<compile_context>
chip_gen: v6e
topology: v6e:2x2x1
jax: 0.10.0
libtpu: 0.0.40
codegen_flags: <defaults>
</compile_context>

<pallas_src>
import functools

import jax
import jax.numpy as jnp
from jax import lax
from jax.experimental import pallas as pl
from jax.experimental.pallas import tpu as pltpu

# Hyper-parameters mirroring RefineMultiBoxLoss.__init__ defaults
NEG_IOU_THRESHOLD = 0.5
POS_IOU_THRESHOLD = 0.5
VARIANCES = (0.1, 0.2)      # Config.CFG['variances'] in the reference repo
FOCAL_ALPHA = 0.1
FOCAL_GAMMA = 2.0           # TODO(synk): FocalLoss class body is not given; RetinaNet-style
                            #             (gamma=2, alpha on foreground) convention assumed.
NUM_CLASSES = 2             # is_solve_odm=False -> binary ARM branch
LANE = 128
TGT_STRIDE = 10             # [label, x0, y0, x1, y1, area, cx, cy, logw, logh] per GT


def _huber(d):
    ad = jnp.abs(d)
    return jnp.where(ad < 1.0, 0.5 * d * d, ad - 0.5)


def _refine_loss_kernel(tgt_ref, pa_ref, lc_ref, out_ref, *,
                        batch_tile, num_objects, neg_thr, pos_thr,
                        inv_var1, alpha, gamma):
    grp = pl.program_id(0)
    S = pa_ref.shape[1]
    L = pa_ref.shape[2]
    unroll = max(1, min(num_objects, 8))

    # --- batch-invariant prior quantities (precomputed in wrapper, resident in VMEM) ---
    px0 = pa_ref[0]
    py0 = pa_ref[1]
    px1 = pa_ref[2]
    py1 = pa_ref[3]
    area_p = pa_ref[4]
    pcx = pa_ref[5]
    pcy = pa_ref[6]
    inv_v0w = pa_ref[7]        # 1 / (var0 * pw)
    inv_v0h = pa_ref[8]        # 1 / (var0 * ph)
    log_pw = pa_ref[9]
    log_ph = pa_ref[10]
    pvalid = pa_ref[11] > 0.5  # real (non-padded) prior lanes

    # linear prior index for the "best prior per GT" argmin tie-break
    lin = (lax.broadcasted_iota(jnp.int32, (S, L), 0) * L
           + lax.broadcasted_iota(jnp.int32, (S, L), 1))
    big_idx = jnp.int32(S * L)
    lane1 = lax.broadcasted_iota(jnp.int32, (1, L), 1)

    for b_loc in range(batch_tile):
        base = (grp * batch_tile + b_loc) * (num_objects * TGT_STRIDE)

        loc0 = lc_ref[b_loc, 0]
        loc1 = lc_ref[b_loc, 1]
        loc2 = lc_ref[b_loc, 2]
        loc3 = lc_ref[b_loc, 3]
        cl0 = lc_ref[b_loc, 4]
        cl1 = lc_ref[b_loc, 5]

        # --- refine_match: sequential pass over GT boxes, 3-array carry only ---
        def match_body(j, carry):
            best_ov, best_idx, forced_idx = carry
            off = base + j * TGT_STRIDE
            lab_j = tgt_ref[off + 0]
            tx0_j = tgt_ref[off + 1]
            ty0_j = tgt_ref[off + 2]
            tx1_j = tgt_ref[off + 3]
            ty1_j = tgt_ref[off + 4]
            area_t = tgt_ref[off + 5]
            valid_j = lab_j > 0.0              # padded GT rows carry label 0

            iw = jnp.maximum(jnp.minimum(tx1_j, px1) - jnp.maximum(tx0_j, px0), 0.0)
            ih = jnp.maximum(jnp.minimum(ty1_j, py1) - jnp.maximum(ty0_j, py0), 0.0)
            inter = iw * ih
            denom = jnp.maximum(area_t + area_p - inter, 1e-12)
            ov = inter * pl.reciprocal(denom, approx=True)
            ov = jnp.where(valid_j, ov, -1.0)

            # running best-GT-per-prior (first max wins); carried chain = cmp + 2 selects
            plain = ov > best_ov
            best_ov = jnp.where(plain, ov, best_ov)
            best_idx = jnp.where(plain, j, best_idx)

            # best prior for this GT (first-max tie break); NOT on the carried chain
            ov_max = jnp.max(ov)
            amin = jnp.min(jnp.where(ov >= ov_max, lin, big_idx))
            force = jnp.logical_and(lin == amin, valid_j)
            forced_idx = jnp.where(force, j, forced_idx)
            return best_ov, best_idx, forced_idx

        init = (jnp.full((S, L), -1.0, jnp.float32),
                jnp.zeros((S, L), jnp.int32),
                jnp.full((S, L), -1, jnp.int32))
        best_ov, best_idx, forced_idx = lax.fori_loop(
            0, num_objects, match_body, init, unroll=unroll)

        # apply the "force best prior for each GT" fixup once (last forcing GT wins)
        forced = forced_idx >= 0
        final_ov = jnp.where(forced, 2.0, best_ov)
        final_idx = jnp.where(forced, forced_idx, best_idx)

        # thresholding (with default equal thresholds the ignore band is empty);
        # any prior with final_ov >= pos_thr is matched to a real GT (label > 0).
        pos = jnp.logical_and(final_ov >= pos_thr, pvalid)
        not_ignored = jnp.logical_or(final_ov < neg_thr, final_ov >= pos_thr)
        valid = jnp.logical_and(not_ignored, pvalid)
        posf = pos.astype(jnp.float32)

        # --- rebuild matched-GT encode scalars from final_idx (cheap select pass) ---
        def recon_body(j, carry):
            m_cx, m_cy, m_lw, m_lh = carry
            off = base + j * TGT_STRIDE
            cx_j = tgt_ref[off + 6]
            cy_j = tgt_ref[off + 7]
            lw_j = tgt_ref[off + 8]
            lh_j = tgt_ref[off + 9]
            sel = final_idx == j
            m_cx = jnp.where(sel, cx_j, m_cx)
            m_cy = jnp.where(sel, cy_j, m_cy)
            m_lw = jnp.where(sel, lw_j, m_lw)
            m_lh = jnp.where(sel, lh_j, m_lh)
            return m_cx, m_cy, m_lw, m_lh

        zeros = jnp.zeros((S, L), jnp.float32)
        m_cx, m_cy, m_lw, m_lh = lax.fori_loop(
            0, num_objects, recon_body, (zeros, zeros, zeros, zeros), unroll=unroll)

        # --- encode(matched, priors, variances) + smooth-L1 over positives (fused) ---
        g_cx = (m_cx - pcx) * inv_v0w
        g_cy = (m_cy - pcy) * inv_v0h
        g_w = (m_lw - log_pw) * inv_var1
        g_h = (m_lh - log_ph) * inv_var1
        loc_sum = jnp.sum(posf * (_huber(loc0 - g_cx) + _huber(loc1 - g_cy)
                                  + _huber(loc2 - g_w) + _huber(loc3 - g_h)))
        pos_cnt = jnp.sum(posf)

        # --- focal loss over binary ARM confidences (target 1 for pos, 0 otherwise) ---
        z = jnp.where(pos, cl0 - cl1, cl1 - cl0)
        # logpt = log p_target = -softplus(z)   (stable softplus)
        logpt = -(jnp.maximum(z, 0.0) + jnp.log(1.0 + jnp.exp(-jnp.abs(z))))
        pt = jnp.exp(logpt)
        alpha_t = jnp.where(pos, alpha, 1.0 - alpha)
        if gamma == 2.0:
            mod = (1.0 - pt) * (1.0 - pt)
        else:
            mod = jnp.power(1.0 - pt, gamma)
        focal = -alpha_t * mod * logpt
        conf_sum = jnp.sum(jnp.where(valid, focal, 0.0))
        valid_cnt = jnp.sum(valid.astype(jnp.float32))

        # per-image partials in the first 4 lanes of a lane-dense (1, 128) output row
        row = jnp.where(lane1 == 0, loc_sum,
              jnp.where(lane1 == 1, pos_cnt,
              jnp.where(lane1 == 2, conf_sum,
              jnp.where(lane1 == 3, valid_cnt, 0.0))))
        out_ref[b_loc] = row


def _pick_batch_tile(B, P_pad):
    """Images per grid step: big enough to amortize per-step overhead, small enough
    that double-buffered blocks stay well under v7x's scoped VMEM, and leaving >= 2
    grid steps (when B >= 2) so the 'parallel' batch axis can split across TCs."""
    per_img_bytes = 6 * P_pad * 4
    budget = 4 << 20
    cap = max(1, budget // per_img_bytes)
    if B >= 2:
        cap = min(cap, max(1, B // 2))
    bt = 1
    for d in range(1, min(cap, B) + 1):
        if B % d == 0:
            bt = d
    return bt


def refine_multibox_loss(loc_data, conf_data, priors, targets):
    """loc_data (B,P,4), conf_data (B,P,2) [ARM branch], priors (P,4) center form,
    targets (B,O,5) = [label, xmin, ymin, xmax, ymax] (padded rows: label<=0).
    Returns (loss_l, loss_c)."""
    B, P, _ = loc_data.shape
    O = targets.shape[1]
    P_pad = ((P + LANE - 1) // LANE) * LANE
    S = P_pad // LANE
    pad = P_pad - P
    v0, v1 = VARIANCES

    # --- batch-invariant augmented priors (hoisted out of the per-image loop) ---
    pf = priors.astype(jnp.float32)
    pcx, pcy, pw, ph = pf[:, 0], pf[:, 1], pf[:, 2], pf[:, 3]
    px0 = pcx - 0.5 * pw
    py0 = pcy - 0.5 * ph
    px1 = pcx + 0.5 * pw
    py1 = pcy + 0.5 * ph
    area_p = (px1 - px0) * (py1 - py0)
    aug = jnp.stack([px0, py0, px1, py1, area_p, pcx, pcy,
                     1.0 / (v0 * pw), 1.0 / (v0 * ph),
                     jnp.log(pw), jnp.log(ph),
                     jnp.ones_like(pw)], axis=0)                       # (12, P)
    if pad:
        # far-away dummy boxes, validity mask 0 -> never positive / never counted
        pad_col = jnp.array([-1000.0, -1000.0, -999.0, -999.0, 1.0, 0.0, 0.0,
                             1.0, 1.0, 0.0, 0.0, 0.0], jnp.float32)[:, None]
        aug = jnp.concatenate([aug, jnp.tile(pad_col, (1, pad))], axis=1)
    priors_aug = aug.reshape(12, S, LANE)

    # --- combined loc+conf, channel-major lane-dense tiles: (B, 6, S, LANE) ---
    lc = jnp.concatenate([loc_data.astype(jnp.float32),
                          conf_data.astype(jnp.float32)], axis=2)      # (B, P, 6)
    lc = jnp.transpose(lc, (0, 2, 1))                                  # (B, 6, P)
    if pad:
        lc = jnp.pad(lc, ((0, 0), (0, 0), (0, pad)))
    lc_t = lc.reshape(B, 6, S, LANE)

    # --- per-GT scalar table for SMEM (derived scalars hoisted out of the kernel) ---
    tf = targets.astype(jnp.float32)
    lab = tf[..., 0]
    tx0, ty0, tx1, ty1 = tf[..., 1], tf[..., 2], tf[..., 3], tf[..., 4]
    tw = jnp.maximum(tx1 - tx0, 1e-12)
    th = jnp.maximum(ty1 - ty0, 1e-12)
    tgt_tab = jnp.stack([lab, tx0, ty0, tx1, ty1,
                         (tx1 - tx0) * (ty1 - ty0),
                         0.5 * (tx0 + tx1), 0.5 * (ty0 + ty1),
                         jnp.log(tw), jnp.log(th)], axis=-1)           # (B, O, 10)
    tgt_flat = tgt_tab.reshape(-1)                                     # -> SMEM

    Bt = _pick_batch_tile(B, P_pad)
    grid = (B // Bt,)

    kernel = functools.partial(
        _refine_loss_kernel,
        batch_tile=Bt, num_objects=O,
        neg_thr=NEG_IOU_THRESHOLD, pos_thr=POS_IOU_THRESHOLD,
        inv_var1=1.0 / v1,
        alpha=FOCAL_ALPHA, gamma=FOCAL_GAMMA)

    partials = pl.pallas_call(
        kernel,
        out_shape=jax.ShapeDtypeStruct((B, 1, LANE), jnp.float32),
        grid=grid,
        in_specs=[
            pl.BlockSpec(memory_space=pltpu.SMEM),                     # targets (flat, resident)
            pl.BlockSpec((12, S, LANE), lambda g: (0, 0, 0)),          # priors (resident)
            pl.BlockSpec((Bt, 6, S, LANE), lambda g: (g, 0, 0, 0)),    # loc+conf block
        ],
        out_specs=pl.BlockSpec((Bt, 1, LANE), lambda g: (g, 0, 0)),
        compiler_params=pltpu.CompilerParams(
            dimension_semantics=("parallel",),
            allow_input_fusion=[False, False, True]),
    )(tgt_flat, priors_aug, lc_t)

    sums = jnp.sum(partials[:, 0, :4], axis=0)
    loc_sum, pos_cnt, conf_sum, valid_cnt = sums[0], sums[1], sums[2], sums[3]
    # smooth_l1_loss(reduction='mean') over the (num_pos, 4) selected tensor; 0 if no positives
    loss_l = jnp.where(pos_cnt > 0, loc_sum / jnp.maximum(4.0 * pos_cnt, 1.0), 0.0)
    # focal_loss(reduction='mean') over all non-ignored priors
    loss_c = conf_sum / jnp.maximum(valid_cnt, 1.0)
    # TODO(synk): hard-negative-mining branch (neg_ratio_to_pos != -1) and the
    #             is_solve_odm=True (ODM + ARM-decoded priors) path are not implemented.
    # TODO(synk): for very large prior sets add a prior-chunk grid axis ("arbitrary")
    #             with VMEM partial-sum scratch to bound the match-loop working set.
    return loss_l, loss_c


if __name__ == "__main__":
    # Small, deterministic example shapes
    B, P, O = 2, 1024, 8
    N_REAL = 6   # last O - N_REAL GT slots per image are padding (label 0, zero box)

    key = jax.random.PRNGKey(0)
    k1, k2, k3, k4, k5, k6 = jax.random.split(key, 6)

    # priors in center form (cx, cy, w, h)
    pc = jax.random.uniform(k1, (P, 2), minval=0.2, maxval=0.8)
    pwh = jax.random.uniform(k2, (P, 2), minval=0.05, maxval=0.3)
    priors = jnp.concatenate([pc, pwh], axis=1)                          # (P, 4)

    # ground-truth targets: [label, xmin, ymin, xmax, ymax]; padded rows all-zero
    tc = jax.random.uniform(k3, (B, O, 2), minval=0.25, maxval=0.75)
    twh = jax.random.uniform(k4, (B, O, 2), minval=0.1, maxval=0.35)
    tmin = tc - 0.5 * twh
    tmax = tc + 0.5 * twh
    labels = jnp.ones((B, O, 1), dtype=jnp.float32)
    targets = jnp.concatenate([labels, tmin, tmax], axis=2)              # (B, O, 5)
    obj_mask = (jnp.arange(O) < N_REAL).astype(jnp.float32)[None, :, None]
    targets = targets * obj_mask

    # ARM predictions (is_solve_odm=False path uses the ARM branch)
    arm_loc = 0.1 * jax.random.normal(k5, (B, P, 4), dtype=jnp.float32)
    arm_conf = jax.random.normal(k6, (B, P, NUM_CLASSES), dtype=jnp.float32)

    loss_l, loss_c = refine_multibox_loss(arm_loc, arm_conf, priors, targets)
    loss_l, loss_c = jax.block_until_ready((loss_l, loss_c))

    print("loss_l =", float(loss_l), " loss_c =", float(loss_c))
    assert jnp.isfinite(loss_l) and jnp.isfinite(loss_c)
    print("KERNEL_OK")
</pallas_src>

<mosaic_0001>
module attributes {stable_mosaic.version = 11 : i64} {
  func.func @_refine_loss_kernel(%arg0: i32, %arg1: memref<160xf32, #tpu.memory_space<smem>>, %arg2: memref<12x8x128xf32, #tpu.memory_space<vmem>>, %arg3: memref<1x6x8x128xf32, #tpu.memory_space<vmem>>, %arg4: memref<1x1x128xf32, #tpu.memory_space<vmem>>) attributes {dimension_semantics = [#tpu.dimension_semantics<parallel>], iteration_bounds = array<i64: 2>, scalar_prefetch = 0 : i64, scratch_operands = 0 : i64, tpu.core_type = #tpu.core_type<tc>, window_params = [{transform_indices = @transform_0, window_bounds = array<i64: 160>}, {pipeline_mode = #tpu.pipeline_mode<synchronous>, transform_indices = @transform_1, window_bounds = array<i64: 12, 8, 128>}, {transform_indices = @transform_2, window_bounds = array<i64: 1, 6, 8, 128>}, {transform_indices = @transform_3, window_bounds = array<i64: 1, 1, 128>}]} {
    %c0 = arith.constant 0 : index
    %c0_0 = arith.constant 0 : index
    %c0_1 = arith.constant 0 : index
    %0 = vector.load %arg2[%c0, %c0_0, %c0_1] : memref<12x8x128xf32, #tpu.memory_space<vmem>>, vector<1x8x128xf32>
    %1 = vector.shape_cast %0 : vector<1x8x128xf32> to vector<8x128xf32>
    %c1 = arith.constant 1 : index
    %c0_2 = arith.constant 0 : index
    %c0_3 = arith.constant 0 : index
    %2 = vector.load %arg2[%c1, %c0_2, %c0_3] : memref<12x8x128xf32, #tpu.memory_space<vmem>>, vector<1x8x128xf32>
    %3 = vector.shape_cast %2 : vector<1x8x128xf32> to vector<8x128xf32>
    %c2 = arith.constant 2 : index
    %c0_4 = arith.constant 0 : index
    %c0_5 = arith.constant 0 : index
    %4 = vector.load %arg2[%c2, %c0_4, %c0_5] : memref<12x8x128xf32, #tpu.memory_space<vmem>>, vector<1x8x128xf32>
    %5 = vector.shape_cast %4 : vector<1x8x128xf32> to vector<8x128xf32>
    %c3 = arith.constant 3 : index
    %c0_6 = arith.constant 0 : index
    %c0_7 = arith.constant 0 : index
    %6 = vector.load %arg2[%c3, %c0_6, %c0_7] : memref<12x8x128xf32, #tpu.memory_space<vmem>>, vector<1x8x128xf32>
    %7 = vector.shape_cast %6 : vector<1x8x128xf32> to vector<8x128xf32>
    %c4 = arith.constant 4 : index
    %c0_8 = arith.constant 0 : index
    %c0_9 = arith.constant 0 : index
    %8 = vector.load %arg2[%c4, %c0_8, %c0_9] : memref<12x8x128xf32, #tpu.memory_space<vmem>>, vector<1x8x128xf32>
    %9 = vector.shape_cast %8 : vector<1x8x128xf32> to vector<8x128xf32>
    %c5 = arith.constant 5 : index
    %c0_10 = arith.constant 0 : index
    %c0_11 = arith.constant 0 : index
    %10 = vector.load %arg2[%c5, %c0_10, %c0_11] : memref<12x8x128xf32, #tpu.memory_space<vmem>>, vector<1x8x128xf32>
    %11 = vector.shape_cast %10 : vector<1x8x128xf32> to vector<8x128xf32>
    %c6 = arith.constant 6 : index
    %c0_12 = arith.constant 0 : index
    %c0_13 = arith.constant 0 : index
    %12 = vector.load %arg2[%c6, %c0_12, %c0_13] : memref<12x8x128xf32, #tpu.memory_space<vmem>>, vector<1x8x128xf32>
    %13 = vector.shape_cast %12 : vector<1x8x128xf32> to vector<8x128xf32>
    %c7 = arith.constant 7 : index
    %c0_14 = arith.constant 0 : index
    %c0_15 = arith.constant 0 : index
    %14 = vector.load %arg2[%c7, %c0_14, %c0_15] : memref<12x8x128xf32, #tpu.memory_space<vmem>>, vector<1x8x128xf32>
    %15 = vector.shape_cast %14 : vector<1x8x128xf32> to vector<8x128xf32>
    %c8 = arith.constant 8 : index
    %c0_16 = arith.constant 0 : index
    %c0_17 = arith.constant 0 : index
    %16 = vector.load %arg2[%c8, %c0_16, %c0_17] : memref<12x8x128xf32, #tpu.memory_space<vmem>>, vector<1x8x128xf32>
    %17 = vector.shape_cast %16 : vector<1x8x128xf32> to vector<8x128xf32>
    %c9 = arith.constant 9 : index
    %c0_18 = arith.constant 0 : index
    %c0_19 = arith.constant 0 : index
    %18 = vector.load %arg2[%c9, %c0_18, %c0_19] : memref<12x8x128xf32, #tpu.memory_space<vmem>>, vector<1x8x128xf32>
    %19 = vector.shape_cast %18 : vector<1x8x128xf32> to vector<8x128xf32>
    %c10 = arith.constant 10 : index
    %c0_20 = arith.constant 0 : index
    %c0_21 = arith.constant 0 : index
    %20 = vector.load %arg2[%c10, %c0_20, %c0_21] : memref<12x8x128xf32, #tpu.memory_space<vmem>>, vector<1x8x128xf32>
    %21 = vector.shape_cast %20 : vector<1x8x128xf32> to vector<8x128xf32>
    %c11 = arith.constant 11 : index
    %c0_22 = arith.constant 0 : index
    %c0_23 = arith.constant 0 : index
    %22 = vector.load %arg2[%c11, %c0_22, %c0_23] : memref<12x8x128xf32, #tpu.memory_space<vmem>>, vector<1x8x128xf32>
    %23 = vector.shape_cast %22 : vector<1x8x128xf32> to vector<8x128xf32>
    %cst = arith.constant 5.000000e-01 : f32
    %24 = vector.broadcast %cst : f32 to vector<8x128xf32>
    %25 = arith.cmpf ogt, %23, %24 : vector<8x128xf32>
    %26 = tpu.iota {dimensions = array<i32: 0>} : vector<8x128xi32>
    %c128_i32 = arith.constant 128 : i32
    %27 = vector.broadcast %c128_i32 : i32 to vector<8x128xi32>
    %28 = arith.muli %26, %27 : vector<8x128xi32>
    %29 = tpu.iota {dimensions = array<i32: 1>} : vector<8x128xi32>
    %30 = arith.addi %28, %29 : vector<8x128xi32>
    %31 = tpu.iota {dimensions = array<i32: 1>} : vector<1x128xi32>
    %c1_i32 = arith.constant 1 : i32
    %32 = arith.muli %arg0, %c1_i32 : i32
    %c0_i32 = arith.constant 0 : i32
    %33 = arith.addi %32, %c0_i32 : i32
    %c80_i32 = arith.constant 80 : i32
    %34 = arith.muli %33, %c80_i32 : i32
    %c0_24 = arith.constant 0 : index
    %c0_25 = arith.constant 0 : index
    %c0_26 = arith.constant 0 : index
    %c0_27 = arith.constant 0 : index
    %35 = vector.load %arg3[%c0_24, %c0_25, %c0_26, %c0_27] : memref<1x6x8x128xf32, #tpu.memory_space<vmem>>, vector<1x1x8x128xf32>
    %36 = vector.shape_cast %35 : vector<1x1x8x128xf32> to vector<8x128xf32>
    %c0_28 = arith.constant 0 : index
    %c1_29 = arith.constant 1 : index
    %c0_30 = arith.constant 0 : index
    %c0_31 = arith.constant 0 : index
    %37 = vector.load %arg3[%c0_28, %c1_29, %c0_30, %c0_31] : memref<1x6x8x128xf32, #tpu.memory_space<vmem>>, vector<1x1x8x128xf32>
    %38 = vector.shape_cast %37 : vector<1x1x8x128xf32> to vector<8x128xf32>
    %c0_32 = arith.constant 0 : index
    %c2_33 = arith.constant 2 : index
    %c0_34 = arith.constant 0 : index
    %c0_35 = arith.constant 0 : index
    %39 = vector.load %arg3[%c0_32, %c2_33, %c0_34, %c0_35] : memref<1x6x8x128xf32, #tpu.memory_space<vmem>>, vector<1x1x8x128xf32>
    %40 = vector.shape_cast %39 : vector<1x1x8x128xf32> to vector<8x128xf32>
    %c0_36 = arith.constant 0 : index
    %c3_37 = arith.constant 3 : index
    %c0_38 = arith.constant 0 : index
    %c0_39 = arith.constant 0 : index
    %41 = vector.load %arg3[%c0_36, %c3_37, %c0_38, %c0_39] : memref<1x6x8x128xf32, #tpu.memory_space<vmem>>, vector<1x1x8x128xf32>
    %42 = vector.shape_cast %41 : vector<1x1x8x128xf32> to vector<8x128xf32>
    %c0_40 = arith.constant 0 : index
    %c4_41 = arith.constant 4 : index
    %c0_42 = arith.constant 0 : index
    %c0_43 = arith.constant 0 : index
    %43 = vector.load %arg3[%c0_40, %c4_41, %c0_42, %c0_43] : memref<1x6x8x128xf32, #tpu.memory_space<vmem>>, vector<1x1x8x128xf32>
    %44 = vector.shape_cast %43 : vector<1x1x8x128xf32> to vector<8x128xf32>
    %c0_44 = arith.constant 0 : index
    %c5_45 = arith.constant 5 : index
    %c0_46 = arith.constant 0 : index
    %c0_47 = arith.constant 0 : index
    %45 = vector.load %arg3[%c0_44, %c5_45, %c0_46, %c0_47] : memref<1x6x8x128xf32, #tpu.memory_space<vmem>>, vector<1x1x8x128xf32>
    %46 = vector.shape_cast %45 : vector<1x1x8x128xf32> to vector<8x128xf32>
    %cst_48 = arith.constant -1.000000e+00 : f32
    %47 = vector.broadcast %cst_48 : f32 to vector<8x128xf32>
    %c0_i32_49 = arith.constant 0 : i32
    %48 = vector.broadcast %c0_i32_49 : i32 to vector<8x128xi32>
    %c-1_i32 = arith.constant -1 : i32
    %49 = vector.broadcast %c-1_i32 : i32 to vector<8x128xi32>
    %c1024_i32 = arith.constant 1024 : i32
    %c0_i32_50 = arith.constant 0 : i32
    %c10_i32 = arith.constant 10 : i32
    %50 = arith.muli %c0_i32_50, %c10_i32 : i32
    %51 = arith.addi %34, %50 : i32
    %c0_i32_51 = arith.constant 0 : i32
    %52 = arith.addi %51, %c0_i32_51 : i32
    %53 = arith.index_cast %52 : i32 to index
    %54 = memref.load %arg1[%53] : memref<160xf32, #tpu.memory_space<smem>>
    %c1_i32_52 = arith.constant 1 : i32
    %55 = arith.addi %51, %c1_i32_52 : i32
    %56 = arith.index_cast %55 : i32 to index
    %57 = memref.load %arg1[%56] : memref<160xf32, #tpu.memory_space<smem>>
    %c2_i32 = arith.constant 2 : i32
    %58 = arith.addi %51, %c2_i32 : i32
    %59 = arith.index_cast %58 : i32 to index
    %60 = memref.load %arg1[%59] : memref<160xf32, #tpu.memory_space<smem>>
    %c3_i32 = arith.constant 3 : i32
    %61 = arith.addi %51, %c3_i32 : i32
    %62 = arith.index_cast %61 : i32 to index
    %63 = memref.load %arg1[%62] : memref<160xf32, #tpu.memory_space<smem>>
    %c4_i32 = arith.constant 4 : i32
    %64 = arith.addi %51, %c4_i32 : i32
    %65 = arith.index_cast %64 : i32 to index
    %66 = memref.load %arg1[%65] : memref<160xf32, #tpu.memory_space<smem>>
    %c5_i32 = arith.constant 5 : i32
    %67 = arith.addi %51, %c5_i32 : i32
    %68 = arith.index_cast %67 : i32 to index
    %69 = memref.load %arg1[%68] : memref<160xf32, #tpu.memory_space<smem>>
    %cst_53 = arith.constant 0.000000e+00 : f32
    %70 = arith.cmpf ogt, %54, %cst_53 : f32
    %71 = vector.broadcast %63 : f32 to vector<8x128xf32>
    %72 = arith.minimumf %71, %5 : vector<8x128xf32>
    %73 = vector.broadcast %57 : f32 to vector<8x128xf32>
    %74 = arith.maximumf %73, %1 : vector<8x128xf32>
    %75 = arith.subf %72, %74 : vector<8x128xf32>
    %cst_54 = arith.constant 0.000000e+00 : f32
    %76 = vector.broadcast %cst_54 : f32 to vector<8x128xf32>
    %77 = arith.maximumf %75, %76 : vector<8x128xf32>
    %78 = vector.broadcast %66 : f32 to vector<8x128xf32>
    %79 = arith.minimumf %78, %7 : vector<8x128xf32>
    %80 = vector.broadcast %60 : f32 to vector<8x128xf32>
    %81 = arith.maximumf %80, %3 : vector<8x128xf32>
    %82 = arith.subf %79, %81 : vector<8x128xf32>
    %cst_55 = arith.constant 0.000000e+00 : f32
    %83 = vector.broadcast %cst_55 : f32 to vector<8x128xf32>
    %84 = arith.maximumf %82, %83 : vector<8x128xf32>
    %85 = arith.mulf %77, %84 : vector<8x128xf32>
    %86 = vector.broadcast %69 : f32 to vector<8x128xf32>
    %87 = arith.addf %86, %9 : vector<8x128xf32>
    %88 = arith.subf %87, %85 : vector<8x128xf32>
    %cst_56 = arith.constant 9.99999996E-13 : f32
    %89 = vector.broadcast %cst_56 : f32 to vector<8x128xf32>
    %90 = arith.maximumf %88, %89 : vector<8x128xf32>
    %91 = tpu.reciprocal %90 {approx = true} : vector<8x128xf32> -> vector<8x128xf32>
    %92 = arith.mulf %85, %91 : vector<8x128xf32>
    %cst_57 = arith.constant -1.000000e+00 : f32
    %93 = vector.broadcast %cst_57 : f32 to vector<8x128xf32>
    %94 = arith.select %70, %92, %93 : vector<8x128xf32>
    %95 = arith.cmpf ogt, %94, %47 : vector<8x128xf32>
    %96 = arith.select %95, %94, %47 : vector<8x128xi1>, vector<8x128xf32>
    %97 = vector.broadcast %c0_i32_50 : i32 to vector<8x128xi32>
    %98 = arith.select %95, %97, %48 : vector<8x128xi1>, vector<8x128xi32>
    %99 = vector.shape_cast %94 : vector<8x128xf32> to vector<1x8x128xf32>
    %cst_58 = arith.constant dense<0xFF800000> : vector<1xf32>
    %100 = vector.multi_reduction <maximumf>, %99, %cst_58 [1, 2] : vector<1x8x128xf32> to vector<1xf32>
    %101 = vector.shape_cast %100 : vector<1xf32> to vector<1x1x1xf32>
    %102 = vector.extract %101[0, 0, 0] : f32 from vector<1x1x1xf32>
    %103 = vector.broadcast %102 : f32 to vector<8x128xf32>
    %104 = arith.cmpf oge, %94, %103 : vector<8x128xf32>
    %105 = vector.broadcast %c1024_i32 : i32 to vector<8x128xi32>
    %106 = arith.select %104, %30, %105 : vector<8x128xi1>, vector<8x128xi32>
    %107 = vector.shape_cast %106 : vector<8x128xi32> to vector<1x8x128xi32>
    %cst_59 = arith.constant dense<2147483647> : vector<1xi32>
    %108 = vector.multi_reduction <minsi>, %107, %cst_59 [1, 2] : vector<1x8x128xi32> to vector<1xi32>
    %109 = vector.shape_cast %108 : vector<1xi32> to vector<1x1x1xi32>
    %110 = vector.extract %109[0, 0, 0] : i32 from vector<1x1x1xi32>
    %111 = vector.broadcast %110 : i32 to vector<8x128xi32>
    %112 = arith.cmpi eq, %30, %111 : vector<8x128xi32>
    %113 = vector.broadcast %70 : i1 to vector<8x128xi1>
    %114 = arith.andi %112, %113 : vector<8x128xi1>
    %115 = vector.broadcast %c0_i32_50 : i32 to vector<8x128xi32>
    %116 = arith.select %114, %115, %49 : vector<8x128xi1>, vector<8x128xi32>
    %c1_i32_60 = arith.constant 1 : i32
    %c10_i32_61 = arith.constant 10 : i32
    %117 = arith.muli %c1_i32_60, %c10_i32_61 : i32
    %118 = arith.addi %34, %117 : i32
    %c0_i32_62 = arith.constant 0 : i32
    %119 = arith.addi %118, %c0_i32_62 : i32
    %120 = arith.index_cast %119 : i32 to index
    %121 = memref.load %arg1[%120] : memref<160xf32, #tpu.memory_space<smem>>
    %c1_i32_63 = arith.constant 1 : i32
    %122 = arith.addi %118, %c1_i32_63 : i32
    %123 = arith.index_cast %122 : i32 to index
    %124 = memref.load %arg1[%123] : memref<160xf32, #tpu.memory_space<smem>>
    %c2_i32_64 = arith.constant 2 : i32
    %125 = arith.addi %118, %c2_i32_64 : i32
    %126 = arith.index_cast %125 : i32 to index
    %127 = memref.load %arg1[%126] : memref<160xf32, #tpu.memory_space<smem>>
    %c3_i32_65 = arith.constant 3 : i32
    %128 = arith.addi %118, %c3_i32_65 : i32
    %129 = arith.index_cast %128 : i32 to index
    %130 = memref.load %arg1[%129] : memref<160xf32, #tpu.memory_space<smem>>
    %c4_i32_66 = arith.constant 4 : i32
    %131 = arith.addi %118, %c4_i32_66 : i32
    %132 = arith.index_cast %131 : i32 to index
    %133 = memref.load %arg1[%132] : memref<160xf32, #tpu.memory_space<smem>>
    %c5_i32_67 = arith.constant 5 : i32
    %134 = arith.addi %118, %c5_i32_67 : i32
    %135 = arith.index_cast %134 : i32 to index
    %136 = memref.load %arg1[%135] : memref<160xf32, #tpu.memory_space<smem>>
    %cst_68 = arith.constant 0.000000e+00 : f32
    %137 = arith.cmpf ogt, %121, %cst_68 : f32
    %138 = vector.broadcast %130 : f32 to vector<8x128xf32>
    %139 = arith.minimumf %138, %5 : vector<8x128xf32>
    %140 = vector.broadcast %124 : f32 to vector<8x128xf32>
    %141 = arith.maximumf %140, %1 : vector<8x128xf32>
    %142 = arith.subf %139, %141 : vector<8x128xf32>
    %cst_69 = arith.constant 0.000000e+00 : f32
    %143 = vector.broadcast %cst_69 : f32 to vector<8x128xf32>
    %144 = arith.maximumf %142, %143 : vector<8x128xf32>
    %145 = vector.broadcast %133 : f32 to vector<8x128xf32>
    %146 = arith.minimumf %145, %7 : vector<8x128xf32>
    %147 = vector.broadcast %127 : f32 to vector<8x128xf32>
    %148 = arith.maximumf %147, %3 : vector<8x128xf32>
    %149 = arith.subf %146, %148 : vector<8x128xf32>
    %cst_70 = arith.constant 0.000000e+00 : f32
    %150 = vector.broadcast %cst_70 : f32 to vector<8x128xf32>
    %151 = arith.maximumf %149, %150 : vector<8x128xf32>
    %152 = arith.mulf %144, %151 : vector<8x128xf32>
    %153 = vector.broadcast %136 : f32 to vector<8x128xf32>
    %154 = arith.addf %153, %9 : vector<8x128xf32>
    %155 = arith.subf %154, %152 : vector<8x128xf32>
    %cst_71 = arith.constant 9.99999996E-13 : f32
    %156 = vector.broadcast %cst_71 : f32 to vector<8x128xf32>
    %157 = arith.maximumf %155, %156 : vector<8x128xf32>
    %158 = tpu.reciprocal %157 {approx = true} : vector<8x128xf32> -> vector<8x128xf32>
    %159 = arith.mulf %152, %158 : vector<8x128xf32>
    %cst_72 = arith.constant -1.000000e+00 : f32
    %160 = vector.broadcast %cst_72 : f32 to vector<8x128xf32>
    %161 = arith.select %137, %159, %160 : vector<8x128xf32>
    %162 = arith.cmpf ogt, %161, %96 : vector<8x128xf32>
    %163 = arith.select %162, %161, %96 : vector<8x128xi1>, vector<8x128xf32>
    %164 = vector.broadcast %c1_i32_60 : i32 to vector<8x128xi32>
    %165 = arith.select %162, %164, %98 : vector<8x128xi1>, vector<8x128xi32>
    %166 = vector.shape_cast %161 : vector<8x128xf32> to vector<1x8x128xf32>
    %cst_73 = arith.constant dense<0xFF800000> : vector<1xf32>
    %167 = vector.multi_reduction <maximumf>, %166, %cst_73 [1, 2] : vector<1x8x128xf32> to vector<1xf32>
    %168 = vector.shape_cast %167 : vector<1xf32> to vector<1x1x1xf32>
    %169 = vector.extract %168[0, 0, 0] : f32 from vector<1x1x1xf32>
    %170 = vector.broadcast %169 : f32 to vector<8x128xf32>
    %171 = arith.cmpf oge, %161, %170 : vector<8x128xf32>
    %172 = vector.broadcast %c1024_i32 : i32 to vector<8x128xi32>
    %173 = arith.select %171, %30, %172 : vector<8x128xi1>, vector<8x128xi32>
    %174 = vector.shape_cast %173 : vector<8x128xi32> to vector<1x8x128xi32>
    %cst_74 = arith.constant dense<2147483647> : vector<1xi32>
    %175 = vector.multi_reduction <minsi>, %174, %cst_74 [1, 2] : vector<1x8x128xi32> to vector<1xi32>
    %176 = vector.shape_cast %175 : vector<1xi32> to vector<1x1x1xi32>
    %177 = vector.extract %176[0, 0, 0] : i32 from vector<1x1x1xi32>
    %178 = vector.broadcast %177 : i32 to vector<8x128xi32>
    %179 = arith.cmpi eq, %30, %178 : vector<8x128xi32>
    %180 = vector.broadcast %137 : i1 to vector<8x128xi1>
    %181 = arith.andi %179, %180 : vector<8x128xi1>
    %182 = vector.broadcast %c1_i32_60 : i32 to vector<8x128xi32>
    %183 = arith.select %181, %182, %116 : vector<8x128xi1>, vector<8x128xi32>
    %c2_i32_75 = arith.constant 2 : i32
    %c10_i32_76 = arith.constant 10 : i32
    %184 = arith.muli %c2_i32_75, %c10_i32_76 : i32
    %185 = arith.addi %34, %184 : i32
    %c0_i32_77 = arith.constant 0 : i32
    %186 = arith.addi %185, %c0_i32_77 : i32
    %187 = arith.index_cast %186 : i32 to index
    %188 = memref.load %arg1[%187] : memref<160xf32, #tpu.memory_space<smem>>
    %c1_i32_78 = arith.constant 1 : i32
    %189 = arith.addi %185, %c1_i32_78 : i32
    %190 = arith.index_cast %189 : i32 to index
    %191 = memref.load %arg1[%190] : memref<160xf32, #tpu.memory_space<smem>>
    %c2_i32_79 = arith.constant 2 : i32
    %192 = arith.addi %185, %c2_i32_79 : i32
    %193 = arith.index_cast %192 : i32 to index
    %194 = memref.load %arg1[%193] : memref<160xf32, #tpu.memory_space<smem>>
    %c3_i32_80 = arith.constant 3 : i32
    %195 = arith.addi %185, %c3_i32_80 : i32
    %196 = arith.index_cast %195 : i32 to index
    %197 = memref.load %arg1[%196] : memref<160xf32, #tpu.memory_space<smem>>
    %c4_i32_81 = arith.constant 4 : i32
    %198 = arith.addi %185, %c4_i32_81 : i32
    %199 = arith.index_cast %198 : i32 to index
    %200 = memref.load %arg1[%199] : memref<160xf32, #tpu.memory_space<smem>>
    %c5_i32_82 = arith.constant 5 : i32
    %201 = arith.addi %185, %c5_i32_82 : i32
    %202 = arith.index_cast %201 : i32 to index
    %203 = memref.load %arg1[%202] : memref<160xf32, #tpu.memory_space<smem>>
    %cst_83 = arith.constant 0.000000e+00 : f32
    %204 = arith.cmpf ogt, %188, %cst_83 : f32
    %205 = vector.broadcast %197 : f32 to vector<8x128xf32>
    %206 = arith.minimumf %205, %5 : vector<8x128xf32>
    %207 = vector.broadcast %191 : f32 to vector<8x128xf32>
    %208 = arith.maximumf %207, %1 : vector<8x128xf32>
    %209 = arith.subf %206, %208 : vector<8x128xf32>
    %cst_84 = arith.constant 0.000000e+00 : f32
    %210 = vector.broadcast %cst_84 : f32 to vector<8x128xf32>
    %211 = arith.maximumf %209, %210 : vector<8x128xf32>
    %212 = vector.broadcast %200 : f32 to vector<8x128xf32>
    %213 = arith.minimumf %212, %7 : vector<8x128xf32>
    %214 = vector.broadcast %194 : f32 to vector<8x128xf32>
    %215 = arith.maximumf %214, %3 : vector<8x128xf32>
    %216 = arith.subf %213, %215 : vector<8x128xf32>
    %cst_85 = arith.constant 0.000000e+00 : f32
    %217 = vector.broadcast %cst_85 : f32 to vector<8x128xf32>
    %218 = arith.maximumf %216, %217 : vector<8x128xf32>
    %219 = arith.mulf %211, %218 : vector<8x128xf32>
    %220 = vector.broadcast %203 : f32 to vector<8x128xf32>
    %221 = arith.addf %220, %9 : vector<8x128xf32>
    %222 = arith.subf %221, %219 : vector<8x128xf32>
    %cst_86 = arith.constant 9.99999996E-13 : f32
    %223 = vector.broadcast %cst_86 : f32 to vector<8x128xf32>
    %224 = arith.maximumf %222, %223 : vector<8x128xf32>
    %225 = tpu.reciprocal %224 {approx = true} : vector<8x128xf32> -> vector<8x128xf32>
    %226 = arith.mulf %219, %225 : vector<8x128xf32>
    %cst_87 = arith.constant -1.000000e+00 : f32
    %227 = vector.broadcast %cst_87 : f32 to vector<8x128xf32>
    %228 = arith.select %204, %226, %227 : vector<8x128xf32>
    %229 = arith.cmpf ogt, %228, %163 : vector<8x128xf32>
    %230 = arith.select %229, %228, %163 : vector<8x128xi1>, vector<8x128xf32>
    %231 = vector.broadcast %c2_i32_75 : i32 to vector<8x128xi32>
    %232 = arith.select %229, %231, %165 : vector<8x128xi1>, vector<8x128xi32>
    %233 = vector.shape_cast %228 : vector<8x128xf32> to vector<1x8x128xf32>
    %cst_88 = arith.constant dense<0xFF800000> : vector<1xf32>
    %234 = vector.multi_reduction <maximumf>, %233, %cst_88 [1, 2] : vector<1x8x128xf32> to vector<1xf32>
    %235 = vector.shape_cast %234 : vector<1xf32> to vector<1x1x1xf32>
    %236 = vector.extract %235[0, 0, 0] : f32 from vector<1x1x1xf32>
    %237 = vector.broadcast %236 : f32 to vector<8x128xf32>
    %238 = arith.cmpf oge, %228, %237 : vector<8x128xf32>
    %239 = vector.broadcast %c1024_i32 : i32 to vector<8x128xi32>
    %240 = arith.select %238, %30, %239 : vector<8x128xi1>, vector<8x128xi32>
    %241 = vector.shape_cast %240 : vector<8x128xi32> to vector<1x8x128xi32>
    %cst_89 = arith.constant dense<2147483647> : vector<1xi32>
    %242 = vector.multi_reduction <minsi>, %241, %cst_89 [1, 2] : vector<1x8x128xi32> to vector<1xi32>
    %243 = vector.shape_cast %242 : vector<1xi32> to vector<1x1x1xi32>
    %244 = vector.extract %243[0, 0, 0] : i32 from vector<1x1x1xi32>
    %245 = vector.broadcast %244 : i32 to vector<8x128xi32>
    %246 = arith.cmpi eq, %30, %245 : vector<8x128xi32>
    %247 = vector.broadcast %204 : i1 to vector<8x128xi1>
    %248 = arith.andi %246, %247 : vector<8x128xi1>
    %249 = vector.broadcast %c2_i32_75 : i32 to vector<8x128xi32>
    %250 = arith.select %248, %249, %183 : vector<8x128xi1>, vector<8x128xi32>
    %c3_i32_90 = arith.constant 3 : i32
    %c10_i32_91 = arith.constant 10 : i32
    %251 = arith.muli %c3_i32_90, %c10_i32_91 : i32
    %252 = arith.addi %34, %251 : i32
    %c0_i32_92 = arith.constant 0 : i32
    %253 = arith.addi %252, %c0_i32_92 : i32
    %254 = arith.index_cast %253 : i32 to index
    %255 = memref.load %arg1[%254] : memref<160xf32, #tpu.memory_space<smem>>
    %c1_i32_93 = arith.constant 1 : i32
    %256 = arith.addi %252, %c1_i32_93 : i32
    %257 = arith.index_cast %256 : i32 to index
    %258 = memref.load %arg1[%257] : memref<160xf32, #tpu.memory_space<smem>>
    %c2_i32_94 = arith.constant 2 : i32
    %259 = arith.addi %252, %c2_i32_94 : i32
    %260 = arith.index_cast %259 : i32 to index
    %261 = memref.load %arg1[%260] : memref<160xf32, #tpu.memory_space<smem>>
    %c3_i32_95 = arith.constant 3 : i32
    %262 = arith.addi %252, %c3_i32_95 : i32
    %263 = arith.index_cast %262 : i32 to index
    %264 = memref.load %arg1[%263] : memref<160xf32, #tpu.memory_space<smem>>
    %c4_i32_96 = arith.constant 4 : i32
    %265 = arith.addi %252, %c4_i32_96 : i32
    %266 = arith.index_cast %265 : i32 to index
    %267 = memref.load %arg1[%266] : memref<160xf32, #tpu.memory_space<smem>>
    %c5_i32_97 = arith.constant 5 : i32
    %268 = arith.addi %252, %c5_i32_97 : i32
    %269 = arith.index_cast %268 : i32 to index
    %270 = memref.load %arg1[%269] : memref<160xf32, #tpu.memory_space<smem>>
    %cst_98 = arith.constant 0.000000e+00 : f32
    %271 = arith.cmpf ogt, %255, %cst_98 : f32
    %272 = vector.broadcast %264 : f32 to vector<8x128xf32>
    %273 = arith.minimumf %272, %5 : vector<8x128xf32>
    %274 = vector.broadcast %258 : f32 to vector<8x128xf32>
    %275 = arith.maximumf %274, %1 : vector<8x128xf32>
    %276 = arith.subf %273, %275 : vector<8x128xf32>
    %cst_99 = arith.constant 0.000000e+00 : f32
    %277 = vector.broadcast %cst_99 : f32 to vector<8x128xf32>
    %278 = arith.maximumf %276, %277 : vector<8x128xf32>
    %279 = vector.broadcast %267 : f32 to vector<8x128xf32>
    %280 = arith.minimumf %279, %7 : vector<8x128xf32>
    %281 = vector.broadcast %261 : f32 to vector<8x128xf32>
    %282 = arith.maximumf %281, %3 : vector<8x128xf32>
    %283 = arith.subf %280, %282 : vector<8x128xf32>
    %cst_100 = arith.constant 0.000000e+00 : f32
    %284 = vector.broadcast %cst_100 : f32 to vector<8x128xf32>
    %285 = arith.maximumf %283, %284 : vector<8x128xf32>
    %286 = arith.mulf %278, %285 : vector<8x128xf32>
    %287 = vector.broadcast %270 : f32 to vector<8x128xf32>
    %288 = arith.addf %287, %9 : vector<8x128xf32>
    %289 = arith.subf %288, %286 : vector<8x128xf32>
    %cst_101 = arith.constant 9.99999996E-13 : f32
    %290 = vector.broadcast %cst_101 : f32 to vector<8x128xf32>
    %291 = arith.maximumf %289, %290 : vector<8x128xf32>
    %292 = tpu.reciprocal %291 {approx = true} : vector<8x128xf32> -> vector<8x128xf32>
    %293 = arith.mulf %286, %292 : vector<8x128xf32>
    %cst_102 = arith.constant -1.000000e+00 : f32
    %294 = vector.broadcast %cst_102 : f32 to vector<8x128xf32>
    %295 = arith.select %271, %293, %294 : vector<8x128xf32>
    %296 = arith.cmpf ogt, %295, %230 : vector<8x128xf32>
    %297 = arith.select %296, %295, %230 : vector<8x128xi1>, vector<8x128xf32>
    %298 = vector.broadcast %c3_i32_90 : i32 to vector<8x128xi32>
    %299 = arith.select %296, %298, %232 : vector<8x128xi1>, vector<8x128xi32>
    %300 = vector.shape_cast %295 : vector<8x128xf32> to vector<1x8x128xf32>
    %cst_103 = arith.constant dense<0xFF800000> : vector<1xf32>
    %301 = vector.multi_reduction <maximumf>, %300, %cst_103 [1, 2] : vector<1x8x128xf32> to vector<1xf32>
    %302 = vector.shape_cast %301 : vector<1xf32> to vector<1x1x1xf32>
    %303 = vector.extract %302[0, 0, 0] : f32 from vector<1x1x1xf32>
    %304 = vector.broadcast %303 : f32 to vector<8x128xf32>
    %305 = arith.cmpf oge, %295, %304 : vector<8x128xf32>
    %306 = vector.broadcast %c1024_i32 : i32 to vector<8x128xi32>
    %307 = arith.select %305, %30, %306 : vector<8x128xi1>, vector<8x128xi32>
    %308 = vector.shape_cast %307 : vector<8x128xi32> to vector<1x8x128xi32>
    %cst_104 = arith.constant dense<2147483647> : vector<1xi32>
    %309 = vector.multi_reduction <minsi>, %308, %cst_104 [1, 2] : vector<1x8x128xi32> to vector<1xi32>
    %310 = vector.shape_cast %309 : vector<1xi32> to vector<1x1x1xi32>
    %311 = vector.extract %310[0, 0, 0] : i32 from vector<1x1x1xi32>
    %312 = vector.broadcast %311 : i32 to vector<8x128xi32>
    %313 = arith.cmpi eq, %30, %312 : vector<8x128xi32>
    %314 = vector.broadcast %271 : i1 to vector<8x128xi1>
    %315 = arith.andi %313, %314 : vector<8x128xi1>
    %316 = vector.broadcast %c3_i32_90 : i32 to vector<8x128xi32>
    %317 = arith.select %315, %316, %250 : vector<8x128xi1>, vector<8x128xi32>
    %c4_i32_105 = arith.constant 4 : i32
    %c10_i32_106 = arith.constant 10 : i32
    %318 = arith.muli %c4_i32_105, %c10_i32_106 : i32
    %319 = arith.addi %34, %318 : i32
    %c0_i32_107 = arith.constant 0 : i32
    %320 = arith.addi %319, %c0_i32_107 : i32
    %321 = arith.index_cast %320 : i32 to index
    %322 = memref.load %arg1[%321] : memref<160xf32, #tpu.memory_space<smem>>
    %c1_i32_108 = arith.constant 1 : i32
    %323 = arith.addi %319, %c1_i32_108 : i32
    %324 = arith.index_cast %323 : i32 to index
    %325 = memref.load %arg1[%324] : memref<160xf32, #tpu.memory_space<smem>>
    %c2_i32_109 = arith.constant 2 : i32
    %326 = arith.addi %319, %c2_i32_109 : i32
    %327 = arith.index_cast %326 : i32 to index
    %328 = memref.load %arg1[%327] : memref<160xf32, #tpu.memory_space<smem>>
    %c3_i32_110 = arith.constant 3 : i32
    %329 = arith.addi %319, %c3_i32_110 : i32
    %330 = arith.index_cast %329 : i32 to index
    %331 = memref.load %arg1[%330] : memref<160xf32, #tpu.memory_space<smem>>
    %c4_i32_111 = arith.constant 4 : i32
    %332 = arith.addi %319, %c4_i32_111 : i32
    %333 = arith.index_cast %332 : i32 to index
    %334 = memref.load %arg1[%333] : memref<160xf32, #tpu.memory_space<smem>>
    %c5_i32_112 = arith.constant 5 : i32
    %335 = arith.addi %319, %c5_i32_112 : i32
    %336 = arith.index_cast %335 : i32 to index
    %337 = memref.load %arg1[%336] : memref<160xf32, #tpu.memory_space<smem>>
    %cst_113 = arith.constant 0.000000e+00 : f32
    %338 = arith.cmpf ogt, %322, %cst_113 : f32
    %339 = vector.broadcast %331 : f32 to vector<8x128xf32>
    %340 = arith.minimumf %339, %5 : vector<8x128xf32>
    %341 = vector.broadcast %325 : f32 to vector<8x128xf32>
    %342 = arith.maximumf %341, %1 : vector<8x128xf32>
    %343 = arith.subf %340, %342 : vector<8x128xf32>
    %cst_114 = arith.constant 0.000000e+00 : f32
    %344 = vector.broadcast %cst_114 : f32 to vector<8x128xf32>
    %345 = arith.maximumf %343, %344 : vector<8x128xf32>
    %346 = vector.broadcast %334 : f32 to vector<8x128xf32>
    %347 = arith.minimumf %346, %7 : vector<8x128xf32>
    %348 = vector.broadcast %328 : f32 to vector<8x128xf32>
    %349 = arith.maximumf %348, %3 : vector<8x128xf32>
    %350 = arith.subf %347, %349 : vector<8x128xf32>
    %cst_115 = arith.constant 0.000000e+00 : f32
    %351 = vector.broadcast %cst_115 : f32 to vector<8x128xf32>
    %352 = arith.maximumf %350, %351 : vector<8x128xf32>
    %353 = arith.mulf %345, %352 : vector<8x128xf32>
    %354 = vector.broadcast %337 : f32 to vector<8x128xf32>
    %355 = arith.addf %354, %9 : vector<8x128xf32>
    %356 = arith.subf %355, %353 : vector<8x128xf32>
    %cst_116 = arith.constant 9.99999996E-13 : f32
    %357 = vector.broadcast %cst_116 : f32 to vector<8x128xf32>
    %358 = arith.maximumf %356, %357 : vector<8x128xf32>
    %359 = tpu.reciprocal %358 {approx = true} : vector<8x128xf32> -> vector<8x128xf32>
    %360 = arith.mulf %353, %359 : vector<8x128xf32>
    %cst_117 = arith.constant -1.000000e+00 : f32
    %361 = vector.broadcast %cst_117 : f32 to vector<8x128xf32>
    %362 = arith.select %338, %360, %361 : vector<8x128xf32>
    %363 = arith.cmpf ogt, %362, %297 : vector<8x128xf32>
    %364 = arith.select %363, %362, %297 : vector<8x128xi1>, vector<8x128xf32>
    %365 = vector.broadcast %c4_i32_105 : i32 to vector<8x128xi32>
    %366 = arith.select %363, %365, %299 : vector<8x128xi1>, vector<8x128xi32>
    %367 = vector.shape_cast %362 : vector<8x128xf32> to vector<1x8x128xf32>
    %cst_118 = arith.constant dense<0xFF800000> : vector<1xf32>
    %368 = vector.multi_reduction <maximumf>, %367, %cst_118 [1, 2] : vector<1x8x128xf32> to vector<1xf32>
    %369 = vector.shape_cast %368 : vector<1xf32> to vector<1x1x1xf32>
    %370 = vector.extract %369[0, 0, 0] : f32 from vector<1x1x1xf32>
    %371 = vector.broadcast %370 : f32 to vector<8x128xf32>
    %372 = arith.cmpf oge, %362, %371 : vector<8x128xf32>
    %373 = vector.broadcast %c1024_i32 : i32 to vector<8x128xi32>
    %374 = arith.select %372, %30, %373 : vector<8x128xi1>, vector<8x128xi32>
    %375 = vector.shape_cast %374 : vector<8x128xi32> to vector<1x8x128xi32>
    %cst_119 = arith.constant dense<2147483647> : vector<1xi32>
    %376 = vector.multi_reduction <minsi>, %375, %cst_119 [1, 2] : vector<1x8x128xi32> to vector<1xi32>
    %377 = vector.shape_cast %376 : vector<1xi32> to vector<1x1x1xi32>
    %378 = vector.extract %377[0, 0, 0] : i32 from vector<1x1x1xi32>
    %379 = vector.broadcast %378 : i32 to vector<8x128xi32>
    %380 = arith.cmpi eq, %30, %379 : vector<8x128xi32>
    %381 = vector.broadcast %338 : i1 to vector<8x128xi1>
    %382 = arith.andi %380, %381 : vector<8x128xi1>
    %383 = vector.broadcast %c4_i32_105 : i32 to vector<8x128xi32>
    %384 = arith.select %382, %383, %317 : vector<8x128xi1>, vector<8x128xi32>
    %c5_i32_120 = arith.constant 5 : i32
    %c10_i32_121 = arith.constant 10 : i32
    %385 = arith.muli %c5_i32_120, %c10_i32_121 : i32
    %386 = arith.addi %34, %385 : i32
    %c0_i32_122 = arith.constant 0 : i32
    %387 = arith.addi %386, %c0_i32_122 : i32
    %388 = arith.index_cast %387 : i32 to index
    %389 = memref.load %arg1[%388] : memref<160xf32, #tpu.memory_space<smem>>
    %c1_i32_123 = arith.constant 1 : i32
    %390 = arith.addi %386, %c1_i32_123 : i32
    %391 = arith.index_cast %390 : i32 to index
    %392 = memref.load %arg1[%391] : memref<160xf32, #tpu.memory_space<smem>>
    %c2_i32_124 = arith.constant 2 : i32
    %393 = arith.addi %386, %c2_i32_124 : i32
    %394 = arith.index_cast %393 : i32 to index
    %395 = memref.load %arg1[%394] : memref<160xf32, #tpu.memory_space<smem>>
    %c3_i32_125 = arith.constant 3 : i32
    %396 = arith.addi %386, %c3_i32_125 : i32
    %397 = arith.index_cast %396 : i32 to index
    %398 = memref.load %arg1[%397] : memref<160xf32, #tpu.memory_space<smem>>
    %c4_i32_126 = arith.constant 4 : i32
    %399 = arith.addi %386, %c4_i32_126 : i32
    %400 = arith.index_cast %399 : i32 to index
    %401 = memref.load %arg1[%400] : memref<160xf32, #tpu.memory_space<smem>>
    %c5_i32_127 = arith.constant 5 : i32
    %402 = arith.addi %386, %c5_i32_127 : i32
    %403 = arith.index_cast %402 : i32 to index
    %404 = memref.load %arg1[%403] : memref<160xf32, #tpu.memory_space<smem>>
    %cst_128 = arith.constant 0.000000e+00 : f32
    %405 = arith.cmpf ogt, %389, %cst_128 : f32
    %406 = vector.broadcast %398 : f32 to vector<8x128xf32>
    %407 = arith.minimumf %406, %5 : vector<8x128xf32>
    %408 = vector.broadcast %392 : f32 to vector<8x128xf32>
    %409 = arith.maximumf %408, %1 : vector<8x128xf32>
    %410 = arith.subf %407, %409 : vector<8x128xf32>
    %cst_129 = arith.constant 0.000000e+00 : f32
    %411 = vector.broadcast %cst_129 : f32 to vector<8x128xf32>
    %412 = arith.maximumf %410, %411 : vector<8x128xf32>
    %413 = vector.broadcast %401 : f32 to vector<8x128xf32>
    %414 = arith.minimumf %413, %7 : vector<8x128xf32>
    %415 = vector.broadcast %395 : f32 to vector<8x128xf32>
    %416 = arith.maximumf %415, %3 : vector<8x128xf32>
    %417 = arith.subf %414, %416 : vector<8x128xf32>
    %cst_130 = arith.constant 0.000000e+00 : f32
    %418 = vector.broadcast %cst_130 : f32 to vector<8x128xf32>
    %419 = arith.maximumf %417, %418 : vector<8x128xf32>
    %420 = arith.mulf %412, %419 : vector<8x128xf32>
    %421 = vector.broadcast %404 : f32 to vector<8x128xf32>
    %422 = arith.addf %421, %9 : vector<8x128xf32>
    %423 = arith.subf %422, %420 : vector<8x128xf32>
    %cst_131 = arith.constant 9.99999996E-13 : f32
    %424 = vector.broadcast %cst_131 : f32 to vector<8x128xf32>
    %425 = arith.maximumf %423, %424 : vector<8x128xf32>
    %426 = tpu.reciprocal %425 {approx = true} : vector<8x128xf32> -> vector<8x128xf32>
    %427 = arith.mulf %420, %426 : vector<8x128xf32>
    %cst_132 = arith.constant -1.000000e+00 : f32
    %428 = vector.broadcast %cst_132 : f32 to vector<8x128xf32>
    %429 = arith.select %405, %427, %428 : vector<8x128xf32>
    %430 = arith.cmpf ogt, %429, %364 : vector<8x128xf32>
    %431 = arith.select %430, %429, %364 : vector<8x128xi1>, vector<8x128xf32>
    %432 = vector.broadcast %c5_i32_120 : i32 to vector<8x128xi32>
    %433 = arith.select %430, %432, %366 : vector<8x128xi1>, vector<8x128xi32>
    %434 = vector.shape_cast %429 : vector<8x128xf32> to vector<1x8x128xf32>
    %cst_133 = arith.constant dense<0xFF800000> : vector<1xf32>
    %435 = vector.multi_reduction <maximumf>, %434, %cst_133 [1, 2] : vector<1x8x128xf32> to vector<1xf32>
    %436 = vector.shape_cast %435 : vector<1xf32> to vector<1x1x1xf32>
    %437 = vector.extract %436[0, 0, 0] : f32 from vector<1x1x1xf32>
    %438 = vector.broadcast %437 : f32 to vector<8x128xf32>
    %439 = arith.cmpf oge, %429, %438 : vector<8x128xf32>
    %440 = vector.broadcast %c1024_i32 : i32 to vector<8x128xi32>
    %441 = arith.select %439, %30, %440 : vector<8x128xi1>, vector<8x128xi32>
    %442 = vector.shape_cast %441 : vector<8x128xi32> to vector<1x8x128xi32>
    %cst_134 = arith.constant dense<2147483647> : vector<1xi32>
    %443 = vector.multi_reduction <minsi>, %442, %cst_134 [1, 2] : vector<1x8x128xi32> to vector<1xi32>
    %444 = vector.shape_cast %443 : vector<1xi32> to vector<1x1x1xi32>
    %445 = vector.extract %444[0, 0, 0] : i32 from vector<1x1x1xi32>
    %446 = vector.broadcast %445 : i32 to vector<8x128xi32>
    %447 = arith.cmpi eq, %30, %446 : vector<8x128xi32>
    %448 = vector.broadcast %405 : i1 to vector<8x128xi1>
    %449 = arith.andi %447, %448 : vector<8x128xi1>
    %450 = vector.broadcast %c5_i32_120 : i32 to vector<8x128xi32>
    %451 = arith.select %449, %450, %384 : vector<8x128xi1>, vector<8x128xi32>
    %c6_i32 = arith.constant 6 : i32
    %c10_i32_135 = arith.constant 10 : i32
    %452 = arith.muli %c6_i32, %c10_i32_135 : i32
    %453 = arith.addi %34, %452 : i32
    %c0_i32_136 = arith.constant 0 : i32
    %454 = arith.addi %453, %c0_i32_136 : i32
    %455 = arith.index_cast %454 : i32 to index
    %456 = memref.load %arg1[%455] : memref<160xf32, #tpu.memory_space<smem>>
    %c1_i32_137 = arith.constant 1 : i32
    %457 = arith.addi %453, %c1_i32_137 : i32
    %458 = arith.index_cast %457 : i32 to index
    %459 = memref.load %arg1[%458] : memref<160xf32, #tpu.memory_space<smem>>
    %c2_i32_138 = arith.constant 2 : i32
    %460 = arith.addi %453, %c2_i32_138 : i32
    %461 = arith.index_cast %460 : i32 to index
    %462 = memref.load %arg1[%461] : memref<160xf32, #tpu.memory_space<smem>>
    %c3_i32_139 = arith.constant 3 : i32
    %463 = arith.addi %453, %c3_i32_139 : i32
    %464 = arith.index_cast %463 : i32 to index
    %465 = memref.load %arg1[%464] : memref<160xf32, #tpu.memory_space<smem>>
    %c4_i32_140 = arith.constant 4 : i32
    %466 = arith.addi %453, %c4_i32_140 : i32
    %467 = arith.index_cast %466 : i32 to index
    %468 = memref.load %arg1[%467] : memref<160xf32, #tpu.memory_space<smem>>
    %c5_i32_141 = arith.constant 5 : i32
    %469 = arith.addi %453, %c5_i32_141 : i32
    %470 = arith.index_cast %469 : i32 to index
    %471 = memref.load %arg1[%470] : memref<160xf32, #tpu.memory_space<smem>>
    %cst_142 = arith.constant 0.000000e+00 : f32
    %472 = arith.cmpf ogt, %456, %cst_142 : f32
    %473 = vector.broadcast %465 : f32 to vector<8x128xf32>
    %474 = arith.minimumf %473, %5 : vector<8x128xf32>
    %475 = vector.broadcast %459 : f32 to vector<8x128xf32>
    %476 = arith.maximumf %475, %1 : vector<8x128xf32>
    %477 = arith.subf %474, %476 : vector<8x128xf32>
    %cst_143 = arith.constant 0.000000e+00 : f32
    %478 = vector.broadcast %cst_143 : f32 to vector<8x128xf32>
    %479 = arith.maximumf %477, %478 : vector<8x128xf32>
    %480 = vector.broadcast %468 : f32 to vector<8x128xf32>
    %481 = arith.minimumf %480, %7 : vector<8x128xf32>
    %482 = vector.broadcast %462 : f32 to vector<8x128xf32>
    %483 = arith.maximumf %482, %3 : vector<8x128xf32>
    %484 = arith.subf %481, %483 : vector<8x128xf32>
    %cst_144 = arith.constant 0.000000e+00 : f32
    %485 = vector.broadcast %cst_144 : f32 to vector<8x128xf32>
    %486 = arith.maximumf %484, %485 : vector<8x128xf32>
    %487 = arith.mulf %479, %486 : vector<8x128xf32>
    %488 = vector.broadcast %471 : f32 to vector<8x128xf32>
    %489 = arith.addf %488, %9 : vector<8x128xf32>
    %490 = arith.subf %489, %487 : vector<8x128xf32>
    %cst_145 = arith.constant 9.99999996E-13 : f32
    %491 = vector.broadcast %cst_145 : f32 to vector<8x128xf32>
    %492 = arith.maximumf %490, %491 : vector<8x128xf32>
    %493 = tpu.reciprocal %492 {approx = true} : vector<8x128xf32> -> vector<8x128xf32>
    %494 = arith.mulf %487, %493 : vector<8x128xf32>
    %cst_146 = arith.constant -1.000000e+00 : f32
    %495 = vector.broadcast %cst_146 : f32 to vector<8x128xf32>
    %496 = arith.select %472, %494, %495 : vector<8x128xf32>
    %497 = arith.cmpf ogt, %496, %431 : vector<8x128xf32>
    %498 = arith.select %497, %496, %431 : vector<8x128xi1>, vector<8x128xf32>
    %499 = vector.broadcast %c6_i32 : i32 to vector<8x128xi32>
    %500 = arith.select %497, %499, %433 : vector<8x128xi1>, vector<8x128xi32>
    %501 = vector.shape_cast %496 : vector<8x128xf32> to vector<1x8x128xf32>
    %cst_147 = arith.constant dense<0xFF800000> : vector<1xf32>
    %502 = vector.multi_reduction <maximumf>, %501, %cst_147 [1, 2] : vector<1x8x128xf32> to vector<1xf32>
    %503 = vector.shape_cast %502 : vector<1xf32> to vector<1x1x1xf32>
    %504 = vector.extract %503[0, 0, 0] : f32 from vector<1x1x1xf32>
    %505 = vector.broadcast %504 : f32 to vector<8x128xf32>
    %506 = arith.cmpf oge, %496, %505 : vector<8x128xf32>
    %507 = vector.broadcast %c1024_i32 : i32 to vector<8x128xi32>
    %508 = arith.select %506, %30, %507 : vector<8x128xi1>, vector<8x128xi32>
    %509 = vector.shape_cast %508 : vector<8x128xi32> to vector<1x8x128xi32>
    %cst_148 = arith.constant dense<2147483647> : vector<1xi32>
    %510 = vector.multi_reduction <minsi>, %509, %cst_148 [1, 2] : vector<1x8x128xi32> to vector<1xi32>
    %511 = vector.shape_cast %510 : vector<1xi32> to vector<1x1x1xi32>
    %512 = vector.extract %511[0, 0, 0] : i32 from vector<1x1x1xi32>
    %513 = vector.broadcast %512 : i32 to vector<8x128xi32>
    %514 = arith.cmpi eq, %30, %513 : vector<8x128xi32>
    %515 = vector.broadcast %472 : i1 to vector<8x128xi1>
    %516 = arith.andi %514, %515 : vector<8x128xi1>
    %517 = vector.broadcast %c6_i32 : i32 to vector<8x128xi32>
    %518 = arith.select %516, %517, %451 : vector<8x128xi1>, vector<8x128xi32>
    %c7_i32 = arith.constant 7 : i32
    %c10_i32_149 = arith.constant 10 : i32
    %519 = arith.muli %c7_i32, %c10_i32_149 : i32
    %520 = arith.addi %34, %519 : i32
    %c0_i32_150 = arith.constant 0 : i32
    %521 = arith.addi %520, %c0_i32_150 : i32
    %522 = arith.index_cast %521 : i32 to index
    %523 = memref.load %arg1[%522] : memref<160xf32, #tpu.memory_space<smem>>
    %c1_i32_151 = arith.constant 1 : i32
    %524 = arith.addi %520, %c1_i32_151 : i32
    %525 = arith.index_cast %524 : i32 to index
    %526 = memref.load %arg1[%525] : memref<160xf32, #tpu.memory_space<smem>>
    %c2_i32_152 = arith.constant 2 : i32
    %527 = arith.addi %520, %c2_i32_152 : i32
    %528 = arith.index_cast %527 : i32 to index
    %529 = memref.load %arg1[%528] : memref<160xf32, #tpu.memory_space<smem>>
    %c3_i32_153 = arith.constant 3 : i32
    %530 = arith.addi %520, %c3_i32_153 : i32
    %531 = arith.index_cast %530 : i32 to index
    %532 = memref.load %arg1[%531] : memref<160xf32, #tpu.memory_space<smem>>
    %c4_i32_154 = arith.constant 4 : i32
    %533 = arith.addi %520, %c4_i32_154 : i32
    %534 = arith.index_cast %533 : i32 to index
    %535 = memref.load %arg1[%534] : memref<160xf32, #tpu.memory_space<smem>>
    %c5_i32_155 = arith.constant 5 : i32
    %536 = arith.addi %520, %c5_i32_155 : i32
    %537 = arith.index_cast %536 : i32 to index
    %538 = memref.load %arg1[%537] : memref<160xf32, #tpu.memory_space<smem>>
    %cst_156 = arith.constant 0.000000e+00 : f32
    %539 = arith.cmpf ogt, %523, %cst_156 : f32
    %540 = vector.broadcast %532 : f32 to vector<8x128xf32>
    %541 = arith.minimumf %540, %5 : vector<8x128xf32>
    %542 = vector.broadcast %526 : f32 to vector<8x128xf32>
    %543 = arith.maximumf %542, %1 : vector<8x128xf32>
    %544 = arith.subf %541, %543 : vector<8x128xf32>
    %cst_157 = arith.constant 0.000000e+00 : f32
    %545 = vector.broadcast %cst_157 : f32 to vector<8x128xf32>
    %546 = arith.maximumf %544, %545 : vector<8x128xf32>
    %547 = vector.broadcast %535 : f32 to vector<8x128xf32>
    %548 = arith.minimumf %547, %7 : vector<8x128xf32>
    %549 = vector.broadcast %529 : f32 to vector<8x128xf32>
    %550 = arith.maximumf %549, %3 : vector<8x128xf32>
    %551 = arith.subf %548, %550 : vector<8x128xf32>
    %cst_158 = arith.constant 0.000000e+00 : f32
    %552 = vector.broadcast %cst_158 : f32 to vector<8x128xf32>
    %553 = arith.maximumf %551, %552 : vector<8x128xf32>
    %554 = arith.mulf %546, %553 : vector<8x128xf32>
    %555 = vector.broadcast %538 : f32 to vector<8x128xf32>
    %556 = arith.addf %555, %9 : vector<8x128xf32>
    %557 = arith.subf %556, %554 : vector<8x128xf32>
    %cst_159 = arith.constant 9.99999996E-13 : f32
    %558 = vector.broadcast %cst_159 : f32 to vector<8x128xf32>
    %559 = arith.maximumf %557, %558 : vector<8x128xf32>
    %560 = tpu.reciprocal %559 {approx = true} : vector<8x128xf32> -> vector<8x128xf32>
    %561 = arith.mulf %554, %560 : vector<8x128xf32>
    %cst_160 = arith.constant -1.000000e+00 : f32
    %562 = vector.broadcast %cst_160 : f32 to vector<8x128xf32>
    %563 = arith.select %539, %561, %562 : vector<8x128xf32>
    %564 = arith.cmpf ogt, %563, %498 : vector<8x128xf32>
    %565 = arith.select %564, %563, %498 : vector<8x128xi1>, vector<8x128xf32>
    %566 = vector.broadcast %c7_i32 : i32 to vector<8x128xi32>
    %567 = arith.select %564, %566, %500 : vector<8x128xi1>, vector<8x128xi32>
    %568 = vector.shape_cast %563 : vector<8x128xf32> to vector<1x8x128xf32>
    %cst_161 = arith.constant dense<0xFF800000> : vector<1xf32>
    %569 = vector.multi_reduction <maximumf>, %568, %cst_161 [1, 2] : vector<1x8x128xf32> to vector<1xf32>
    %570 = vector.shape_cast %569 : vector<1xf32> to vector<1x1x1xf32>
    %571 = vector.extract %570[0, 0, 0] : f32 from vector<1x1x1xf32>
    %572 = vector.broadcast %571 : f32 to vector<8x128xf32>
    %573 = arith.cmpf oge, %563, %572 : vector<8x128xf32>
    %574 = vector.broadcast %c1024_i32 : i32 to vector<8x128xi32>
    %575 = arith.select %573, %30, %574 : vector<8x128xi1>, vector<8x128xi32>
    %576 = vector.shape_cast %575 : vector<8x128xi32> to vector<1x8x128xi32>
    %cst_162 = arith.constant dense<2147483647> : vector<1xi32>
    %577 = vector.multi_reduction <minsi>, %576, %cst_162 [1, 2] : vector<1x8x128xi32> to vector<1xi32>
    %578 = vector.shape_cast %577 : vector<1xi32> to vector<1x1x1xi32>
    %579 = vector.extract %578[0, 0, 0] : i32 from vector<1x1x1xi32>
    %580 = vector.broadcast %579 : i32 to vector<8x128xi32>
    %581 = arith.cmpi eq, %30, %580 : vector<8x128xi32>
    %582 = vector.broadcast %539 : i1 to vector<8x128xi1>
    %583 = arith.andi %581, %582 : vector<8x128xi1>
    %584 = vector.broadcast %c7_i32 : i32 to vector<8x128xi32>
    %585 = arith.select %583, %584, %518 : vector<8x128xi1>, vector<8x128xi32>
    %c8_i32 = arith.constant 8 : i32
    %c0_i32_163 = arith.constant 0 : i32
    %586 = vector.broadcast %c0_i32_163 : i32 to vector<8x128xi32>
    %587 = arith.cmpi sge, %585, %586 : vector<8x128xi32>
    %cst_164 = arith.constant 2.000000e+00 : f32
    %588 = vector.broadcast %cst_164 : f32 to vector<8x128xf32>
    %589 = arith.select %587, %588, %565 : vector<8x128xi1>, vector<8x128xf32>
    %590 = arith.select %587, %585, %567 : vector<8x128xi1>, vector<8x128xi32>
    %cst_165 = arith.constant 5.000000e-01 : f32
    %591 = vector.broadcast %cst_165 : f32 to vector<8x128xf32>
    %592 = arith.cmpf oge, %589, %591 : vector<8x128xf32>
    %593 = arith.andi %592, %25 : vector<8x128xi1>
    %cst_166 = arith.constant 5.000000e-01 : f32
    %594 = vector.broadcast %cst_166 : f32 to vector<8x128xf32>
    %595 = arith.cmpf olt, %589, %594 : vector<8x128xf32>
    %cst_167 = arith.constant 5.000000e-01 : f32
    %596 = vector.broadcast %cst_167 : f32 to vector<8x128xf32>
    %597 = arith.cmpf oge, %589, %596 : vector<8x128xf32>
    %598 = arith.ori %595, %597 : vector<8x128xi1>
    %599 = arith.andi %598, %25 : vector<8x128xi1>
    %600 = arith.extui %593 : vector<8x128xi1> to vector<8x128xi32>
    %601 = arith.sitofp %600 : vector<8x128xi32> to vector<8x128xf32>
    %cst_168 = arith.constant 0.000000e+00 : f32
    %602 = vector.broadcast %cst_168 : f32 to vector<8x128xf32>
    %c0_i32_169 = arith.constant 0 : i32
    %c10_i32_170 = arith.constant 10 : i32
    %603 = arith.muli %c0_i32_169, %c10_i32_170 : i32
    %604 = arith.addi %34, %603 : i32
    %c6_i32_171 = arith.constant 6 : i32
    %605 = arith.addi %604, %c6_i32_171 : i32
    %606 = arith.index_cast %605 : i32 to index
    %607 = memref.load %arg1[%606] : memref<160xf32, #tpu.memory_space<smem>>
    %c7_i32_172 = arith.constant 7 : i32
    %608 = arith.addi %604, %c7_i32_172 : i32
    %609 = arith.index_cast %608 : i32 to index
    %610 = memref.load %arg1[%609] : memref<160xf32, #tpu.memory_space<smem>>
    %c8_i32_173 = arith.constant 8 : i32
    %611 = arith.addi %604, %c8_i32_173 : i32
    %612 = arith.index_cast %611 : i32 to index
    %613 = memref.load %arg1[%612] : memref<160xf32, #tpu.memory_space<smem>>
    %c9_i32 = arith.constant 9 : i32
    %614 = arith.addi %604, %c9_i32 : i32
    %615 = arith.index_cast %614 : i32 to index
    %616 = memref.load %arg1[%615] : memref<160xf32, #tpu.memory_space<smem>>
    %617 = vector.broadcast %c0_i32_169 : i32 to vector<8x128xi32>
    %618 = arith.cmpi eq, %590, %617 : vector<8x128xi32>
    %619 = vector.broadcast %607 : f32 to vector<8x128xf32>
    %620 = arith.select %618, %619, %602 : vector<8x128xi1>, vector<8x128xf32>
    %621 = vector.broadcast %610 : f32 to vector<8x128xf32>
    %622 = arith.select %618, %621, %602 : vector<8x128xi1>, vector<8x128xf32>
    %623 = vector.broadcast %613 : f32 to vector<8x128xf32>
    %624 = arith.select %618, %623, %602 : vector<8x128xi1>, vector<8x128xf32>
    %625 = vector.broadcast %616 : f32 to vector<8x128xf32>
    %626 = arith.select %618, %625, %602 : vector<8x128xi1>, vector<8x128xf32>
    %c1_i32_174 = arith.constant 1 : i32
    %c10_i32_175 = arith.constant 10 : i32
    %627 = arith.muli %c1_i32_174, %c10_i32_175 : i32
    %628 = arith.addi %34, %627 : i32
    %c6_i32_176 = arith.constant 6 : i32
    %629 = arith.addi %628, %c6_i32_176 : i32
    %630 = arith.index_cast %629 : i32 to index
    %631 = memref.load %arg1[%630] : memref<160xf32, #tpu.memory_space<smem>>
    %c7_i32_177 = arith.constant 7 : i32
    %632 = arith.addi %628, %c7_i32_177 : i32
    %633 = arith.index_cast %632 : i32 to index
    %634 = memref.load %arg1[%633] : memref<160xf32, #tpu.memory_space<smem>>
    %c8_i32_178 = arith.constant 8 : i32
    %635 = arith.addi %628, %c8_i32_178 : i32
    %636 = arith.index_cast %635 : i32 to index
    %637 = memref.load %arg1[%636] : memref<160xf32, #tpu.memory_space<smem>>
    %c9_i32_179 = arith.constant 9 : i32
    %638 = arith.addi %628, %c9_i32_179 : i32
    %639 = arith.index_cast %638 : i32 to index
    %640 = memref.load %arg1[%639] : memref<160xf32, #tpu.memory_space<smem>>
    %641 = vector.broadcast %c1_i32_174 : i32 to vector<8x128xi32>
    %642 = arith.cmpi eq, %590, %641 : vector<8x128xi32>
    %643 = vector.broadcast %631 : f32 to vector<8x128xf32>
    %644 = arith.select %642, %643, %620 : vector<8x128xi1>, vector<8x128xf32>
    %645 = vector.broadcast %634 : f32 to vector<8x128xf32>
    %646 = arith.select %642, %645, %622 : vector<8x128xi1>, vector<8x128xf32>
    %647 = vector.broadcast %637 : f32 to vector<8x128xf32>
    %648 = arith.select %642, %647, %624 : vector<8x128xi1>, vector<8x128xf32>
    %649 = vector.broadcast %640 : f32 to vector<8x128xf32>
    %650 = arith.select %642, %649, %626 : vector<8x128xi1>, vector<8x128xf32>
    %c2_i32_180 = arith.constant 2 : i32
    %c10_i32_181 = arith.constant 10 : i32
    %651 = arith.muli %c2_i32_180, %c10_i32_181 : i32
    %652 = arith.addi %34, %651 : i32
    %c6_i32_182 = arith.constant 6 : i32
    %653 = arith.addi %652, %c6_i32_182 : i32
    %654 = arith.index_cast %653 : i32 to index
    %655 = memref.load %arg1[%654] : memref<160xf32, #tpu.memory_space<smem>>
    %c7_i32_183 = arith.constant 7 : i32
    %656 = arith.addi %652, %c7_i32_183 : i32
    %657 = arith.index_cast %656 : i32 to index
    %658 = memref.load %arg1[%657] : memref<160xf32, #tpu.memory_space<smem>>
    %c8_i32_184 = arith.constant 8 : i32
    %659 = arith.addi %652, %c8_i32_184 : i32
    %660 = arith.index_cast %659 : i32 to index
    %661 = memref.load %arg1[%660] : memref<160xf32, #tpu.memory_space<smem>>
    %c9_i32_185 = arith.constant 9 : i32
    %662 = arith.addi %652, %c9_i32_185 : i32
    %663 = arith.index_cast %662 : i32 to index
    %664 = memref.load %arg1[%663] : memref<160xf32, #tpu.memory_space<smem>>
    %665 = vector.broadcast %c2_i32_180 : i32 to vector<8x128xi32>
    %666 = arith.cmpi eq, %590, %665 : vector<8x128xi32>
    %667 = vector.broadcast %655 : f32 to vector<8x128xf32>
    %668 = arith.select %666, %667, %644 : vector<8x128xi1>, vector<8x128xf32>
    %669 = vector.broadcast %658 : f32 to vector<8x128xf32>
    %670 = arith.select %666, %669, %646 : vector<8x128xi1>, vector<8x128xf32>
    %671 = vector.broadcast %661 : f32 to vector<8x128xf32>
    %672 = arith.select %666, %671, %648 : vector<8x128xi1>, vector<8x128xf32>
    %673 = vector.broadcast %664 : f32 to vector<8x128xf32>
    %674 = arith.select %666, %673, %650 : vector<8x128xi1>, vector<8x128xf32>
    %c3_i32_186 = arith.constant 3 : i32
    %c10_i32_187 = arith.constant 10 : i32
    %675 = arith.muli %c3_i32_186, %c10_i32_187 : i32
    %676 = arith.addi %34, %675 : i32
    %c6_i32_188 = arith.constant 6 : i32
    %677 = arith.addi %676, %c6_i32_188 : i32
    %678 = arith.index_cast %677 : i32 to index
    %679 = memref.load %arg1[%678] : memref<160xf32, #tpu.memory_space<smem>>
    %c7_i32_189 = arith.constant 7 : i32
    %680 = arith.addi %676, %c7_i32_189 : i32
    %681 = arith.index_cast %680 : i32 to index
    %682 = memref.load %arg1[%681] : memref<160xf32, #tpu.memory_space<smem>>
    %c8_i32_190 = arith.constant 8 : i32
    %683 = arith.addi %676, %c8_i32_190 : i32
    %684 = arith.index_cast %683 : i32 to index
    %685 = memref.load %arg1[%684] : memref<160xf32, #tpu.memory_space<smem>>
    %c9_i32_191 = arith.constant 9 : i32
    %686 = arith.addi %676, %c9_i32_191 : i32
    %687 = arith.index_cast %686 : i32 to index
    %688 = memref.load %arg1[%687] : memref<160xf32, #tpu.memory_space<smem>>
    %689 = vector.broadcast %c3_i32_186 : i32 to vector<8x128xi32>
    %690 = arith.cmpi eq, %590, %689 : vector<8x128xi32>
    %691 = vector.broadcast %679 : f32 to vector<8x128xf32>
    %692 = arith.select %690, %691, %668 : vector<8x128xi1>, vector<8x128xf32>
    %693 = vector.broadcast %682 : f32 to vector<8x128xf32>
    %694 = arith.select %690, %693, %670 : vector<8x128xi1>, vector<8x128xf32>
    %695 = vector.broadcast %685 : f32 to vector<8x128xf32>
    %696 = arith.select %690, %695, %672 : vector<8x128xi1>, vector<8x128xf32>
    %697 = vector.broadcast %688 : f32 to vector<8x128xf32>
    %698 = arith.select %690, %697, %674 : vector<8x128xi1>, vector<8x128xf32>
    %c4_i32_192 = arith.constant 4 : i32
    %c10_i32_193 = arith.constant 10 : i32
    %699 = arith.muli %c4_i32_192, %c10_i32_193 : i32
    %700 = arith.addi %34, %699 : i32
    %c6_i32_194 = arith.constant 6 : i32
    %701 = arith.addi %700, %c6_i32_194 : i32
    %702 = arith.index_cast %701 : i32 to index
    %703 = memref.load %arg1[%702] : memref<160xf32, #tpu.memory_space<smem>>
    %c7_i32_195 = arith.constant 7 : i32
    %704 = arith.addi %700, %c7_i32_195 : i32
    %705 = arith.index_cast %704 : i32 to index
    %706 = memref.load %arg1[%705] : memref<160xf32, #tpu.memory_space<smem>>
    %c8_i32_196 = arith.constant 8 : i32
    %707 = arith.addi %700, %c8_i32_196 : i32
    %708 = arith.index_cast %707 : i32 to index
    %709 = memref.load %arg1[%708] : memref<160xf32, #tpu.memory_space<smem>>
    %c9_i32_197 = arith.constant 9 : i32
    %710 = arith.addi %700, %c9_i32_197 : i32
    %711 = arith.index_cast %710 : i32 to index
    %712 = memref.load %arg1[%711] : memref<160xf32, #tpu.memory_space<smem>>
    %713 = vector.broadcast %c4_i32_192 : i32 to vector<8x128xi32>
    %714 = arith.cmpi eq, %590, %713 : vector<8x128xi32>
    %715 = vector.broadcast %703 : f32 to vector<8x128xf32>
    %716 = arith.select %714, %715, %692 : vector<8x128xi1>, vector<8x128xf32>
    %717 = vector.broadcast %706 : f32 to vector<8x128xf32>
    %718 = arith.select %714, %717, %694 : vector<8x128xi1>, vector<8x128xf32>
    %719 = vector.broadcast %709 : f32 to vector<8x128xf32>
    %720 = arith.select %714, %719, %696 : vector<8x128xi1>, vector<8x128xf32>
    %721 = vector.broadcast %712 : f32 to vector<8x128xf32>
    %722 = arith.select %714, %721, %698 : vector<8x128xi1>, vector<8x128xf32>
    %c5_i32_198 = arith.constant 5 : i32
    %c10_i32_199 = arith.constant 10 : i32
    %723 = arith.muli %c5_i32_198, %c10_i32_199 : i32
    %724 = arith.addi %34, %723 : i32
    %c6_i32_200 = arith.constant 6 : i32
    %725 = arith.addi %724, %c6_i32_200 : i32
    %726 = arith.index_cast %725 : i32 to index
    %727 = memref.load %arg1[%726] : memref<160xf32, #tpu.memory_space<smem>>
    %c7_i32_201 = arith.constant 7 : i32
    %728 = arith.addi %724, %c7_i32_201 : i32
    %729 = arith.index_cast %728 : i32 to index
    %730 = memref.load %arg1[%729] : memref<160xf32, #tpu.memory_space<smem>>
    %c8_i32_202 = arith.constant 8 : i32
    %731 = arith.addi %724, %c8_i32_202 : i32
    %732 = arith.index_cast %731 : i32 to index
    %733 = memref.load %arg1[%732] : memref<160xf32, #tpu.memory_space<smem>>
    %c9_i32_203 = arith.constant 9 : i32
    %734 = arith.addi %724, %c9_i32_203 : i32
    %735 = arith.index_cast %734 : i32 to index
    %736 = memref.load %arg1[%735] : memref<160xf32, #tpu.memory_space<smem>>
    %737 = vector.broadcast %c5_i32_198 : i32 to vector<8x128xi32>
    %738 = arith.cmpi eq, %590, %737 : vector<8x128xi32>
    %739 = vector.broadcast %727 : f32 to vector<8x128xf32>
    %740 = arith.select %738, %739, %716 : vector<8x128xi1>, vector<8x128xf32>
    %741 = vector.broadcast %730 : f32 to vector<8x128xf32>
    %742 = arith.select %738, %741, %718 : vector<8x128xi1>, vector<8x128xf32>
    %743 = vector.broadcast %733 : f32 to vector<8x128xf32>
    %744 = arith.select %738, %743, %720 : vector<8x128xi1>, vector<8x128xf32>
    %745 = vector.broadcast %736 : f32 to vector<8x128xf32>
    %746 = arith.select %738, %745, %722 : vector<8x128xi1>, vector<8x128xf32>
    %c6_i32_204 = arith.constant 6 : i32
    %c10_i32_205 = arith.constant 10 : i32
    %747 = arith.muli %c6_i32_204, %c10_i32_205 : i32
    %748 = arith.addi %34, %747 : i32
    %c6_i32_206 = arith.constant 6 : i32
    %749 = arith.addi %748, %c6_i32_206 : i32
    %750 = arith.index_cast %749 : i32 to index
    %751 = memref.load %arg1[%750] : memref<160xf32, #tpu.memory_space<smem>>
    %c7_i32_207 = arith.constant 7 : i32
    %752 = arith.addi %748, %c7_i32_207 : i32
    %753 = arith.index_cast %752 : i32 to index
    %754 = memref.load %arg1[%753] : memref<160xf32, #tpu.memory_space<smem>>
    %c8_i32_208 = arith.constant 8 : i32
    %755 = arith.addi %748, %c8_i32_208 : i32
    %756 = arith.index_cast %755 : i32 to index
    %757 = memref.load %arg1[%756] : memref<160xf32, #tpu.memory_space<smem>>
    %c9_i32_209 = arith.constant 9 : i32
    %758 = arith.addi %748, %c9_i32_209 : i32
    %759 = arith.index_cast %758 : i32 to index
    %760 = memref.load %arg1[%759] : memref<160xf32, #tpu.memory_space<smem>>
    %761 = vector.broadcast %c6_i32_204 : i32 to vector<8x128xi32>
    %762 = arith.cmpi eq, %590, %761 : vector<8x128xi32>
    %763 = vector.broadcast %751 : f32 to vector<8x128xf32>
    %764 = arith.select %762, %763, %740 : vector<8x128xi1>, vector<8x128xf32>
    %765 = vector.broadcast %754 : f32 to vector<8x128xf32>
    %766 = arith.select %762, %765, %742 : vector<8x128xi1>, vector<8x128xf32>
    %767 = vector.broadcast %757 : f32 to vector<8x128xf32>
    %768 = arith.select %762, %767, %744 : vector<8x128xi1>, vector<8x128xf32>
    %769 = vector.broadcast %760 : f32 to vector<8x128xf32>
    %770 = arith.select %762, %769, %746 : vector<8x128xi1>, vector<8x128xf32>
    %c7_i32_210 = arith.constant 7 : i32
    %c10_i32_211 = arith.constant 10 : i32
    %771 = arith.muli %c7_i32_210, %c10_i32_211 : i32
    %772 = arith.addi %34, %771 : i32
    %c6_i32_212 = arith.constant 6 : i32
    %773 = arith.addi %772, %c6_i32_212 : i32
    %774 = arith.index_cast %773 : i32 to index
    %775 = memref.load %arg1[%774] : memref<160xf32, #tpu.memory_space<smem>>
    %c7_i32_213 = arith.constant 7 : i32
    %776 = arith.addi %772, %c7_i32_213 : i32
    %777 = arith.index_cast %776 : i32 to index
    %778 = memref.load %arg1[%777] : memref<160xf32, #tpu.memory_space<smem>>
    %c8_i32_214 = arith.constant 8 : i32
    %779 = arith.addi %772, %c8_i32_214 : i32
    %780 = arith.index_cast %779 : i32 to index
    %781 = memref.load %arg1[%780] : memref<160xf32, #tpu.memory_space<smem>>
    %c9_i32_215 = arith.constant 9 : i32
    %782 = arith.addi %772, %c9_i32_215 : i32
    %783 = arith.index_cast %782 : i32 to index
    %784 = memref.load %arg1[%783] : memref<160xf32, #tpu.memory_space<smem>>
    %785 = vector.broadcast %c7_i32_210 : i32 to vector<8x128xi32>
    %786 = arith.cmpi eq, %590, %785 : vector<8x128xi32>
    %787 = vector.broadcast %775 : f32 to vector<8x128xf32>
    %788 = arith.select %786, %787, %764 : vector<8x128xi1>, vector<8x128xf32>
    %789 = vector.broadcast %778 : f32 to vector<8x128xf32>
    %790 = arith.select %786, %789, %766 : vector<8x128xi1>, vector<8x128xf32>
    %791 = vector.broadcast %781 : f32 to vector<8x128xf32>
    %792 = arith.select %786, %791, %768 : vector<8x128xi1>, vector<8x128xf32>
    %793 = vector.broadcast %784 : f32 to vector<8x128xf32>
    %794 = arith.select %786, %793, %770 : vector<8x128xi1>, vector<8x128xf32>
    %c8_i32_216 = arith.constant 8 : i32
    %795 = arith.subf %788, %11 : vector<8x128xf32>
    %796 = arith.mulf %795, %15 : vector<8x128xf32>
    %797 = arith.subf %790, %13 : vector<8x128xf32>
    %798 = arith.mulf %797, %17 : vector<8x128xf32>
    %799 = arith.subf %792, %19 : vector<8x128xf32>
    %cst_217 = arith.constant 5.000000e+00 : f32
    %800 = vector.broadcast %cst_217 : f32 to vector<8x128xf32>
    %801 = arith.mulf %799, %800 : vector<8x128xf32>
    %802 = arith.subf %794, %21 : vector<8x128xf32>
    %cst_218 = arith.constant 5.000000e+00 : f32
    %803 = vector.broadcast %cst_218 : f32 to vector<8x128xf32>
    %804 = arith.mulf %802, %803 : vector<8x128xf32>
    %805 = arith.subf %36, %796 : vector<8x128xf32>
    %806 = math.absf %805 : vector<8x128xf32>
    %cst_219 = arith.constant 1.000000e+00 : f32
    %807 = vector.broadcast %cst_219 : f32 to vector<8x128xf32>
    %808 = arith.cmpf olt, %806, %807 : vector<8x128xf32>
    %cst_220 = arith.constant 5.000000e-01 : f32
    %809 = vector.broadcast %cst_220 : f32 to vector<8x128xf32>
    %810 = arith.mulf %809, %805 : vector<8x128xf32>
    %811 = arith.mulf %810, %805 : vector<8x128xf32>
    %cst_221 = arith.constant 5.000000e-01 : f32
    %812 = vector.broadcast %cst_221 : f32 to vector<8x128xf32>
    %813 = arith.subf %806, %812 : vector<8x128xf32>
    %814 = arith.select %808, %811, %813 : vector<8x128xi1>, vector<8x128xf32>
    %815 = arith.subf %38, %798 : vector<8x128xf32>
    %816 = math.absf %815 : vector<8x128xf32>
    %cst_222 = arith.constant 1.000000e+00 : f32
    %817 = vector.broadcast %cst_222 : f32 to vector<8x128xf32>
    %818 = arith.cmpf olt, %816, %817 : vector<8x128xf32>
    %cst_223 = arith.constant 5.000000e-01 : f32
    %819 = vector.broadcast %cst_223 : f32 to vector<8x128xf32>
    %820 = arith.mulf %819, %815 : vector<8x128xf32>
    %821 = arith.mulf %820, %815 : vector<8x128xf32>
    %cst_224 = arith.constant 5.000000e-01 : f32
    %822 = vector.broadcast %cst_224 : f32 to vector<8x128xf32>
    %823 = arith.subf %816, %822 : vector<8x128xf32>
    %824 = arith.select %818, %821, %823 : vector<8x128xi1>, vector<8x128xf32>
    %825 = arith.addf %814, %824 : vector<8x128xf32>
    %826 = arith.subf %40, %801 : vector<8x128xf32>
    %827 = math.absf %826 : vector<8x128xf32>
    %cst_225 = arith.constant 1.000000e+00 : f32
    %828 = vector.broadcast %cst_225 : f32 to vector<8x128xf32>
    %829 = arith.cmpf olt, %827, %828 : vector<8x128xf32>
    %cst_226 = arith.constant 5.000000e-01 : f32
    %830 = vector.broadcast %cst_226 : f32 to vector<8x128xf32>
    %831 = arith.mulf %830, %826 : vector<8x128xf32>
    %832 = arith.mulf %831, %826 : vector<8x128xf32>
    %cst_227 = arith.constant 5.000000e-01 : f32
    %833 = vector.broadcast %cst_227 : f32 to vector<8x128xf32>
    %834 = arith.subf %827, %833 : vector<8x128xf32>
    %835 = arith.select %829, %832, %834 : vector<8x128xi1>, vector<8x128xf32>
    %836 = arith.addf %825, %835 : vector<8x128xf32>
    %837 = arith.subf %42, %804 : vector<8x128xf32>
    %838 = math.absf %837 : vector<8x128xf32>
    %cst_228 = arith.constant 1.000000e+00 : f32
    %839 = vector.broadcast %cst_228 : f32 to vector<8x128xf32>
    %840 = arith.cmpf olt, %838, %839 : vector<8x128xf32>
    %cst_229 = arith.constant 5.000000e-01 : f32
    %841 = vector.broadcast %cst_229 : f32 to vector<8x128xf32>
    %842 = arith.mulf %841, %837 : vector<8x128xf32>
    %843 = arith.mulf %842, %837 : vector<8x128xf32>
    %cst_230 = arith.constant 5.000000e-01 : f32
    %844 = vector.broadcast %cst_230 : f32 to vector<8x128xf32>
    %845 = arith.subf %838, %844 : vector<8x128xf32>
    %846 = arith.select %840, %843, %845 : vector<8x128xi1>, vector<8x128xf32>
    %847 = arith.addf %836, %846 : vector<8x128xf32>
    %848 = arith.mulf %601, %847 : vector<8x128xf32>
    %849 = vector.shape_cast %848 : vector<8x128xf32> to vector<1x8x128xf32>
    %cst_231 = arith.constant dense<0.000000e+00> : vector<1xf32>
    %850 = vector.multi_reduction <add>, %849, %cst_231 [1, 2] : vector<1x8x128xf32> to vector<1xf32>
    %851 = vector.shape_cast %850 : vector<1xf32> to vector<1x1x1xf32>
    %852 = vector.extract %851[0, 0, 0] : f32 from vector<1x1x1xf32>
    %853 = vector.shape_cast %601 : vector<8x128xf32> to vector<1x8x128xf32>
    %cst_232 = arith.constant dense<0.000000e+00> : vector<1xf32>
    %854 = vector.multi_reduction <add>, %853, %cst_232 [1, 2] : vector<1x8x128xf32> to vector<1xf32>
    %855 = vector.shape_cast %854 : vector<1xf32> to vector<1x1x1xf32>
    %856 = vector.extract %855[0, 0, 0] : f32 from vector<1x1x1xf32>
    %857 = arith.subf %44, %46 : vector<8x128xf32>
    %858 = arith.subf %46, %44 : vector<8x128xf32>
    %859 = arith.select %593, %857, %858 : vector<8x128xi1>, vector<8x128xf32>
    %cst_233 = arith.constant 0.000000e+00 : f32
    %860 = vector.broadcast %cst_233 : f32 to vector<8x128xf32>
    %861 = arith.maximumf %859, %860 : vector<8x128xf32>
    %862 = math.absf %859 : vector<8x128xf32>
    %cst_234 = arith.constant 0.000000e+00 : f32
    %863 = vector.broadcast %cst_234 : f32 to vector<8x128xf32>
    %864 = arith.subf %863, %862 : vector<8x128xf32>
    %865 = math.exp %864 : vector<8x128xf32>
    %cst_235 = arith.constant 1.000000e+00 : f32
    %866 = vector.broadcast %cst_235 : f32 to vector<8x128xf32>
    %867 = arith.addf %866, %865 : vector<8x128xf32>
    %868 = math.log %867 : vector<8x128xf32>
    %869 = arith.addf %861, %868 : vector<8x128xf32>
    %cst_236 = arith.constant 0.000000e+00 : f32
    %870 = vector.broadcast %cst_236 : f32 to vector<8x128xf32>
    %871 = arith.subf %870, %869 : vector<8x128xf32>
    %872 = math.exp %871 : vector<8x128xf32>
    %cst_237 = arith.constant 1.000000e-01 : f32
    %cst_238 = arith.constant 0.899999976 : f32
    %873 = vector.broadcast %cst_237 : f32 to vector<8x128xf32>
    %874 = vector.broadcast %cst_238 : f32 to vector<8x128xf32>
    %875 = arith.select %593, %873, %874 : vector<8x128xi1>, vector<8x128xf32>
    %cst_239 = arith.constant 1.000000e+00 : f32
    %876 = vector.broadcast %cst_239 : f32 to vector<8x128xf32>
    %877 = arith.subf %876, %872 : vector<8x128xf32>
    %cst_240 = arith.constant 1.000000e+00 : f32
    %878 = vector.broadcast %cst_240 : f32 to vector<8x128xf32>
    %879 = arith.subf %878, %872 : vector<8x128xf32>
    %880 = arith.mulf %877, %879 : vector<8x128xf32>
    %cst_241 = arith.constant 0.000000e+00 : f32
    %881 = vector.broadcast %cst_241 : f32 to vector<8x128xf32>
    %882 = arith.subf %881, %875 : vector<8x128xf32>
    %883 = arith.mulf %882, %880 : vector<8x128xf32>
    %884 = arith.mulf %883, %871 : vector<8x128xf32>
    %cst_242 = arith.constant 0.000000e+00 : f32
    %885 = vector.broadcast %cst_242 : f32 to vector<8x128xf32>
    %886 = arith.select %599, %884, %885 : vector<8x128xi1>, vector<8x128xf32>
    %887 = vector.shape_cast %886 : vector<8x128xf32> to vector<1x8x128xf32>
    %cst_243 = arith.constant dense<0.000000e+00> : vector<1xf32>
    %888 = vector.multi_reduction <add>, %887, %cst_243 [1, 2] : vector<1x8x128xf32> to vector<1xf32>
    %889 = vector.shape_cast %888 : vector<1xf32> to vector<1x1x1xf32>
    %890 = vector.extract %889[0, 0, 0] : f32 from vector<1x1x1xf32>
    %891 = arith.extui %599 : vector<8x128xi1> to vector<8x128xi32>
    %892 = arith.sitofp %891 : vector<8x128xi32> to vector<8x128xf32>
    %893 = vector.shape_cast %892 : vector<8x128xf32> to vector<1x8x128xf32>
    %cst_244 = arith.constant dense<0.000000e+00> : vector<1xf32>
    %894 = vector.multi_reduction <add>, %893, %cst_244 [1, 2] : vector<1x8x128xf32> to vector<1xf32>
    %895 = vector.shape_cast %894 : vector<1xf32> to vector<1x1x1xf32>
    %896 = vector.extract %895[0, 0, 0] : f32 from vector<1x1x1xf32>
    %c0_i32_245 = arith.constant 0 : i32
    %897 = vector.broadcast %c0_i32_245 : i32 to vector<1x128xi32>
    %898 = arith.cmpi eq, %31, %897 : vector<1x128xi32>
    %c1_i32_246 = arith.constant 1 : i32
    %899 = vector.broadcast %c1_i32_246 : i32 to vector<1x128xi32>
    %900 = arith.cmpi eq, %31, %899 : vector<1x128xi32>
    %c2_i32_247 = arith.constant 2 : i32
    %901 = vector.broadcast %c2_i32_247 : i32 to vector<1x128xi32>
    %902 = arith.cmpi eq, %31, %901 : vector<1x128xi32>
    %c3_i32_248 = arith.constant 3 : i32
    %903 = vector.broadcast %c3_i32_248 : i32 to vector<1x128xi32>
    %904 = arith.cmpi eq, %31, %903 : vector<1x128xi32>
    %cst_249 = arith.constant 0.000000e+00 : f32
    %905 = vector.broadcast %896 : f32 to vector<1x128xf32>
    %906 = vector.broadcast %cst_249 : f32 to vector<1x128xf32>
    %907 = arith.select %904, %905, %906 : vector<1x128xi1>, vector<1x128xf32>
    %908 = vector.broadcast %890 : f32 to vector<1x128xf32>
    %909 = arith.select %902, %908, %907 : vector<1x128xi1>, vector<1x128xf32>
    %910 = vector.broadcast %856 : f32 to vector<1x128xf32>
    %911 = arith.select %900, %910, %909 : vector<1x128xi1>, vector<1x128xf32>
    %912 = vector.broadcast %852 : f32 to vector<1x128xf32>
    %913 = arith.select %898, %912, %911 : vector<1x128xi1>, vector<1x128xf32>
    %c0_250 = arith.constant 0 : index
    %c0_251 = arith.constant 0 : index
    %c0_252 = arith.constant 0 : index
    %914 = vector.load %arg4[%c0_250, %c0_251, %c0_252] : memref<1x1x128xf32, #tpu.memory_space<vmem>>, vector<1x1x128xf32>
    %915 = vector.shape_cast %914 : vector<1x1x128xf32> to vector<1x128xf32>
    %916 = vector.shape_cast %913 : vector<1x128xf32> to vector<1x1x128xf32>
    tpu.vector_store %arg4[%c0_250, %c0_251, %c0_252], %916 {strides = array<i32>} : memref<1x1x128xf32, #tpu.memory_space<vmem>>, vector<1x1x128xf32>,
    return
  }
  func.func @transform_0(%arg0: i32) -> i32 {
    %c0_i32 = arith.constant 0 : i32
    %c0_i32_0 = arith.constant 0 : i32
    return %c0_i32 : i32
  }
  func.func @transform_1(%arg0: i32) -> (i32, i32, i32) {
    %c0_i32 = arith.constant 0 : i32
    %c0_i32_0 = arith.constant 0 : i32
    %c0_i32_1 = arith.constant 0 : i32
    %c0_i32_2 = arith.constant 0 : i32
    return %c0_i32, %c0_i32_0, %c0_i32_1 : i32, i32, i32
  }
  func.func @transform_2(%arg0: i32) -> (i32, i32, i32, i32) {
    %c0_i32 = arith.constant 0 : i32
    %c0_i32_0 = arith.constant 0 : i32
    %c0_i32_1 = arith.constant 0 : i32
    %c0_i32_2 = arith.constant 0 : i32
    return %arg0, %c0_i32, %c0_i32_0, %c0_i32_1 : i32, i32, i32, i32
  }
  func.func @transform_3(%arg0: i32) -> (i32, i32, i32) {
    %c0_i32 = arith.constant 0 : i32
    %c0_i32_0 = arith.constant 0 : i32
    %c0_i32_1 = arith.constant 0 : i32
    return %arg0, %c0_i32, %c0_i32_0 : i32, i32, i32
  }
}

</mosaic_0001>

<bundles_post_ra>
// kernel: tpu_custom_call.1
= control target key start
LH: loop header
LB: loop body
LE: loop exit
PB: predicated region body
PF: predicated region fallthrough
CT: control target
= control target key end

     0   :  { %s2275_s0 = inlined_call_operand.hbm [shape: f32[160], index: 0, kind: input, shape index: {}]   ;;  %s2276_s1 = inlined_call_operand.hbm [shape: f32[12,8,128], index: 1, kind: input, shape index: {}]   ;;  %s2277_s2 = inlined_call_operand.hbm [shape: f32[2,6,8,128], index: 2, kind: input, shape index: {}]   ;;  %s2278_s3 = inlined_call_operand.hbm [shape: f32[2,1,128], index: 3, kind: output, shape index: {}]  }
   0x1   :  { %2296 = sst [smem:[#allocation27_spill]] %s2275_s0 }
   0x2   :  { %2297 = sst [smem:[#allocation28_spill]] %s2276_s1 }
   0x3   :  { %2298 = sst [smem:[#allocation29_spill]] %s2277_s2 }
   0x4   :  { %2299 = sst [smem:[#allocation30_spill]] %s2278_s3 }
   0x5   :  { %8 = vsyncpa [#allocation5], 0 }
   0x6   :  { %9 = vsyncpa [#allocation3], 0 }
   0x7   :  { %10 = vsyncpa [#allocation8], 0 }
   0x8   :  { %12 = vsyncpa [#allocation8 + $0x1], 0 }
   0x9   :  { %13 = vsyncpa [#allocation4], 0 }
   0xa   :  { %15 = vsyncpa [#allocation4 + $0x1], 0  ;;  %s1584_s12 = smov 0   ;;  %s1586_s13 = smov 0  }
   0xb   :  { %s1588_s14 = smov 0   ;;  %s1590_s15 = smov 0  }
   0xc LB: > { %2300 = sst [smem:[#allocation14_spill]] %s1540_s12  ;;  %s1605_s16 = sadd.s32 4294967295, %s1552_s15   ;;  %s1552_s15 = sphi %s1590_s15, %s2364_s15   ;;  %s1548_s14 = sphi %s1588_s14, %s2367_s14   ;;  %s1544_s13 = sphi %s1586_s13, %s2366_s13   ;;  %s1540_s12 = sphi %s1584_s12, %s2365_s12  }
   0xd   : > { %2301 = sst [smem:[#allocation15_spill]] %s1544_s13  ;;  %s1249_s17 = sadd.s32 4294967294, %s1552_s15  }
   0xe   : > { %2302 = sst [smem:[#allocation16_spill]] %s1548_s14  ;;  %s1609_s18 = sadd.s32 1, %s1552_s15  }
   0xf   : > { %2303 = sst [smem:[#allocation17_spill]] %s1552_s15  ;;  %s70_s19 = sadd.s32 1, %s1548_s14 }
  0x10   : > { %2304 = sst [smem:[#allocation18_spill]] %s1605_s16  ;;  %s67_s20 = ssub.s32 %s1552_s15, %s1609_s18 }
  0x11   : > { %2305 = sst [smem:[#allocation19_spill]] %s1609_s18  ;;  %p77_p0 = scmp.ne.s32.totalorder %s1548_s14, %s1544_s13 }
  0x12   : > { %p68_p1 = scmp.eq.s32.totalorder %s67_s20, 0  ;;  %p78_p2 = scmp.eq.s32.totalorder %s1552_s15, 0 }
  0x13   : > { %p83_p3 = scmp.ne.s32.totalorder %s1544_s13, %s1540_s12  ;;  %p2279_p4 = scmp.eq.s32.totalorder %s1605_s16, 0 }
  0x14   : > { %s1621_s21 = scalar_select %p68_p1, %s1548_s14, %s70_s19  }
  0x15   : > { %p1623_p5 = por %p78_p2, %p77_p0  ;;  %p1629_p6 = por %p2279_p4, %p83_p3 }
  0x16   : > { %2306 = sst [smem:[#allocation20_spill]] %s1621_s21  ;;  %p107_p7 = scmp.eq.s32.totalorder %s1605_s16, 1 }
  0x17   : > { %s2307_s22 = scalar_select %p1623_p5, 1, 0 }
  0x18   : > { %s2308_s23 = scalar_select %p1629_p6, 1, 0 }
  0x19   : > { %p113_p8 = scmp.eq.s32.totalorder %s1249_s17, 1  ;;  %p1250_p9 = scmp.ge.s32.totalorder %s1552_s15, 1 }
  0x1a   : > { %p120_p10 = scmp.lt.s32.totalorder %s1552_s15, 3  ;;  %p1636_p11 = por %p107_p7, %p77_p0 }
  0x1b   : > { %p1640_p12 = por %p113_p8, %p83_p3  ;;  %p1344_p4 = scmp.lt.s32.totalorder %s1552_s15, 2 }
  0x1c   : > { %s2309_s24 = scalar_select %p1636_p11, 1, 0 }
  0x1d   : > { %s2311_s25 = scalar_select %p1640_p12, 1, 0 }
  0x1e   : > { %2310 = sst [smem:[#allocation21_spill]] %s2309_s24  ;;  %p1644_p13 = pnand %p1250_p9, %p120_p10 }
  0x1f   : > { %2312 = sst [smem:[#allocation22_spill]] %s2311_s25  ;;  %p2314_p6 = scmp.eq.s32.totalorder %s1605_s16, 0 }
  0x20   : > { %s2313_s26 = scalar_select %p1644_p13, 1, 0 }
  0x21   : > { %p1327_p2 = pneg %p1644_p13  ;;  %p2316_p0 = scmp.ne.s32.totalorder %s2307_s22, 0 }
  0x22   : > { %s1554_s29 = smov [#allocation6]   ;;  %s1555_s4 = smov [#allocation2]  }
  0x23   : > { %p1654_p5 = pnand %p1327_p2, %p2314_p6  ;;  %p1660_p3 = pnand %p1344_p4, %p2316_p0 }
  0x24   : > { %s141_s30 = sshll.u32 %s1554_s29, 4  ;;  %s2318_s0 = sld [smem:[#allocation27_spill]]  ;;  %s142_s30 = int_to_ptr.vmem [resolvable:$true] %s141_s30 }
  0x25   : > { %s155_s7 = sand.u32 1, %s1548_s14   ;;  %p1428_p6 = pneg %p1654_p5 }
  0x26   : > { %s1437_s8 = scalar_lea.vmem %s142_s30, 1536  ;;  %p1445_p4 = scmp.lt.s32.totalorder %s142_s30, %s142_s30 }
  0x27   : > { %p1438_p7 = scmp.ne.s32.totalorder %s142_s30, %s1437_s8  ;;  %p1446_p10 = scmp.lt.s32.totalorder %s1437_s8, %s1437_s8 }
  0x29   : > { %p1440_p8 = pnand %p1438_p7, %p1428_p6  ;;  %p1447_p2 = por %p1446_p10, %p1445_p4 }
  0x2a   : > { %1330 = dma.hbm_to_smem (!%p1654_p5), %s2318_s0, 32, %s1555_s4, [#allocation5]  }
  0x2b   : > { %p1441_p9 = pneg %p1440_p8 }
  0x2d   : > { %p1448_p0 = pnand %p1447_p2, %p1441_p9 }
  0x2f   : > { %1451 = shalt.err (!%p1448_p0)
}
  0x30   : > { %s1556_s9 = smov 128   ;;  %s1557_s10 = smov 8  }
  0x31   : > { %s2319_s1 = sld [smem:[#allocation28_spill]]  ;;  %s1272_s19 = smul.u32 48, %s155_s7 }
  0x32   : > { %s1273_s20 = smul.u32 768, %s1552_s15  ;;  %s2320_s2 = sld [smem:[#allocation29_spill]] }
  0x33   : > { %s159_s5 = scalar_lea.vmem [#allocation7], %s1272_s19  ;;  %s1688_s27 = scalar_lea.sflag [#allocation8], %s155_s7 }
  0x34   : > { %s166_s6 = sshll.u32 %s159_s5, 4  ;;  %s1686_s6 = int_to_ptr.vmem [resolvable:$true] %s166_s6 }
  0x37   : > { %1333 = dma.hbm_to_vmem [thread:$0]  (!%p1654_p5), %s2319_s1, 1536, %s142_s30, [#allocation3], %s1556_s9, %s1556_s9, %s1557_s10  }
  0x38   : > { %s1684_s4 = scalar_lea.hbm %s2320_s2, %s1273_s20  ;;  %p1454_p5 = pneg %p1660_p3 }
  0x39   : > { %s1452_s8 = scalar_lea.hbm %s1684_s4, 768  ;;  %s1457_s17 = scalar_lea.hbm %s2320_s2, 1536 }
  0x3a   : > { %p1453_p6 = scmp.ne.s32.totalorder %s1684_s4, %s1452_s8  ;;  %p1458_p9 = scmp.lt.s32.totalorder %s1684_s4, %s2320_s2 }
  0x3b   : > { %p1459_p4 = scmp.lt.s32.totalorder %s1457_s17, %s1452_s8 }
  0x3c   : > { %p1455_p7 = pnand %p1454_p5, %p1453_p6 }
  0x3d   : > { %p1460_p10 = por %p1459_p4, %p1458_p9 }
  0x3e   : > { %p1456_p8 = pneg %p1455_p7 }
  0x40   : > { %p1461_p2 = pnand %p1460_p10, %p1456_p8 }
  0x42   : > { %1464 = shalt.err (!%p1461_p2)
}
  0x43   : > { %s1465_s7 = scalar_lea.vmem %s1686_s6, 768  ;;  %s1558_s19 = smov [#allocation7]  }
  0x44   : > { %p1466_p0 = scmp.ne.s32.totalorder %s1686_s6, %s1465_s7  ;;  %s1470_s29 = sshll.u32 %s1558_s19, 4  ;;  %s1471_s29 = int_to_ptr.vmem [resolvable:$false] %s1470_s29 }
  0x45   : > { %s1472_s5 = scalar_lea.vmem %s1471_s29, 1536  ;;  %p1473_p7 = scmp.lt.s32.totalorder %s1686_s6, %s1471_s29 }
  0x46   : > { %p1468_p1 = pnand %p1466_p0, %p1454_p5  ;;  %p1474_p12 = scmp.lt.s32.totalorder %s1472_s5, %s1465_s7 }
  0x48   : > { %p1469_p6 = pneg %p1468_p1  ;;  %p1475_p11 = por %p1474_p12, %p1473_p7 }
  0x4a   : > { %p1476_p13 = pnand %p1475_p11, %p1469_p6 }
  0x4c   : > { %1479 = shalt.err (!%p1476_p13)
}
  0x4d   : > { %1337 = dma.hbm_to_vmem [thread:$0]  (!%p1660_p3), %s1684_s4, 768, %s1686_s6, %s1688_s27, %s1556_s9, %s1556_s9, %s1557_s10  }
  0x4e   : > { %p2321_p1 = scmp.ne.s32.totalorder %s2313_s26, 0 }
  0x50   : > { %178 = sbr.rel (%p2321_p1) target bundleno = 3456 (0xd80), region = 32 }
  0x55   : > { %p2322_p5 = scmp.eq.s32.totalorder %s1605_s16, 0 }
  0x57   : > { %1523 = dma.done.wait (%p2322_p5), [#allocation5], 32   ;;  %p2323_p8 = pmov %p2322_p5 }
  0x58   : > { %p2324_p11 = pmov %p2322_p5 }
  0x59   : > { %1525 = vsyncadd (%p2323_p8), [#allocation5], 4294967264 }
  0x5a   : > { %1527 = dma.done.wait (%p2324_p11), [#allocation3], 1536   ;;  %p2325_p12 = pmov %p2322_p5 }
  0x5b   : > { %s1723_s28 = sand.u32 1, %s1544_s13   ;;  %p2327_p13 = scmp.ne.s32.totalorder %s2308_s23, 0 }
  0x5c   : > { %1529 = vsyncadd (%p2325_p12), [#allocation3], 4294965760  ;;  %2326 = sst [smem:[#allocation23_spill]] %s1723_s28  ;;  %s1274_s26 = smul.u32 48, %s1723_s28 }
  0x5d   : > { %s189_s9 = scalar_lea.sflag [#allocation8], %s1723_s28 }
  0x5e   : > { %s1727_s10 = scalar_lea.vmem [#allocation7], %s1274_s26 }
  0x5f   : > { %1531 = dma.done.wait (%p2327_p13), %s189_s9, 768  }
  0x60   : > { %1533 = vsyncadd (%p2327_p13), %s189_s9, 4294966528 }
  0x61   : > { %197 = sfence }
  0x62   : > { %s1734_s4 = smul.u32 80, %s1605_s16  ;;  %v1741_v0 = vld [vmem:[#allocation6] sm:$0xff]  ;;  %v1743_v1 = vld [vmem:[#allocation6 + $0x8] sm:$0xff]  ;;  %v1745_v2 = vld [vmem:[#allocation6 + $0x10] sm:$0xff]  ;;  %v239_v34 = vlaneseq }
  0x63   : > { %v1747_v4 = vld [vmem:[#allocation6 + $0x18] sm:$0xff]  ;;  %v1753_v12 = vld [vmem:[#allocation6 + $0x20] sm:$0xff] }
  0x64   : > { %s258_s6 = sadd.s32 1, %s1734_s4  ;;  %s260_s8 = sadd.s32 2, %s1734_s4  ;;  %v240_v35 = vshrl.u32 %v239_v34, 7  ;;  %v1766_v37 = vand.u32 127, %v239_v34 }
  0x65   : > { %s259_s27 = sld [smem:[#allocation2 + %s258_s6]]  ;;  %s262_s11 = sadd.s32 3, %s1734_s4 }
  0x66   : > { %s261_s30 = sld [smem:[#allocation2 + %s260_s8]]  ;;  %s264_s20 = sadd.s32 4, %s1734_s4  ;;  %v241_v36 = vmul.u32 128, %v240_v35 }
  0x67   : > { %s263_s17 = sld [smem:[#allocation2 + %s262_s11]]  ;;  %s266_s7 = sadd.s32 5, %s1734_s4 }
  0x68   : > { %s265_s22 = sld [smem:[#allocation2 + %s264_s20]]  ;;  %v1769_v38 = vadd.s32 %v1766_v37, %v241_v36  ;;  %s336_s26 = sadd.s32 11, %s1734_s4 }
  0x69   : > { %s267_s23 = sld [smem:[#allocation2 + %s266_s7]]  ;;  %s338_s9 = sadd.s32 12, %s1734_s4 }
  0x6a   : > { %s257_s19 = sld [smem:[#allocation2 + %s1734_s4]]  ;;  %s340_s6 = sadd.s32 13, %s1734_s4 }
  0x6b   : > { %v271_v3 = vstv %s259_s27  ;;  %s337_s27 = sld [smem:[#allocation2 + %s336_s26]]  ;;  %s342_s8 = sadd.s32 14, %s1734_s4 }
  0x6c   : > { %v272_v5 = vmax.f32 %v271_v3, %v1741_v0  ;;  %v277_v6 = vstv %s261_s30  ;;  %s339_s30 = sld [smem:[#allocation2 + %s338_s9]]  ;;  %s344_s20 = sadd.s32 15, %s1734_s4 }
  0x6d   : > { %v269_v7 = vstv %s263_s17  ;;  %v278_v8 = vmax.f32 %v277_v6, %v1743_v1  ;;  %s341_s11 = sld [smem:[#allocation2 + %s340_s6]]  ;;  %s334_s7 = sadd.s32 10, %s1734_s4 }
  0x6e   : > { %v270_v9 = vmin.f32 %v269_v7, %v1745_v2  ;;  %v275_v10 = vstv %s265_s22  ;;  %s343_s17 = sld [smem:[#allocation2 + %s342_s8]]  ;;  %s419_s9 = sadd.s32 23, %s1734_s4 }
  0x6f   : > { %v276_v11 = vmin.f32 %v275_v10, %v1747_v4  ;;  %v282_v14 = vstv %s267_s23  ;;  %s345_s22 = sld [smem:[#allocation2 + %s344_s20]]  ;;  %s950_s1 = sadd.s32 37, %s1734_s4 }
  0x70   : > { %v273_v13 = vsub.f32 %v270_v9, %v272_v5  ;;  %v283_v18 = vadd.f32 %v282_v14, %v1753_v12  ;;  %p268_p3 = scmp.gt.f32.partialorder %s257_s19, 0.0  ;;  %s335_s23 = sld [smem:[#allocation2 + %s334_s7]] }
  0x71   : > { %v279_v15 = vsub.f32 %v276_v11, %v278_v8  ;;  %v349_v44 = vstv %s337_s27  ;;  %s421_s27 = sadd.s32 24, %s1734_s4  ;;  %s420_s8 = sld [smem:[#allocation2 + %s419_s9]] }
  0x72   : > { %v274_v16 = vmax.f32 %v273_v13, 0.0  ;;  %s288_s29 = scalar_select %p268_p3, 1, 0  ;;  %v355_v46 = vstv %s339_s30  ;;  %v350_v48 = vmax.f32 %v349_v44, %v1741_v0 }
  0x73   : > { %v280_v17 = vmax.f32 %v279_v15, 0.0  ;;  %v347_v43 = vstv %s341_s11  ;;  %v356_v50 = vmax.f32 %v355_v46, %v1743_v1  ;;  %s422_s30 = sld [smem:[#allocation2 + %s421_s27]]  ;;  %s423_s11 = sadd.s32 25, %s1734_s4 }
  0x74   : > { %v289_v22 = vstv %s288_s29  ;;  %v353_v45 = vstv %s343_s17  ;;  %v348_v47 = vmin.f32 %v347_v43, %v1745_v2  ;;  %s415_s29 = sadd.s32 21, %s1734_s4  ;;  %s424_s17 = sld [smem:[#allocation2 + %s423_s11]] }
  0x75   : > { %v281_v19 = vmul.f32 %v280_v17, %v274_v16  ;;  %vm1757_vm0 = vcmp.eq.s32.totalorder %v289_v22, 1  ;;  %v354_v49 = vmin.f32 %v353_v45, %v1747_v4  ;;  %v360_v55 = vstv %s345_s22  ;;  %s416_s26 = sld [smem:[#allocation2 + %s415_s29]]  ;;  %s413_s7 = sadd.s32 20, %s1734_s4 }
  0x76   : > { %v351_v51 = vsub.f32 %v348_v47, %v350_v48  ;;  %v361_v57 = vadd.f32 %v360_v55, %v1753_v12  ;;  %p346_p9 = scmp.gt.f32.partialorder %s335_s23, 0.0  ;;  %s414_s23 = sld [smem:[#allocation2 + %s413_s7]] }
  0x77   : > { %v284_v20 = vsub.f32 %v283_v18, %v281_v19  ;;  %v357_v52 = vsub.f32 %v354_v49, %v356_v50  ;;  %s494_s29 = sadd.s32 31, %s1734_s4  ;;  %s498_s9 = sadd.s32 33, %s1734_s4 }
  0x78   : > { %v352_v53 = vmax.f32 %v351_v51, 0.0  ;;  %s366_s19 = scalar_select %p346_p9, 1, 0 }
  0x79   : > { %v285_v21 = vmax.f32 %v284_v20, 1e-12  ;;  %v358_v54 = vmax.f32 %v357_v52, 0.0  ;;  %v432_v36 = vstv %s422_s30  ;;  %s500_s27 = sadd.s32 34, %s1734_s4  ;;  %s502_s11 = sadd.s32 35, %s1734_s4 }
  0x7a   : > { %v367_v62 = vstv %s366_s19  ;;  %s501_s30 = sld [smem:[#allocation2 + %s500_s27]]  ;;  %s579_s27 = sadd.s32 44, %s1734_s4 }
  0x7b   : > { %1388 = vrcp.f32 %v285_v21  ;;  %v359_v56 = vmul.f32 %v358_v54, %v352_v53  ;;  %vm1784_vm3 = vcmp.eq.s32.totalorder %v367_v62, 1  ;;  %s952_s2 = sadd.s32 38, %s1734_s4  ;;  %s965_s14 = sadd.s32 46, %s1734_s4 }
  0x7c   : > { %p425_p4 = scmp.gt.f32.partialorder %s414_s23, 0.0  ;;  %s967_s13 = sadd.s32 47, %s1734_s4 }
  0x7d   : > { %v362_v58 = vsub.f32 %v361_v57, %v359_v56  ;;  %s982_s18 = sadd.s32 56, %s1734_s4  ;;  %s2039_s15 = sld [smem:[#allocation2 + %s967_s13]] }
  0x7e   : > { %s445_s19 = scalar_select %p425_p4, 1, 0 }
  0x7f   : > { %v363_v59 = vmax.f32 %v362_v58, 1e-12  ;;  %s2042_s25 = sld [smem:[#allocation2 + %s982_s18]]  ;;  %s971_s3 = sadd.s32 49, %s1734_s4 }
  0x80   : > { %v446_v53 = vstv %s445_s19  ;;  %s986_s24 = sadd.s32 58, %s1734_s4  ;;  %s988_s18 = sadd.s32 59, %s1734_s4 }
  0x81   : > { %1390 = vrcp.f32 %v363_v59  ;;  %vm1808_vm8 = vcmp.eq.s32.totalorder %v446_v53, 1  ;;  %s2060_s28 = sld [smem:[#allocation2 + %s971_s3]]  ;;  %s1005_s3 = sadd.s32 69, %s1734_s4 }
  0x82   : > { %s2063_s16 = sld [smem:[#allocation2 + %s986_s24]]  ;;  %s1016_s24 = sadd.s32 76, %s1734_s4 }
  0x87   : > { %2346 = sst [smem:[#allocation26_spill]] %s2060_s28 }
  0x88   : > { %v1389_v23 = vpop.eup %1388 }
  0x89   : > { %v287_v25 = vmul.f32 %v1389_v23, %v281_v19 }
  0x8b   : > { %v1763_v26 = vsel %vm1757_vm0, %v287_v25, -1.0 }
  0x8c   : > { %294 = vmax.xlane.f32.xlu0 %v1763_v26 }
  0x8e   : > { %v1391_v61 = vpop.eup %1390 }
  0x8f   : > { %v365_v5 = vmul.f32 %v1391_v61, %v359_v56 }
  0x91   : > { %v1790_v8 = vsel %vm1784_vm3, %v365_v5, -1.0 }
 0x115   : > { %v295_v27 = vpop.xlane.xlu0 %294 }
 0x116   : > { %v296_v28 = vrot.slane %v295_v27, 4 }
 0x118   : > { %v297_v29 = vmax.f32 %v295_v27, %v296_v28 }
 0x11a   : > { %v298_v30 = vrot.slane %v297_v29, 2 }
 0x11c   : > { %v299_v31 = vmax.f32 %v297_v29, %v298_v30  ;;  %v428_v30 = vstv %s416_s26  ;;  %s495_s26 = sld [smem:[#allocation2 + %s494_s29]]  ;;  %s573_s29 = sadd.s32 41, %s1734_s4 }
 0x11e   : > { %v300_v32 = vrot.slane %v299_v31, 1 }
 0x120   : > { %v301_v33 = vmax.f32 %v299_v31, %v300_v32  ;;  %v429_v31 = vmax.f32 %v428_v30, %v1741_v0 }
 0x122   : > { %1275 = vpush %v301_v33  ;;  %v426_v33 = vstv %s420_s8  ;;  %s499_s8 = sld [smem:[#allocation2 + %s498_s9]]  ;;  %s577_s9 = sadd.s32 43, %s1734_s4 }
 0x123   : > { %v427_v35 = vmin.f32 %v426_v33, %v1745_v2 }
 0x153   : > { %s1276_s5 = spop %1275 }
 0x154   : > { %v303_v39 = vstv %s1276_s5  ;;  %s417_s5 = sadd.s32 22, %s1734_s4 }
 0x155   : > { %vm304_vm1 = vcmp.ge.f32.partialorder %v1763_v26, %v303_v39  ;;  %s418_s6 = sld [smem:[#allocation2 + %s417_s5]]  ;;  %v433_v39 = vmin.f32 %v432_v36, %v1747_v4  ;;  %s496_s5 = sadd.s32 32, %s1734_s4 }
 0x156   : > { %v305_v40 = vsel %vm304_vm1, %v1769_v38, 1024 }
 0x157   : > { %v307_v41 = vshra.s32 %v305_v40, 16  ;;  %v306_v60 = vand.u32 65535, %v305_v40  ;;  %v430_v40 = vsub.f32 %v427_v35, %v429_v31  ;;  %v511_v31 = vstv %s501_s30  ;;  %s580_s30 = sld [smem:[#allocation2 + %s579_s27]]  ;;  %s658_s27 = sadd.s32 54, %s1734_s4 }
 0x159   : > { %v309_v42 = vcvt.s32.f32 %v307_v41  ;;  %v308_v3 = vcvt.s32.f32 %v306_v60  ;;  %v431_v43 = vmax.f32 %v430_v40, 0.0 }
 0x15b   : > { %310 = vmin.xlane.f32.xlu0 %v309_v42  ;;  %v434_v32 = vstv %s418_s6  ;;  %s497_s6 = sld [smem:[#allocation2 + %s496_s5]]  ;;  %s575_s5 = sadd.s32 42, %s1734_s4 }
 0x15c   : > { %v435_v34 = vmax.f32 %v434_v32, %v1743_v1  ;;  %v512_v32 = vmin.f32 %v511_v31, %v1747_v4 }
 0x15d   : > { %v590_v31 = vstv %s580_s30  ;;  %s659_s30 = sld [smem:[#allocation2 + %s658_s27]]  ;;  %s737_s27 = sadd.s32 64, %s1734_s4 }
 0x15e   : > { %v436_v41 = vsub.f32 %v433_v39, %v435_v34 }
 0x160   : > { %v437_v44 = vmax.f32 %v436_v41, 0.0 }
 0x162   : > { %v438_v46 = vmul.f32 %v437_v44, %v431_v43 }
 0x1e4   : > { %v311_v63 = vpop.xlane.xlu0 %310 }
 0x1e5   : > { %vm312_vm2 = vcmp.eq.f32.partialorder %v309_v42, %v311_v63  ;;  %v317_v9 = vcvt.f32.s32 %v311_v63  ;;  %v439_v42 = vstv %s424_s17  ;;  %s503_s17 = sld [smem:[#allocation2 + %s502_s11]]  ;;  %s581_s11 = sadd.s32 45, %s1734_s4 }
 0x1e6   : > { %v313_v7 = vsel %vm312_vm2, %v308_v3, inf  ;;  %v440_v45 = vadd.f32 %v439_v42, %v1753_v12 }
 0x1e7   : > { %314 = vmin.xlane.f32.xlu1 %v313_v7  ;;  %v318_v11 = vshll.u32 %v317_v9, 16 }
 0x1e8   : > { %v441_v47 = vsub.f32 %v440_v45, %v438_v46 }
 0x1ea   : > { %v442_v49 = vmax.f32 %v441_v47, 1e-12 }
 0x1eb   : > { %373 = vmax.xlane.f32.xlu1 %v1790_v8  ;;  %v518_v36 = vstv %s503_s17  ;;  %s582_s17 = sld [smem:[#allocation2 + %s581_s11]]  ;;  %s660_s11 = sadd.s32 55, %s1734_s4 }
 0x1ec   : > { %1392 = vrcp.f32 %v442_v49  ;;  %v519_v41 = vadd.f32 %v518_v36, %v1753_v12 }
 0x1f9   : > { %v1393_v54 = vpop.eup %1392 }
 0x1fa   : > { %v444_v56 = vmul.f32 %v1393_v54, %v438_v46  ;;  %v1559_v46 = vmov 4294967295  }
 0x1fc   : > { %v1814_v57 = vsel %vm1808_vm8, %v444_v56, -1.0 }
 0x270   : > { %v315_v10 = vpop.xlane.xlu1 %314 }
 0x271   : > { %v316_v13 = vcvt.f32.s32 %v315_v10 }
 0x273   : > { %v319_v14 = vadd.s32 %v318_v11, %v316_v13 }
 0x274   : > { %v374_v15 = vpop.xlane.xlu1 %373 }
 0x275   : > { %v320_v16 = vrot.slane %v319_v14, 4  ;;  %v375_v17 = vrot.slane %v374_v15, 4 }
 0x277   : > { %vm321_vm4 = vcmp.lt.s32.totalorder %v319_v14, %v320_v16  ;;  %v376_v18 = vmax.f32 %v374_v15, %v375_v17 }
 0x278   : > { %v322_v19 = vsel %vm321_vm4, %v319_v14, %v320_v16 }
 0x279   : > { %v377_v20 = vrot.slane %v376_v18, 2  ;;  %v323_v21 = vrot.slane %v322_v19, 2 }
 0x27b   : > { %vm324_vm5 = vcmp.lt.s32.totalorder %v322_v19, %v323_v21  ;;  %v378_v22 = vmax.f32 %v376_v18, %v377_v20 }
 0x27c   : > { %v325_v23 = vsel %vm324_vm5, %v322_v19, %v323_v21 }
 0x27d   : > { %v326_v25 = vrot.slane %v325_v23, 1  ;;  %v379_v27 = vrot.slane %v378_v22, 1 }
 0x27f   : > { %vm327_vm6 = vcmp.lt.s32.totalorder %v325_v23, %v326_v25  ;;  %v380_v28 = vmax.f32 %v378_v22, %v379_v27  ;;  %v513_v27 = vstv %s497_s6  ;;  %s576_s6 = sld [smem:[#allocation2 + %s575_s5]]  ;;  %s654_s5 = sadd.s32 52, %s1734_s4 }
 0x280   : > { %v328_v29 = vsel %vm327_vm6, %v325_v23, %v326_v25  ;;  %v507_v23 = vstv %s495_s26  ;;  %s574_s26 = sld [smem:[#allocation2 + %s573_s29]]  ;;  %s652_s29 = sadd.s32 51, %s1734_s4 }
 0x281   : > { %1277 = vpush %v328_v29  ;;  %v508_v25 = vmax.f32 %v507_v23, %v1741_v0  ;;  %v514_v29 = vmax.f32 %v513_v27, %v1743_v1 }
 0x282   : > { %1279 = vpush %v380_v28  ;;  %v505_v28 = vstv %s499_s8  ;;  %s578_s8 = sld [smem:[#allocation2 + %s577_s9]]  ;;  %s656_s9 = sadd.s32 53, %s1734_s4 }
 0x283   : > { %v506_v30 = vmin.f32 %v505_v28, %v1745_v2  ;;  %v515_v35 = vsub.f32 %v512_v32, %v514_v29  ;;  %v591_v32 = vmin.f32 %v590_v31, %v1747_v4 }
 0x285   : > { %v509_v34 = vsub.f32 %v506_v30, %v508_v25  ;;  %v516_v40 = vmax.f32 %v515_v35, 0.0  ;;  %v592_v27 = vstv %s576_s6  ;;  %v597_v35 = vstv %s582_s17  ;;  %s655_s6 = sld [smem:[#allocation2 + %s654_s5]]  ;;  %s733_s5 = sadd.s32 62, %s1734_s4 }
 0x286   : > { %v586_v23 = vstv %s574_s26  ;;  %v593_v29 = vmax.f32 %v592_v27, %v1743_v1  ;;  %s653_s26 = sld [smem:[#allocation2 + %s652_s29]]  ;;  %s731_s29 = sadd.s32 61, %s1734_s4 }
 0x287   : > { %v510_v39 = vmax.f32 %v509_v34, 0.0  ;;  %v587_v25 = vmax.f32 %v586_v23, %v1741_v0  ;;  %s661_s17 = sld [smem:[#allocation2 + %s660_s11]]  ;;  %s739_s11 = sadd.s32 65, %s1734_s4 }
 0x288   : > { %v584_v28 = vstv %s578_s8  ;;  %v594_v34 = vsub.f32 %v591_v32, %v593_v29  ;;  %s657_s8 = sld [smem:[#allocation2 + %s656_s9]]  ;;  %v669_v29 = vstv %s659_s30  ;;  %s735_s9 = sadd.s32 63, %s1734_s4 }
 0x289   : > { %v517_v42 = vmul.f32 %v516_v40, %v510_v39  ;;  %v585_v30 = vmin.f32 %v584_v28, %v1745_v2  ;;  %v598_v40 = vadd.f32 %v597_v35, %v1753_v12  ;;  %s738_s30 = sld [smem:[#allocation2 + %s737_s27]]  ;;  %s816_s27 = sadd.s32 74, %s1734_s4 }
 0x28a   : > { %v595_v39 = vmax.f32 %v594_v34, 0.0 }
 0x28b   : > { %v520_v44 = vsub.f32 %v519_v41, %v517_v42  ;;  %v671_v23 = vstv %s655_s6  ;;  %s734_s6 = sld [smem:[#allocation2 + %s733_s5]]  ;;  %s812_s5 = sadd.s32 72, %s1734_s4 }
 0x28c   : > { %v672_v27 = vmax.f32 %v671_v23, %v1743_v1 }
 0x2b2   : > { %s1803_s20 = spop %1277 }
 0x2b3   : > { %s1280_s22 = spop %1279  ;;  %v330_v33 = vstv %s1803_s20  ;;  %s492_s20 = sadd.s32 30, %s1734_s4 }
 0x2b4   : > { %v382_v48 = vstv %s1280_s22  ;;  %vm331_vm13 = vcmp.eq.s32.totalorder %v1769_v38, %v330_v33  ;;  %s493_s23 = sld [smem:[#allocation2 + %s492_s20]]  ;;  %v588_v33 = vsub.f32 %v585_v30, %v587_v25  ;;  %s571_s20 = sadd.s32 40, %s1734_s4  ;;  %v663_v25 = vstv %s657_s8 }
 0x2b5   : > { %vm383_vm7 = vcmp.ge.f32.partialorder %v1790_v8, %v382_v48  ;;  %vm332_vm14 = vmand %vm331_vm13, %vm1757_vm0  ;;  %v521_v48 = vmax.f32 %v520_v44, 1e-12  ;;  %v664_v28 = vmin.f32 %v663_v25, %v1745_v2  ;;  %v670_v30 = vmin.f32 %v669_v29, %v1747_v4  ;;  %s736_s8 = sld [smem:[#allocation2 + %s735_s9]]  ;;  %s814_s9 = sadd.s32 73, %s1734_s4 }
 0x2b6   : > { %v384_v50 = vsel %vm383_vm7, %v1769_v38, 1024  ;;  %v333_v47 = vsel %vm332_vm14, 0, %v1559_v46  ;;  %v589_v36 = vmax.f32 %v588_v33, 0.0  ;;  %v676_v33 = vstv %s661_s17  ;;  %s740_s17 = sld [smem:[#allocation2 + %s739_s11]]  ;;  %s818_s11 = sadd.s32 75, %s1734_s4 }
 0x2b7   : > { %v386_v51 = vshra.s32 %v384_v50, 16  ;;  %v385_v58 = vand.u32 65535, %v384_v50  ;;  %1394 = vrcp.f32 %v521_v48  ;;  %v673_v32 = vsub.f32 %v670_v30, %v672_v27 }
 0x2b8   : > { %v596_v41 = vmul.f32 %v595_v39, %v589_v36  ;;  %v677_v36 = vadd.f32 %v676_v33, %v1753_v12 }
 0x2b9   : > { %v388_v52 = vcvt.s32.f32 %v386_v51  ;;  %v387_v60 = vcvt.s32.f32 %v385_v58  ;;  %v674_v35 = vmax.f32 %v673_v32, 0.0 }
 0x2ba   : > { %p504_p10 = scmp.gt.f32.partialorder %s493_s23, 0.0  ;;  %s572_s23 = sld [smem:[#allocation2 + %s571_s20]] }
 0x2bb   : > { %389 = vmin.xlane.f32.xlu0 %v388_v52  ;;  %s650_s20 = sadd.s32 50, %s1734_s4  ;;  %v742_v23 = vstv %s736_s8  ;;  %s815_s8 = sld [smem:[#allocation2 + %s814_s9]] }
 0x2bc   : > { %s524_s19 = scalar_select %p504_p10, 1, 0  ;;  %v743_v27 = vmin.f32 %v742_v23, %v1745_v2  ;;  %v755_v32 = vstv %s740_s17 }
 0x2bd   : > { %s819_s17 = sld [smem:[#allocation2 + %s818_s11]]  ;;  %s899_s9 = sadd.s32 7, %s1734_s4 }
 0x2be   : > { %s914_s11 = sadd.s32 16, %s1734_s4 }
 0x2bf   : > { %452 = vmax.xlane.f32.xlu0 %v1814_v57 }
 0x2c0   : > { %p583_p2 = scmp.gt.f32.partialorder %s572_s23, 0.0  ;;  %s651_s23 = sld [smem:[#allocation2 + %s650_s20]] }
 0x2c1   : > { %s729_s20 = sadd.s32 60, %s1734_s4 }
 0x2c4   : > { %v1395_v53 = vpop.eup %1394 }
 0x2c5   : > { %v523_v54 = vmul.f32 %v1395_v53, %v517_v42 }
 0x2c6   : > { %p662_p0 = scmp.gt.f32.partialorder %s651_s23, 0.0  ;;  %s730_s23 = sld [smem:[#allocation2 + %s729_s20]] }
 0x2c7   : > { %s808_s20 = sadd.s32 70, %s1734_s4 }
 0x2cc   : > { %p741_p6 = scmp.gt.f32.partialorder %s730_s23, 0.0  ;;  %s809_s23 = sld [smem:[#allocation2 + %s808_s20]] }
 0x2cd   : > { %s918_s20 = sadd.s32 18, %s1734_s4 }
 0x2d2   : > { %p820_p7 = scmp.gt.f32.partialorder %s809_s23, 0.0  ;;  %s1989_s23 = sld [smem:[#allocation2 + %s914_s11]] }
 0x2d3   : > { %s937_s11 = sadd.s32 29, %s1734_s4 }
 0x344   : > { %v390_v59 = vpop.xlane.xlu0 %389 }
 0x345   : > { %vm391_vm9 = vcmp.eq.f32.partialorder %v388_v52, %v390_v59  ;;  %v396_v3 = vcvt.f32.s32 %v390_v59  ;;  %v525_v52 = vstv %s524_s19  ;;  %s603_s19 = scalar_select %p583_p2, 1, 0 }
 0x346   : > { %v392_v61 = vsel %vm391_vm9, %v387_v60, inf  ;;  %vm1839_vm0 = vcmp.eq.s32.totalorder %v525_v52, 1 }
 0x347   : > { %393 = vmin.xlane.f32.xlu1 %v392_v61  ;;  %v397_v9 = vshll.u32 %v396_v3, 16  ;;  %v1845_v56 = vsel %vm1839_vm0, %v523_v54, -1.0 }
 0x348   : > { %v453_v62 = vpop.xlane.xlu0 %452 }
 0x349   : > { %v454_v63 = vrot.slane %v453_v62, 4 }
 0x34b   : > { %v455_v5 = vmax.f32 %v453_v62, %v454_v63 }
 0x34d   : > { %v456_v13 = vrot.slane %v455_v5, 2 }
 0x34f   : > { %v457_v16 = vmax.f32 %v455_v5, %v456_v13 }
 0x351   : > { %v458_v19 = vrot.slane %v457_v16, 1 }
 0x353   : > { %v459_v22 = vmax.f32 %v457_v16, %v458_v19 }
 0x3d0   : > { %v394_v7 = vpop.xlane.xlu1 %393 }
 0x3d1   : > { %v395_v10 = vcvt.f32.s32 %v394_v7 }
 0x3d3   : > { %v398_v11 = vadd.s32 %v397_v9, %v395_v10 }
 0x3d5   : > { %v399_v14 = vrot.slane %v398_v11, 4 }
 0x3d7   : > { %vm400_vm10 = vcmp.lt.s32.totalorder %v398_v11, %v399_v14 }
 0x3d8   : > { %v401_v15 = vsel %vm400_vm10, %v398_v11, %v399_v14 }
 0x3d9   : > { %v402_v17 = vrot.slane %v401_v15, 2 }
 0x3db   : > { %vm403_vm11 = vcmp.lt.s32.totalorder %v401_v15, %v402_v17 }
 0x3dc   : > { %v404_v18 = vsel %vm403_vm11, %v401_v15, %v402_v17 }
 0x3dd   : > { %v405_v20 = vrot.slane %v404_v18, 1 }
 0x3df   : > { %vm406_vm12 = vcmp.lt.s32.totalorder %v404_v18, %v405_v20 }
 0x3e0   : > { %v407_v21 = vsel %vm406_vm12, %v404_v18, %v405_v20 }
 0x3e1   : > { %1281 = vpush %v407_v21 }
 0x3e2   : > { %1283 = vpush %v459_v22 }
 0x412   : > { %s1282_s22 = spop %1281 }
 0x413   : > { %v409_v43 = vstv %s1282_s22  ;;  %s1284_s7 = spop %1283 }
 0x414   : > { %vm410_vm15 = vcmp.eq.s32.totalorder %v1769_v38, %v409_v43  ;;  %v461_v45 = vstv %s1284_s7  ;;  %v599_v43 = vsub.f32 %v598_v40, %v596_v41 }
 0x415   : > { %vm411_vm1 = vmand %vm410_vm15, %vm1784_vm3  ;;  %vm462_vm2 = vcmp.ge.f32.partialorder %v1814_v57, %v461_v45 }
 0x416   : > { %v1835_v49 = vsel %vm411_vm1, 1, %v333_v47  ;;  %v463_v24 = vsel %vm462_vm2, %v1769_v38, 1024  ;;  %v600_v45 = vmax.f32 %v599_v43, 1e-12 }
 0x417   : > { %v465_v50 = vshra.s32 %v463_v24, 16  ;;  %v464_v58 = vand.u32 65535, %v463_v24 }
 0x418   : > { %1396 = vrcp.f32 %v600_v45 }
 0x419   : > { %v467_v51 = vcvt.s32.f32 %v465_v50  ;;  %v466_v60 = vcvt.s32.f32 %v464_v58  ;;  %v604_v50 = vstv %s603_s19  ;;  %s682_s19 = scalar_select %p662_p0, 1, 0 }
 0x41a   : > { %vm1867_vm11 = vcmp.eq.s32.totalorder %v604_v50, 1 }
 0x41b   : > { %468 = vmin.xlane.f32.xlu1 %v467_v51 }
 0x41f   : > { %531 = vmax.xlane.f32.xlu1 %v1845_v56 }
 0x4a4   : > { %v469_v59 = vpop.xlane.xlu1 %468 }
 0x4a5   : > { %vm470_vm3 = vcmp.eq.f32.partialorder %v467_v51, %v469_v59  ;;  %v475_v3 = vcvt.f32.s32 %v469_v59  ;;  %v1397_v51 = vpop.eup %1396 }
 0x4a6   : > { %v471_v61 = vsel %vm470_vm3, %v466_v60, inf  ;;  %v602_v52 = vmul.f32 %v1397_v51, %v596_v41 }
 0x4a7   : > { %472 = vmin.xlane.f32.xlu0 %v471_v61  ;;  %v476_v9 = vshll.u32 %v475_v3, 16 }
 0x4a8   : > { %v532_v62 = vpop.xlane.xlu1 %531 }
 0x4a9   : > { %v533_v63 = vrot.slane %v532_v62, 4 }
 0x4ab   : > { %v534_v5 = vmax.f32 %v532_v62, %v533_v63 }
 0x4ad   : > { %v535_v13 = vrot.slane %v534_v5, 2 }
 0x4af   : > { %v536_v16 = vmax.f32 %v534_v5, %v535_v13 }
 0x4b1   : > { %v537_v19 = vrot.slane %v536_v16, 1 }
 0x4b3   : > { %v538_v22 = vmax.f32 %v536_v16, %v537_v19 }
 0x530   : > { %v473_v7 = vpop.xlane.xlu0 %472 }
 0x531   : > { %v474_v10 = vcvt.f32.s32 %v473_v7 }
 0x533   : > { %v477_v11 = vadd.s32 %v476_v9, %v474_v10 }
 0x535   : > { %v478_v14 = vrot.slane %v477_v11, 4 }
 0x537   : > { %vm479_vm4 = vcmp.lt.s32.totalorder %v477_v11, %v478_v14 }
 0x538   : > { %v480_v15 = vsel %vm479_vm4, %v477_v11, %v478_v14 }
 0x539   : > { %v481_v17 = vrot.slane %v480_v15, 2 }
 0x53b   : > { %vm482_vm5 = vcmp.lt.s32.totalorder %v480_v15, %v481_v17 }
 0x53c   : > { %v483_v18 = vsel %vm482_vm5, %v480_v15, %v481_v17 }
 0x53d   : > { %v484_v20 = vrot.slane %v483_v18, 1 }
 0x53f   : > { %vm485_vm6 = vcmp.lt.s32.totalorder %v483_v18, %v484_v20 }
 0x540   : > { %v486_v21 = vsel %vm485_vm6, %v483_v18, %v484_v20 }
 0x541   : > { %1285 = vpush %v486_v21  ;;  %v665_v21 = vstv %s653_s26  ;;  %s732_s26 = sld [smem:[#allocation2 + %s731_s29]]  ;;  %s810_s29 = sadd.s32 71, %s1734_s4 }
 0x542   : > { %1287 = vpush %v538_v22  ;;  %v666_v22 = vmax.f32 %v665_v21, %v1741_v0 }
 0x544   : > { %v667_v31 = vsub.f32 %v664_v28, %v666_v22  ;;  %v750_v22 = vstv %s734_s6  ;;  %v748_v28 = vstv %s738_s30  ;;  %s813_s6 = sld [smem:[#allocation2 + %s812_s5]] }
 0x545   : > { %v751_v25 = vmax.f32 %v750_v22, %v1743_v1  ;;  %v749_v29 = vmin.f32 %v748_v28, %v1747_v4  ;;  %s817_s30 = sld [smem:[#allocation2 + %s816_s27]]  ;;  %v1412_v22 = vld [vmem:[#allocation6 + $0x10] sm:$0xff] }
 0x546   : > { %v668_v34 = vmax.f32 %v667_v31, 0.0 }
 0x547   : > { %v752_v31 = vsub.f32 %v749_v29, %v751_v25 }
 0x548   : > { %v675_v39 = vmul.f32 %v674_v35, %v668_v34  ;;  %v756_v35 = vadd.f32 %v755_v32, %v1753_v12 }
 0x549   : > { %v753_v34 = vmax.f32 %v752_v31, 0.0  ;;  %v834_v31 = vstv %s819_s17 }
 0x54a   : > { %v678_v41 = vsub.f32 %v677_v36, %v675_v39 }
 0x54b   : > { %v827_v25 = vstv %s817_s30  ;;  %s1977_s30 = sld [smem:[#allocation2 + %s899_s9]]  ;;  %s933_s9 = sadd.s32 27, %s1734_s4 }
 0x54c   : > { %v679_v43 = vmax.f32 %v678_v41, 1e-12 }
 0x54e   : > { %1398 = vrcp.f32 %v679_v43 }
 0x55b   : > { %v1399_v50 = vpop.eup %1398 }
 0x55c   : > { %v681_v51 = vmul.f32 %v1399_v50, %v675_v39 }
 0x572   : > { %s1286_s22 = spop %1285 }
 0x573   : > { %v488_v42 = vstv %s1286_s22  ;;  %s1288_s7 = spop %1287 }
 0x574   : > { %vm489_vm7 = vcmp.eq.s32.totalorder %v1769_v38, %v488_v42  ;;  %v540_v44 = vstv %s1288_s7 }
 0x575   : > { %vm490_vm9 = vmand %vm489_vm7, %vm1808_vm8  ;;  %vm541_vm10 = vcmp.ge.f32.partialorder %v1845_v56, %v540_v44 }
 0x576   : > { %v1863_v46 = vsel %vm490_vm9, 2, %v1835_v49  ;;  %v542_v47 = vsel %vm541_vm10, %v1769_v38, 1024  ;;  %v1873_v49 = vsel %vm1867_vm11, %v602_v52, -1.0 }
 0x577   : > { %v544_v48 = vshra.s32 %v542_v47, 16  ;;  %v543_v53 = vand.u32 65535, %v542_v47 }
 0x579   : > { %v546_v24 = vcvt.s32.f32 %v544_v48  ;;  %v545_v58 = vcvt.s32.f32 %v543_v53 }
 0x57b   : > { %547 = vmin.xlane.f32.xlu0 %v546_v24 }
 0x57f   : > { %610 = vmax.xlane.f32.xlu0 %v1873_v49 }
 0x604   : > { %v548_v54 = vpop.xlane.xlu0 %547 }
 0x605   : > { %vm549_vm8 = vcmp.eq.f32.partialorder %v546_v24, %v548_v54  ;;  %v554_v62 = vcvt.f32.s32 %v548_v54  ;;  %v683_v24 = vstv %s682_s19  ;;  %s761_s19 = scalar_select %p741_p6, 1, 0 }
 0x606   : > { %v550_v59 = vsel %vm549_vm8, %v545_v58, inf  ;;  %vm1895_vm3 = vcmp.eq.s32.totalorder %v683_v24, 1 }
 0x607   : > { %551 = vmin.xlane.f32.xlu1 %v550_v59  ;;  %v555_v5 = vshll.u32 %v554_v62, 16 }
 0x608   : > { %v611_v60 = vpop.xlane.xlu0 %610 }
 0x609   : > { %v612_v61 = vrot.slane %v611_v60, 4 }
 0x60b   : > { %v613_v63 = vmax.f32 %v611_v60, %v612_v61 }
 0x60d   : > { %v614_v10 = vrot.slane %v613_v63, 2 }
 0x60f   : > { %v615_v14 = vmax.f32 %v613_v63, %v614_v10 }
 0x611   : > { %v616_v17 = vrot.slane %v615_v14, 1 }
 0x613   : > { %v617_v20 = vmax.f32 %v615_v14, %v616_v17 }
 0x690   : > { %v552_v3 = vpop.xlane.xlu1 %551 }
 0x691   : > { %v553_v7 = vcvt.f32.s32 %v552_v3 }
 0x693   : > { %v556_v9 = vadd.s32 %v555_v5, %v553_v7 }
 0x695   : > { %v557_v11 = vrot.slane %v556_v9, 4 }
 0x697   : > { %vm558_vm12 = vcmp.lt.s32.totalorder %v556_v9, %v557_v11 }
 0x698   : > { %v559_v13 = vsel %vm558_vm12, %v556_v9, %v557_v11 }
 0x699   : > { %v560_v15 = vrot.slane %v559_v13, 2 }
 0x69b   : > { %vm561_vm13 = vcmp.lt.s32.totalorder %v559_v13, %v560_v15 }
 0x69c   : > { %v562_v16 = vsel %vm561_vm13, %v559_v13, %v560_v15 }
 0x69d   : > { %v563_v18 = vrot.slane %v562_v16, 1 }
 0x69f   : > { %vm564_vm14 = vcmp.lt.s32.totalorder %v562_v16, %v563_v18 }
 0x6a0   : > { %v565_v19 = vsel %vm564_vm14, %v562_v16, %v563_v18 }
 0x6a1   : > { %1289 = vpush %v565_v19 }
 0x6a2   : > { %1291 = vpush %v617_v20  ;;  %v744_v20 = vstv %s732_s26  ;;  %s811_s26 = sld [smem:[#allocation2 + %s810_s29]] }
 0x6a3   : > { %v745_v21 = vmax.f32 %v744_v20, %v1741_v0  ;;  %v1411_v20 = vld [vmem:[#allocation6 + $0x8] sm:$0xff] }
 0x6a5   : > { %v746_v30 = vsub.f32 %v743_v27, %v745_v21  ;;  %v1413_v27 = vld [vmem:[#allocation6 + $0x18] sm:$0xff] }
 0x6a6   : > { %v828_v28 = vmin.f32 %v827_v25, %v1413_v27 }
 0x6a7   : > { %v747_v33 = vmax.f32 %v746_v30, 0.0 }
 0x6a9   : > { %v754_v36 = vmul.f32 %v753_v34, %v747_v33  ;;  %v1414_v34 = vld [vmem:[#allocation6 + $0x20] sm:$0xff] }
 0x6ab   : > { %v757_v39 = vsub.f32 %v756_v35, %v754_v36  ;;  %v835_v35 = vadd.f32 %v1414_v34, %v834_v31 }
 0x6ad   : > { %v758_v2 = vmax.f32 %v757_v39, 1e-12 }
 0x6af   : > { %1400 = vrcp.f32 %v758_v2 }
 0x6bc   : > { %v1401_v43 = vpop.eup %1400 }
 0x6d2   : > { %s1290_s22 = spop %1289 }
 0x6d3   : > { %v567_v40 = vstv %s1290_s22  ;;  %s1292_s7 = spop %1291 }
 0x6d4   : > { %vm568_vm15 = vcmp.eq.s32.totalorder %v1769_v38, %v567_v40  ;;  %v619_v42 = vstv %s1292_s7 }
 0x6d5   : > { %vm569_vm1 = vmand %vm568_vm15, %vm1839_vm0  ;;  %vm620_vm2 = vcmp.ge.f32.partialorder %v1873_v49, %v619_v42  ;;  %v762_v42 = vstv %s761_s19  ;;  %s840_s19 = scalar_select %p820_p7, 1, 0 }
 0x6d6   : > { %v1891_v44 = vsel %vm569_vm1, 3, %v1863_v46  ;;  %v621_v45 = vsel %vm620_vm2, %v1769_v38, 1024  ;;  %v1901_v46 = vsel %vm1895_vm3, %v681_v51, -1.0  ;;  %vm1923_vm8 = vcmp.eq.s32.totalorder %v762_v42, 1 }
 0x6d7   : > { %v623_v47 = vshra.s32 %v621_v45, 16  ;;  %v622_v52 = vand.u32 65535, %v621_v45  ;;  %v760_v45 = vmul.f32 %v1401_v43, %v754_v36  ;;  %v841_v43 = vstv %s840_s19  ;;  %s920_s19 = sadd.s32 19, %s1734_s4 }
 0x6d9   : > { %v625_v48 = vcvt.s32.f32 %v623_v47  ;;  %v624_v54 = vcvt.s32.f32 %v622_v52 }
 0x6db   : > { %626 = vmin.xlane.f32.xlu1 %v625_v48 }
 0x6df   : > { %689 = vmax.xlane.f32.xlu1 %v1901_v46 }
 0x764   : > { %v627_v53 = vpop.xlane.xlu1 %626 }
 0x765   : > { %vm628_vm0 = vcmp.eq.f32.partialorder %v625_v48, %v627_v53  ;;  %v633_v61 = vcvt.f32.s32 %v627_v53 }
 0x766   : > { %v629_v58 = vsel %vm628_vm0, %v624_v54, inf  ;;  %vm1944_vm0 = vcmp.eq.s32.totalorder %v841_v43, 1 }
 0x767   : > { %630 = vmin.xlane.f32.xlu0 %v629_v58  ;;  %v634_v3 = vshll.u32 %v633_v61, 16 }
 0x768   : > { %v690_v59 = vpop.xlane.xlu1 %689 }
 0x769   : > { %v691_v60 = vrot.slane %v690_v59, 4 }
 0x76b   : > { %v692_v62 = vmax.f32 %v690_v59, %v691_v60 }
 0x76d   : > { %v693_v9 = vrot.slane %v692_v62, 2 }
 0x76f   : > { %v694_v13 = vmax.f32 %v692_v62, %v693_v9 }
 0x771   : > { %v695_v16 = vrot.slane %v694_v13, 1 }
 0x773   : > { %v696_v19 = vmax.f32 %v694_v13, %v695_v16  ;;  %v1410_v16 = vld [vmem:[#allocation6] sm:$0xff] }
 0x7f0   : > { %v631_v63 = vpop.xlane.xlu0 %630 }
 0x7f1   : > { %v632_v5 = vcvt.f32.s32 %v631_v63 }
 0x7f3   : > { %v635_v7 = vadd.s32 %v634_v3, %v632_v5 }
 0x7f5   : > { %v636_v10 = vrot.slane %v635_v7, 4 }
 0x7f7   : > { %vm637_vm4 = vcmp.lt.s32.totalorder %v635_v7, %v636_v10 }
 0x7f8   : > { %v638_v11 = vsel %vm637_vm4, %v635_v7, %v636_v10 }
 0x7f9   : > { %v639_v14 = vrot.slane %v638_v11, 2 }
 0x7fb   : > { %vm640_vm5 = vcmp.lt.s32.totalorder %v638_v11, %v639_v14 }
 0x7fc   : > { %v641_v15 = vsel %vm640_vm5, %v638_v11, %v639_v14 }
 0x7fd   : > { %v642_v17 = vrot.slane %v641_v15, 1 }
 0x7ff   : > { %vm643_vm6 = vcmp.lt.s32.totalorder %v641_v15, %v642_v17 }
 0x800   : > { %v644_v18 = vsel %vm643_vm6, %v641_v15, %v642_v17  ;;  %v823_v15 = vstv %s811_s26  ;;  %s897_s26 = sadd.s32 6, %s1734_s4 }
 0x801   : > { %1293 = vpush %v644_v18  ;;  %v824_v17 = vmax.f32 %v823_v15, %v1410_v16  ;;  %v829_v18 = vstv %s813_s6  ;;  %s901_s6 = sadd.s32 8, %s1734_s4  ;;  %s1974_s27 = sld [smem:[#allocation2 + %s897_s26]] }
 0x802   : > { %1295 = vpush %v696_v19  ;;  %v821_v19 = vstv %s815_s8  ;;  %v830_v21 = vmax.f32 %v829_v18, %v1411_v20  ;;  %s903_s8 = sadd.s32 9, %s1734_s4  ;;  %s1980_s17 = sld [smem:[#allocation2 + %s901_s6]] }
 0x803   : > { %v822_v23 = vmin.f32 %v821_v19, %v1412_v22  ;;  %s1996_s26 = sld [smem:[#allocation2 + %s918_s20]]  ;;  %s948_s20 = sadd.s32 36, %s1734_s4 }
 0x804   : > { %v831_v30 = vsub.f32 %v828_v28, %v830_v21  ;;  %s1999_s6 = sld [smem:[#allocation2 + %s920_s19]] }
 0x805   : > { %v825_v29 = vsub.f32 %v822_v23, %v824_v17  ;;  %s2022_s21 = sld [smem:[#allocation2 + %s948_s20]]  ;;  %s984_s20 = sadd.s32 57, %s1734_s4 }
 0x806   : > { %v832_v33 = vmax.f32 %v831_v30, 0.0  ;;  %s2048_s12 = sld [smem:[#allocation2 + %s984_s20]]  ;;  %s999_s20 = sadd.s32 66, %s1734_s4 }
 0x807   : > { %v826_v32 = vmax.f32 %v825_v29, 0.0 }
 0x809   : > { %v833_v36 = vmul.f32 %v832_v33, %v826_v32 }
 0x80b   : > { %v836_v39 = vsub.f32 %v835_v35, %v833_v36 }
 0x80d   : > { %v837_v2 = vmax.f32 %v836_v39, 1e-12 }
 0x80f   : > { %1402 = vrcp.f32 %v837_v2 }
 0x832   : > { %s1294_s22 = spop %1293 }
 0x833   : > { %v646_v0 = vstv %s1294_s22  ;;  %s1296_s7 = spop %1295 }
 0x834   : > { %vm647_vm7 = vcmp.eq.s32.totalorder %v1769_v38, %v646_v0  ;;  %v698_v1 = vstv %s1296_s7 }
 0x835   : > { %vm648_vm9 = vmand %vm647_vm7, %vm1867_vm11  ;;  %vm699_vm10 = vcmp.ge.f32.partialorder %v1901_v46, %v698_v1 }
 0x836   : > { %v1919_v4 = vsel %vm648_vm9, 4, %v1891_v44  ;;  %v700_v40 = vsel %vm699_vm10, %v1769_v38, 1024  ;;  %v1929_v44 = vsel %vm1923_vm8, %v760_v45, -1.0  ;;  %v1403_v45 = vpop.eup %1402 }
 0x837   : > { %v702_v12 = vshra.s32 %v700_v40, 16  ;;  %v701_v47 = vand.u32 65535, %v700_v40 }
 0x839   : > { %v704_v41 = vcvt.s32.f32 %v702_v12  ;;  %v703_v24 = vcvt.s32.f32 %v701_v47  ;;  %v839_v47 = vmul.f32 %v1403_v45, %v833_v36 }
 0x83b   : > { %705 = vmin.xlane.f32.xlu0 %v704_v41 }
 0x83f   : > { %768 = vmax.xlane.f32.xlu0 %v1929_v44 }
 0x8c4   : > { %v706_v48 = vpop.xlane.xlu0 %705 }
 0x8c5   : > { %vm707_vm11 = vcmp.eq.f32.partialorder %v704_v41, %v706_v48  ;;  %v712_v53 = vcvt.f32.s32 %v706_v48 }
 0x8c6   : > { %v708_v50 = vsel %vm707_vm11, %v703_v24, inf }
 0x8c7   : > { %709 = vmin.xlane.f32.xlu1 %v708_v50  ;;  %v713_v59 = vshll.u32 %v712_v53, 16 }
 0x8c8   : > { %v769_v51 = vpop.xlane.xlu0 %768 }
 0x8c9   : > { %v770_v52 = vrot.slane %v769_v51, 4 }
 0x8cb   : > { %v771_v54 = vmax.f32 %v769_v51, %v770_v52 }
 0x8cd   : > { %v772_v62 = vrot.slane %v771_v54, 2 }
 0x8cf   : > { %v773_v5 = vmax.f32 %v771_v54, %v772_v62 }
 0x8d1   : > { %v774_v10 = vrot.slane %v773_v5, 1 }
 0x8d3   : > { %v775_v14 = vmax.f32 %v773_v5, %v774_v10 }
 0x950   : > { %v710_v58 = vpop.xlane.xlu1 %709 }
 0x951   : > { %v711_v60 = vcvt.f32.s32 %v710_v58 }
 0x953   : > { %v714_v61 = vadd.s32 %v713_v59, %v711_v60 }
 0x955   : > { %v715_v63 = vrot.slane %v714_v61, 4 }
 0x957   : > { %vm716_vm12 = vcmp.lt.s32.totalorder %v714_v61, %v715_v63 }
 0x958   : > { %v717_v3 = vsel %vm716_vm12, %v714_v61, %v715_v63 }
 0x959   : > { %v718_v7 = vrot.slane %v717_v3, 2 }
 0x95b   : > { %vm719_vm13 = vcmp.lt.s32.totalorder %v717_v3, %v718_v7 }
 0x95c   : > { %v720_v9 = vsel %vm719_vm13, %v717_v3, %v718_v7 }
 0x95d   : > { %v721_v11 = vrot.slane %v720_v9, 1 }
 0x95f   : > { %vm722_vm14 = vcmp.lt.s32.totalorder %v720_v9, %v721_v11 }
 0x960   : > { %v723_v13 = vsel %vm722_vm14, %v720_v9, %v721_v11  ;;  %vm292_vm14 = vcmp.gt.f32.partialorder %v1763_v26, -1.0 }
 0x961   : > { %1297 = vpush %v723_v13  ;;  %v293_v39 = vsel %vm292_vm14, %v1763_v26, -1.0 }
 0x962   : > { %1299 = vpush %v775_v14 }
 0x992   : > { %s1298_s22 = spop %1297 }
 0x993   : > { %v725_v0 = vstv %s1298_s22  ;;  %s1300_s7 = spop %1299  ;;  %s916_s22 = sadd.s32 17, %s1734_s4 }
 0x994   : > { %vm726_vm15 = vcmp.eq.s32.totalorder %v1769_v38, %v725_v0  ;;  %v777_v1 = vstv %s1300_s7  ;;  %s1986_s7 = sld [smem:[#allocation2 + %s903_s8]]  ;;  %s935_s8 = sadd.s32 28, %s1734_s4 }
 0x995   : > { %vm727_vm1 = vmand %vm726_vm15, %vm1895_vm3  ;;  %vm778_vm2 = vcmp.ge.f32.partialorder %v1929_v44, %v777_v1  ;;  %vm370_vm15 = vcmp.gt.f32.partialorder %v1790_v8, %v293_v39  ;;  %s2013_s19 = sld [smem:[#allocation2 + %s935_s8]] }
 0x996   : > { %v728_v40 = vsel %vm727_vm1, 5, %v1919_v4  ;;  %v779_v12 = vsel %vm778_vm2, %v1769_v38, 1024  ;;  %v1950_v4 = vsel %vm1944_vm0, %v839_v47, -1.0  ;;  %v371_v1 = vsel %vm370_vm15, %v1790_v8, %v293_v39  ;;  %s2028_s8 = sld [smem:[#allocation2 + %s952_s2]]  ;;  %s969_s2 = sadd.s32 48, %s1734_s4 }
 0x997   : > { %v781_v41 = vshra.s32 %v779_v12, 16  ;;  %v780_v48 = vand.u32 65535, %v779_v12  ;;  %vm449_vm1 = vcmp.gt.f32.partialorder %v1814_v57, %v371_v1  ;;  %s2054_s13 = sld [smem:[#allocation2 + %s969_s2]]  ;;  %s1003_s2 = sadd.s32 68, %s1734_s4 }
 0x998   : > { %v450_v2 = vsel %vm449_vm1, %v1814_v57, %v371_v1 }
 0x999   : > { %v783_v42 = vcvt.s32.f32 %v781_v41  ;;  %v782_v50 = vcvt.s32.f32 %v780_v48  ;;  %vm528_vm2 = vcmp.gt.f32.partialorder %v1845_v56, %v450_v2  ;;  %v906_v48 = vstv %s1974_s27 }
 0x99a   : > { %v529_v26 = vsel %vm528_vm2, %v1845_v56, %v450_v2 }
 0x99b   : > { %784 = vmin.xlane.f32.xlu1 %v783_v42 }
 0x99d   : > { %2345 = sst [smem:[#allocation25_spill]] %s2054_s13 }
 0x99e   : > { %s2070_s13 = sld [smem:[#allocation2 + %s999_s20]] }
 0x99f   : > { %847 = vmax.xlane.f32.xlu1 %v1950_v4  ;;  %s2089_s20 = sld [smem:[#allocation2 + %s1005_s3]]  ;;  %s1563_s3 = smov [#allocation9]  }
 0x9a4   : > { %v1008_v6 = vstv %s2070_s13 }
 0xa24   : > { %v785_v24 = vpop.xlane.xlu1 %784 }
 0xa25   : > { %vm786_vm3 = vcmp.eq.f32.partialorder %v783_v42, %v785_v24  ;;  %v791_v54 = vcvt.f32.s32 %v785_v24  ;;  %v908_v24 = vstv %s1977_s30 }
 0xa26   : > { %v787_v51 = vsel %vm786_vm3, %v782_v50, inf  ;;  %vm607_vm3 = vcmp.gt.f32.partialorder %v1873_v49, %v529_v26  ;;  %v910_v50 = vstv %s1980_s17  ;;  %s2348_s17 = sld [smem:[#allocation25_spill]] }
 0xa27   : > { %788 = vmin.xlane.f32.xlu0 %v787_v51  ;;  %v792_v60 = vshll.u32 %v791_v54, 16  ;;  %v608_v41 = vsel %vm607_vm3, %v1873_v49, %v529_v26  ;;  %v912_v51 = vstv %s1986_s7  ;;  %s2349_s7 = sld [smem:[#allocation26_spill]] }
 0xa28   : > { %v848_v52 = vpop.xlane.xlu1 %847 }
 0xa29   : > { %v849_v53 = vrot.slane %v848_v52, 4 }
 0xa2b   : > { %v850_v58 = vmax.f32 %v848_v52, %v849_v53  ;;  %v923_v52 = vstv %s1989_s23 }
 0xa2d   : > { %v851_v63 = vrot.slane %v850_v58, 2 }
 0xa2f   : > { %v852_v7 = vmax.f32 %v850_v58, %v851_v63  ;;  %v927_v58 = vstv %s1996_s26 }
 0xa31   : > { %v853_v11 = vrot.slane %v852_v7, 1 }
 0xa33   : > { %v854_v15 = vmax.f32 %v852_v7, %v853_v11  ;;  %v961_v11 = vstv %s2028_s8 }
 0xab0   : > { %v789_v59 = vpop.xlane.xlu0 %788 }
 0xab1   : > { %v790_v61 = vcvt.f32.s32 %v789_v59  ;;  %v929_v59 = vstv %s1999_s6 }
 0xab3   : > { %v793_v62 = vadd.s32 %v792_v60, %v790_v61 }
 0xab5   : > { %v794_v3 = vrot.slane %v793_v62, 4 }
 0xab7   : > { %vm795_vm4 = vcmp.lt.s32.totalorder %v793_v62, %v794_v3 }
 0xab8   : > { %v796_v5 = vsel %vm795_vm4, %v793_v62, %v794_v3  ;;  %vm686_vm4 = vcmp.gt.f32.partialorder %v1901_v46, %v608_v41  ;;  %v2108_v3 = vld [vmem:[#allocation6 + $0x58] sm:$0xff] }
 0xab9   : > { %v797_v9 = vrot.slane %v796_v5, 2  ;;  %v687_v57 = vsel %vm686_vm4, %v1901_v46, %v608_v41  ;;  %v2077_v46 = vld [vmem:[%s1727_s10 + $0x20] sm:$0xff] }
 0xabb   : > { %vm798_vm5 = vcmp.lt.s32.totalorder %v796_v5, %v797_v9 }
 0xabc   : > { %v799_v10 = vsel %vm798_vm5, %v796_v5, %v797_v9  ;;  %vm765_vm5 = vcmp.gt.f32.partialorder %v1929_v44, %v687_v57  ;;  %v957_v9 = vstv %s2022_s21  ;;  %s1022_s21 = sadd.s32 79, %s1734_s4 }
 0xabd   : > { %v800_v13 = vrot.slane %v799_v10, 1  ;;  %v766_v43 = vsel %vm765_vm5, %v1929_v44, %v687_v57  ;;  %v2080_v44 = vld [vmem:[%s1727_s10 + $0x28] sm:$0xff] }
 0xabe   : > { %v1091_v60 = vsub.f32 %v2077_v46, %v2080_v44  ;;  %v1092_v61 = vsub.f32 %v2080_v44, %v2077_v46  ;;  %v225_v44 = vld [vmem:[#allocation6 + $0x28] sm:$0xff] }
 0xabf   : > { %vm801_vm6 = vcmp.lt.s32.totalorder %v799_v10, %v800_v13 }
 0xac0   : > { %v802_v14 = vsel %vm801_vm6, %v799_v10, %v800_v13  ;;  %vm844_vm6 = vcmp.gt.f32.partialorder %v1950_v4, %v766_v43 }
 0xac1   : > { %1301 = vpush %v802_v14  ;;  %v845_v54 = vsel %vm844_vm6, %v1950_v4, %v766_v43  ;;  %v976_v14 = vstv %s2039_s15  ;;  %s1020_s15 = sadd.s32 78, %s1734_s4 }
 0xac2   : > { %1303 = vpush %v854_v15  ;;  %v991_v15 = vstv %s2042_s25  ;;  %s2146_s25 = sld [smem:[#allocation2 + %s1022_s21]] }
 0xaf2   : > { %s1302_s29 = spop %1301 }
 0xaf3   : > { %v804_v16 = vstv %s1302_s29  ;;  %s1304_s5 = spop %1303  ;;  %s1992_s29 = sld [smem:[#allocation2 + %s916_s22]] }
 0xaf4   : > { %vm805_vm7 = vcmp.eq.s32.totalorder %v1769_v38, %v804_v16  ;;  %v856_v17 = vstv %s1304_s5  ;;  %s931_s5 = sadd.s32 26, %s1734_s4  ;;  %s2010_s22 = sld [smem:[#allocation2 + %s933_s9]]  ;;  %v993_v16 = vstv %s2048_s12 }
 0xaf5   : > { %vm806_vm9 = vmand %vm805_vm7, %vm1923_vm8  ;;  %vm857_vm10 = vcmp.ge.f32.partialorder %v1950_v4, %v856_v17  ;;  %s2002_s0 = sld [smem:[#allocation2 + %s931_s5]]  ;;  %v944_v4 = vstv %s2013_s19 }
 0xaf6   : > { %v1957_v18 = vsel %vm806_vm9, 6, %v728_v40  ;;  %v858_v19 = vsel %vm857_vm10, %v1769_v38, 1024  ;;  %v1560_v40 = vmov 0   ;;  %s2016_s5 = sld [smem:[#allocation2 + %s937_s11]]  ;;  %vm238_vm10 = vcmp.gt.f32.partialorder %v2108_v3, 0.5 }
 0xaf7   : > { %v860_v20 = vshra.s32 %v858_v19, 16  ;;  %v859_v22 = vand.u32 65535, %v858_v19  ;;  %v372_v12 = vsel %vm370_vm15, 1, %v1560_v40  ;;  %s2025_s9 = sld [smem:[#allocation2 + %s950_s1]]  ;;  %s954_s1 = sadd.s32 39, %s1734_s4  ;;  %v978_v19 = vstv %s2348_s17 }
 0xaf8   : > { %v451_v8 = vsel %vm449_vm1, 2, %v372_v12  ;;  %s2036_s11 = sld [smem:[#allocation2 + %s965_s14]] }
 0xaf9   : > { %v862_v21 = vcvt.s32.f32 %v860_v20  ;;  %v861_v25 = vcvt.s32.f32 %v859_v22  ;;  %v530_v42 = vsel %vm528_vm2, 3, %v451_v8  ;;  %s2051_s14 = sld [smem:[#allocation2 + %s954_s1]]  ;;  %s1001_s1 = sadd.s32 67, %s1734_s4  ;;  %v925_v53 = vstv %s1992_s29 }
 0xafa   : > { %v609_v56 = vsel %vm607_vm3, 4, %v530_v42  ;;  %s2073_s28 = sld [smem:[#allocation2 + %s1001_s1]]  ;;  %v942_v63 = vstv %s2010_s22  ;;  %v980_v20 = vstv %s2349_s7 }
 0xafb   : > { %863 = vmin.xlane.f32.xlu0 %v862_v21  ;;  %v688_v49 = vsel %vm686_vm4, 5, %v609_v56  ;;  %s2097_s1 = sld [smem:[#allocation2 + %s1016_s24]]  ;;  %v940_v62 = vstv %s2002_s0  ;;  %s1018_s0 = sadd.s32 77, %s1734_s4 }
 0xafc   : > { %v767_v45 = vsel %vm765_vm5, 6, %v688_v49  ;;  %v946_v7 = vstv %s2016_s5  ;;  %s2137_s12 = sld [smem:[#allocation2 + %s1018_s0]]  ;;  %s1484_s24 = sshll.u32 %s1563_s3, 4  ;;  %s1485_s24 = int_to_ptr.vmem [resolvable:$false] %s1484_s24 }
 0xafd   : > { %v846_v47 = vsel %vm844_vm6, 7, %v767_v45  ;;  %v959_v10 = vstv %s2025_s9  ;;  %s2356_s22 = sld [smem:[#allocation21_spill]] }
 0xafe   : > { %v974_v13 = vstv %s2036_s11  ;;  %s2357_s11 = sld [smem:[#allocation30_spill]] }
 0xaff   : > { %2344 = sst [smem:[#allocation24_spill]] %s2051_s14 }
 0xb00   : > { %s2066_s14 = sld [smem:[#allocation2 + %s988_s18]] }
 0xb01   : > { %s2082_s18 = sld [smem:[#allocation2 + %s1003_s2]] }
 0xb02   : > { %s2347_s30 = sld [smem:[#allocation24_spill]] }
 0xb03   : > { %p2358_p5 = scmp.ne.s32.totalorder %s2356_s22, 0 }
 0xb06   : > { %v997_v22 = vstv %s2066_s14 }
 0xb08   : > { %v963_v17 = vstv %s2347_s30 }
 0xb84   : > { %v864_v23 = vpop.xlane.xlu0 %863 }
 0xb85   : > { %vm865_vm11 = vcmp.eq.f32.partialorder %v862_v21, %v864_v23  ;;  %v870_v28 = vcvt.f32.s32 %v864_v23  ;;  %v995_v21 = vstv %s2063_s16  ;;  %v1010_v23 = vstv %s2073_s28  ;;  %s2144_s16 = sld [smem:[#allocation2 + %s1020_s15]] }
 0xb86   : > { %v866_v27 = vsel %vm865_vm11, %v861_v25, inf  ;;  %v1012_v25 = vstv %s2082_s18  ;;  %s2354_s28 = sld [smem:[#allocation18_spill]]  ;;  %s1486_s18 = scalar_lea.vmem %s1485_s24, 32 }
 0xb87   : > { %867 = vmin.xlane.f32.xlu1 %v866_v27  ;;  %v871_v30 = vshll.u32 %v870_v28, 16 }
 0xb8c   : > { %s1269_s6 = sshll.u32 %s2354_s28, 4 }
 0xb8d   : > { %s2238_s14 = scalar_lea.hbm %s2357_s11, %s1269_s6 }
 0xc10   : > { %v868_v29 = vpop.xlane.xlu1 %867 }
 0xc11   : > { %v869_v55 = vcvt.f32.s32 %v868_v29  ;;  %v1014_v29 = vstv %s2089_s20 }
 0xc13   : > { %v872_v31 = vadd.s32 %v871_v30, %v869_v55  ;;  %v1025_v30 = vstv %s2097_s1 }
 0xc15   : > { %v873_v32 = vrot.slane %v872_v31, 4 }
 0xc17   : > { %vm874_vm8 = vcmp.lt.s32.totalorder %v872_v31, %v873_v32 }
 0xc18   : > { %v875_v33 = vsel %vm874_vm8, %v872_v31, %v873_v32 }
 0xc19   : > { %v876_v34 = vrot.slane %v875_v33, 2 }
 0xc1b   : > { %vm877_vm12 = vcmp.lt.s32.totalorder %v875_v33, %v876_v34 }
 0xc1c   : > { %v878_v35 = vsel %vm877_vm12, %v875_v33, %v876_v34 }
 0xc1d   : > { %v879_v36 = vrot.slane %v878_v35, 1 }
 0xc1f   : > { %vm880_vm13 = vcmp.lt.s32.totalorder %v878_v35, %v879_v36 }
 0xc20   : > { %v881_v0 = vsel %vm880_vm13, %v878_v35, %v879_v36 }
 0xc21   : > { %1305 = vpush %v881_v0 }
 0xc52   : > { %s1306_s27 = spop %1305 }
 0xc53   : > { %v883_v5 = vstv %s1306_s27 }
 0xc54   : > { %vm884_vm7 = vcmp.eq.s32.totalorder %v1769_v38, %v883_v5 }
 0xc55   : > { %vm885_vm9 = vmand %vm884_vm7, %vm1944_vm0 }
 0xc56   : > { %v886_v38 = vsel %vm885_vm9, 7, %v1957_v18 }
 0xc57   : > { %vm887_vm11 = vcmp.ge.s32.totalorder %v886_v38, 0 }
 0xc58   : > { %v2134_v27 = vsel %vm887_vm11, %v886_v38, %v846_v47  ;;  %v888_v28 = vsel %vm887_vm11, 2.0, %v845_v54  ;;  %v1027_v47 = vstv %s2137_s12  ;;  %v227_v54 = vld [vmem:[#allocation6 + $0x30] sm:$0xff] }
 0xc59   : > { %vm905_vm0 = vcmp.eq.s32.totalorder %v2134_v27, 0  ;;  %vm922_vm8 = vcmp.eq.s32.totalorder %v2134_v27, 1  ;;  %vm939_vm12 = vcmp.eq.s32.totalorder %v2134_v27, 2  ;;  %vm956_vm13 = vcmp.eq.s32.totalorder %v2134_v27, 3  ;;  %v246_v38 = vld [vmem:[%s1727_s10] sm:$0xff] }
 0xc5a   : > { %v907_v18 = vsel %vm905_vm0, %v906_v48, 0.0  ;;  %v909_v55 = vsel %vm905_vm0, %v908_v24, 0.0  ;;  %v911_v31 = vsel %vm905_vm0, %v910_v50, 0.0  ;;  %v913_v32 = vsel %vm905_vm0, %v912_v51, 0.0 }
 0xc5b   : > { %v924_v33 = vsel %vm922_vm8, %v923_v52, %v907_v18  ;;  %v926_v34 = vsel %vm922_vm8, %v925_v53, %v909_v55  ;;  %v928_v35 = vsel %vm922_vm8, %v927_v58, %v911_v31  ;;  %v930_v36 = vsel %vm922_vm8, %v929_v59, %v913_v32 }
 0xc5c   : > { %v941_v0 = vsel %vm939_vm12, %v940_v62, %v924_v33  ;;  %v943_v39 = vsel %vm939_vm12, %v942_v63, %v926_v34  ;;  %v945_v1 = vsel %vm939_vm12, %v944_v4, %v928_v35  ;;  %v947_v2 = vsel %vm939_vm12, %v946_v7, %v930_v36  ;;  %v233_v62 = vld [vmem:[#allocation6 + $0x48] sm:$0xff]  ;;  %v235_v63 = vld [vmem:[#allocation6 + $0x50] sm:$0xff]  ;;  %v229_v7 = vld [vmem:[#allocation6 + $0x38] sm:$0xff] }
 0xc5d   : > { %v958_v26 = vsel %vm956_vm13, %v957_v9, %v941_v0  ;;  %v960_v40 = vsel %vm956_vm13, %v959_v10, %v943_v39  ;;  %v962_v12 = vsel %vm956_vm13, %v961_v11, %v945_v1  ;;  %vm973_vm14 = vcmp.eq.s32.totalorder %v2134_v27, 4  ;;  %v231_v9 = vld [vmem:[#allocation6 + $0x40] sm:$0xff] }
 0xc5e   : > { %v975_v41 = vsel %vm973_vm14, %v974_v13, %v958_v26  ;;  %v977_v8 = vsel %vm973_vm14, %v976_v14, %v960_v40  ;;  %vm990_vm15 = vcmp.eq.s32.totalorder %v2134_v27, 5  ;;  %vm1007_vm1 = vcmp.eq.s32.totalorder %v2134_v27, 6 }
 0xc5f   : > { %v992_v42 = vsel %vm990_vm15, %v991_v15, %v975_v41  ;;  %v994_v57 = vsel %vm990_vm15, %v993_v16, %v977_v8  ;;  %vm890_vm2 = vcmp.ge.f32.partialorder %v888_v28, 0.5  ;;  %vm892_vm3 = vcmp.lt.f32.partialorder %v888_v28, 0.5 }
 0xc60   : > { %vm2167_vm4 = vmand %vm890_vm2, %vm238_vm10  ;;  %v964_v49 = vsel %vm956_vm13, %v963_v17, %v947_v2  ;;  %v979_v43 = vsel %vm973_vm14, %v978_v19, %v962_v12  ;;  %v1009_v45 = vsel %vm1007_vm1, %v1008_v6, %v992_v42  ;;  %v1561_v48 = vmov 0.0   ;;  %v1259_v6 = vld [vmem:[%s1727_s10 + $0x10] sm:$0xff] }
 0xc61   : > { %v2180_v24 = vsel %vm2167_vm4, 1.0, %v1561_v48  ;;  %v2190_v50 = vsel %vm2167_vm4, %v1091_v60, %v1092_v61  ;;  %vm893_vm5 = vmor %vm892_vm3, %vm890_vm2  ;;  %v981_v51 = vsel %vm973_vm14, %v980_v20, %v964_v49  ;;  %v1011_v52 = vsel %vm1007_vm1, %v1010_v23, %v994_v57  ;;  %v1258_v20 = vld [vmem:[%s1727_s10 + $0x8] sm:$0xff]  ;;  %v1260_v23 = vld [vmem:[%s1727_s10 + $0x18] sm:$0xff]  ;;  %s2355_s10 = sld [smem:[#allocation23_spill]] }
 0xc62   : > { %v1095_v53 = vand.u32 2147483647, %v2190_v50  ;;  %1082 = vadd.xlane.f32.xlu1 %v2180_v24  ;;  %vm2200_vm6 = vmand %vm893_vm5, %vm238_vm10  ;;  %v996_v58 = vsel %vm990_vm15, %v995_v21, %v979_v43  ;;  %v1029_v59 = vstv %s2144_s16  ;;  %v1031_v60 = vstv %s2146_s25 }
 0xc63   : > { %v1268_v61 = vsel %vm2200_vm6, 1.0, %v1561_v48  ;;  %v998_v4 = vsel %vm990_vm15, %v997_v22, %v981_v51  ;;  %v1013_v3 = vsel %vm1007_vm1, %v1012_v25, %v996_v58  ;;  %vm1024_vm7 = vcmp.eq.s32.totalorder %v2134_v27, 7 }
 0xc64   : > { %v1096_v5 = vsub.f32 0.0, %v1095_v53  ;;  %v1015_v10 = vsel %vm1007_vm1, %v1014_v29, %v998_v4  ;;  %v1026_v11 = vsel %vm1024_vm7, %v1025_v30, %v1009_v45  ;;  %v1028_v13 = vsel %vm1024_vm7, %v1027_v47, %v1011_v52 }
 0xc65   : > { %v1030_v14 = vsel %vm1024_vm7, %v1029_v59, %v1013_v3  ;;  %v1032_v15 = vsel %vm1024_vm7, %v1031_v60, %v1015_v10  ;;  %v1033_v16 = vsub.f32 %v1026_v11, %v225_v44  ;;  %v1035_v17 = vsub.f32 %v1028_v13, %v227_v54 }
 0xc66   : > { %v1097_v19 = vmul.f32 1.442695, %v1096_v5  ;;  %1124 = vadd.xlane.f32.xlu1 %v1268_v61  ;;  %v1037_v21 = vsub.f32 %v1030_v14, %v233_v62  ;;  %v1039_v22 = vsub.f32 %v1032_v15, %v235_v63  ;;  %v1094_v59 = vmax.f32 %v2190_v50, 0.0 }
 0xc67   : > { %v1034_v25 = vmul.f32 %v1033_v16, %v229_v7  ;;  %v1036_v28 = vmul.f32 %v1035_v17, %v231_v9  ;;  %v1562_v3 = vmov 0.9   ;;  %vm1136_vm8 = vcmp.eq.s32.totalorder %v1766_v37, 3  ;;  %s214_s19 = scalar_lea.vmem [#allocation9], %s2355_s10  ;;  %s1147_s13 = scalar_lea.sflag [#allocation4], %s2355_s10 }
 0xc68   : > { %1404 = vpow2.f32 %v1097_v19  ;;  %v1038_v18 = vmul.f32 5.0, %v1037_v21  ;;  %v1040_v27 = vmul.f32 5.0, %v1039_v22  ;;  %v1106_v5 = vsel %vm2167_vm4, 0.1, %v1562_v3  ;;  %s1159_s5 = sshll.u32 %s214_s19, 4  ;;  %s1160_s5 = int_to_ptr.vmem [resolvable:$true] %s1159_s5 }
 0xc69   : > { %v1041_v29 = vsub.f32 %v246_v38, %v1034_v25  ;;  %v1048_v30 = vsub.f32 %v1258_v20, %v1036_v28  ;;  %v1109_v9 = vsub.f32 0.0, %v1106_v5  ;;  %vm1135_vm12 = vcmp.eq.s32.totalorder %v1766_v37, 2  ;;  %s1480_s2 = scalar_lea.vmem %s1160_s5, 16  ;;  %p1487_p12 = scmp.lt.s32.totalorder %s1160_s5, %s1485_s24 }
 0xc6a   : > { %v1056_v55 = vsub.f32 %v1259_v6, %v1038_v18  ;;  %v1064_v31 = vsub.f32 %v1260_v23, %v1040_v27  ;;  %vm1134_vm13 = vcmp.eq.s32.totalorder %v1766_v37, 1  ;;  %vm1133_vm14 = vcmp.eq.s32.totalorder %v1766_v37, 0  ;;  %p1481_p1 = scmp.ne.s32.totalorder %s1160_s5, %s1480_s2  ;;  %p1488_p13 = scmp.lt.s32.totalorder %s1486_s18, %s1480_s2 }
 0xc6b   : > { %v1042_v32 = vand.u32 2147483647, %v1041_v29  ;;  %v1044_v33 = vmul.f32 0.5, %v1041_v29  ;;  %v1049_v34 = vand.u32 2147483647, %v1048_v30  ;;  %v1051_v35 = vmul.f32 0.5, %v1048_v30 }
 0xc6c   : > { %v1057_v36 = vand.u32 2147483647, %v1056_v55  ;;  %v1059_v0 = vmul.f32 0.5, %v1056_v55  ;;  %v1065_v39 = vand.u32 2147483647, %v1064_v31  ;;  %v1067_v1 = vmul.f32 0.5, %v1064_v31  ;;  %p1482_p8 = pnand %p1481_p1, %p2358_p5  ;;  %p1489_p3 = por %p1488_p13, %p1487_p12 }
 0xc6d   : > { %vm1043_vm9 = vcmp.lt.f32.partialorder %v1042_v32, 1.0  ;;  %v1045_v2 = vmul.f32 %v1044_v33, %v1041_v29  ;;  %v1264_v26 = vadd.f32 -0.5, %v1042_v32  ;;  %vm1050_vm10 = vcmp.lt.f32.partialorder %v1049_v34, 1.0 }
 0xc6e   : > { %v1052_v40 = vmul.f32 %v1051_v35, %v1048_v30  ;;  %v1265_v12 = vadd.f32 -0.5, %v1049_v34  ;;  %v1060_v41 = vmul.f32 %v1059_v0, %v1056_v55  ;;  %vm1058_vm11 = vcmp.lt.f32.partialorder %v1057_v36, 1.0  ;;  %p1483_p11 = pneg %p1482_p8 }
 0xc6f   : > { %v1047_v8 = vsel %vm1043_vm9, %v1045_v2, %v1264_v26  ;;  %v1266_v42 = vadd.f32 -0.5, %v1057_v36  ;;  %v1068_v49 = vmul.f32 %v1067_v1, %v1064_v31  ;;  %v1267_v43 = vadd.f32 -0.5, %v1065_v39 }
 0xc70   : > { %v1054_v57 = vsel %vm1050_vm10, %v1052_v40, %v1265_v12  ;;  %vm1066_vm0 = vcmp.lt.f32.partialorder %v1065_v39, 1.0  ;;  %p1490_p9 = pnand %p1489_p3, %p1483_p11 }
 0xc71   : > { %v1055_v45 = vadd.f32 %v1054_v57, %v1047_v8  ;;  %v1062_v47 = vsel %vm1058_vm11, %v1060_v41, %v1266_v42  ;;  %v1070_v51 = vsel %vm1066_vm0, %v1068_v49, %v1267_v43 }
 0xc73   : > { %v1063_v48 = vadd.f32 %v1062_v47, %v1055_v45 }
 0xc75   : > { %v1405_v52 = vpop.eup %1404  ;;  %v1071_v53 = vadd.f32 %v1070_v51, %v1063_v48 }
 0xc76   : > { %v1099_v44 = vadd.f32 1.0, %v1405_v52 }
 0xc77   : > { %v1072_v54 = vmul.f32 %v2180_v24, %v1071_v53 }
 0xc78   : > { %1406 = vlog2.f32 %v1099_v44 }
 0xc79   : > { %1073 = vadd.xlane.f32.xlu0 %v1072_v54 }
 0xc85   : > { %v1407_v58 = vpop.eup %1406 }
 0xc86   : > { %v1101_v60 = vmul.f32 0.6931472, %v1407_v58 }
 0xc88   : > { %v1102_v61 = vadd.f32 %v1101_v60, %v1094_v59 }
 0xc8a   : > { %v1103_v62 = vsub.f32 0.0, %v1102_v61 }
 0xc8c   : > { %v1104_v63 = vmul.f32 1.442695, %v1103_v62 }
 0xc8e   : > { %1408 = vpow2.f32 %v1104_v63 }
 0xc9b   : > { %v1409_v4 = vpop.eup %1408 }
 0xc9c   : > { %v1107_v7 = vsub.f32 1.0, %v1409_v4 }
 0xc9e   : > { %v1108_v10 = vmul.f32 %v1107_v7, %v1107_v7 }
 0xca0   : > { %v1110_v11 = vmul.f32 %v1109_v9, %v1108_v10 }
 0xca2   : > { %v1111_v24 = vmul.f32 %v1110_v11, %v1103_v62 }
 0xca4   : > { %v1112_v13 = vsel %vm2200_vm6, %v1111_v24, 0.0 }
 0xca5   : > { %1113 = vadd.xlane.f32.xlu0 %v1112_v13 }
 0xceb   : > { %v1083_v50 = vpop.xlane.xlu1 %1082 }
 0xcec   : > { %v1084_v14 = vrot.slane %v1083_v50, 4 }
 0xcee   : > { %v1085_v15 = vadd.f32 %v1084_v14, %v1083_v50 }
 0xcef   : > { %v1125_v28 = vpop.xlane.xlu1 %1124 }
 0xcf0   : > { %v1086_v16 = vrot.slane %v1085_v15, 2  ;;  %v1126_v46 = vrot.slane %v1125_v28, 4 }
 0xcf2   : > { %v1087_v20 = vadd.f32 %v1086_v16, %v1085_v15  ;;  %v1127_v18 = vadd.f32 %v1126_v46, %v1125_v28 }
 0xcf4   : > { %v1088_v22 = vrot.slane %v1087_v20, 1  ;;  %v1128_v27 = vrot.slane %v1127_v18, 2 }
 0xcf6   : > { %v1089_v25 = vadd.f32 %v1088_v22, %v1087_v20  ;;  %v1129_v31 = vadd.f32 %v1128_v27, %v1127_v18 }
 0xcf8   : > { %v1130_v34 = vrot.slane %v1129_v31, 1 }
 0xcfa   : > { %v1131_v0 = vadd.f32 %v1130_v34, %v1129_v31 }
 0xd02   : > { %v1074_v17 = vpop.xlane.xlu0 %1073 }
 0xd03   : > { %v1075_v19 = vrot.slane %v1074_v17, 4 }
 0xd05   : > { %v1076_v38 = vadd.f32 %v1075_v19, %v1074_v17 }
 0xd07   : > { %v1077_v21 = vrot.slane %v1076_v38, 2 }
 0xd09   : > { %v1078_v56 = vadd.f32 %v1077_v21, %v1076_v38 }
 0xd0b   : > { %v1079_v6 = vrot.slane %v1078_v56, 1 }
 0xd0d   : > { %v1080_v23 = vadd.f32 %v1079_v6, %v1078_v56 }
 0xd0f   : > { %1307 = vpush %v1080_v23 }
 0xd10   : > { %1309 = vpush %v1089_v25 }
 0xd2e   : > { %v1114_v29 = vpop.xlane.xlu0 %1113 }
 0xd2f   : > { %v1115_v30 = vrot.slane %v1114_v29, 4 }
 0xd31   : > { %v1116_v55 = vadd.f32 %v1115_v30, %v1114_v29 }
 0xd33   : > { %v1117_v32 = vrot.slane %v1116_v55, 2 }
 0xd35   : > { %v1118_v33 = vadd.f32 %v1117_v32, %v1116_v55 }
 0xd37   : > { %v1119_v35 = vrot.slane %v1118_v33, 1 }
 0xd39   : > { %v1120_v36 = vadd.f32 %v1119_v35, %v1118_v33 }
 0xd3b   : > { %1311 = vpush %v1120_v36 }
 0xd3c   : > { %1313 = vpush %v1131_v0 }
 0xd40   : > { %s1308_s4 = spop %1307 }
 0xd41   : > { %s1310_s23 = spop %1309  ;;  %v1143_v12 = vstv %s1308_s4 }
 0xd42   : > { %v1141_v26 = vstv %s1310_s23 }
 0xd6c   : > { %s1312_s29 = spop %1311 }
 0xd6d   : > { %v1139_v39 = vstv %s1312_s29  ;;  %s1314_s26 = spop %1313 }
 0xd6e   : > { %v1137_v1 = vstv %s1314_s26 }
 0xd6f   : > { %v1138_v2 = vsel %vm1136_vm8, %v1137_v1, 0.0 }
 0xd70   : > { %v1140_v40 = vsel %vm1135_vm12, %v1139_v39, %v1138_v2 }
 0xd71   : > { %v1142_v41 = vsel %vm1134_vm13, %v1141_v26, %v1140_v40 }
 0xd72   : > { %v1144_v8 = vsel %vm1133_vm14, %v1143_v12, %v1142_v41 }
 0xd73   : > { %1145 = vst [vmem:[%s214_s19] sm:$0x1] %v1144_v8 }
 0xd74   : > { %1493 = shalt.err (!%p1490_p9)
}
 0xd75   : > { %s1494_s20 = scalar_lea.hbm %s2238_s14, 16  ;;  %s1498_s30 = scalar_lea.hbm %s2357_s11, 32 }
 0xd76   : > { %p1495_p4 = scmp.ne.s32.totalorder %s2238_s14, %s1494_s20  ;;  %p1499_p0 = scmp.lt.s32.totalorder %s2238_s14, %s2357_s11 }
 0xd77   : > { %p1500_p6 = scmp.lt.s32.totalorder %s1498_s30, %s1494_s20 }
 0xd78   : > { %p1496_p10 = pnand %p1495_p4, %p2358_p5 }
 0xd79   : > { %p1501_p7 = por %p1500_p6, %p1499_p0 }
 0xd7a   : > { %p1497_p2 = pneg %p1496_p10 }
 0xd7c   : > { %p1502_p1 = pnand %p1501_p7, %p1497_p2 }
 0xd7e   : > { %1505 = shalt.err (!%p1502_p1)
}
 0xd7f   : > { %1325 = dma.vmem_to_hbm [thread:$0]  (%p2358_p5), %s1160_s5, 16, %s2238_s14, %s1147_s13  }
 0xd80 PF: > { %s2359_s0 = sld [smem:[#allocation14_spill]] }
 0xd81   : > { %s2360_s15 = sld [smem:[#allocation22_spill]] }
 0xd82   : > { %s2361_s21 = sld [smem:[#allocation17_spill]] }
 0xd86   : > { %s1171_s12 = sand.u32 1, %s2359_s0  }
 0xd87   : > { %p2362_p8 = scmp.ne.s32.totalorder %s2360_s15, 0  ;;  %s1172_s16 = scalar_lea.sflag [#allocation4], %s1171_s12 }
 0xd88   : > { %p2363_p11 = scmp.ge.s32.totalorder %s2361_s21, 2 }
 0xd8a   : > { %p1339_p12 = pnand %p2363_p11, %p2362_p8 }
 0xd8c   : > { %p1340_p13 = pneg %p1339_p12 }
 0xd8e   : > { %1535 = dma.done.wait (%p1340_p13), %s1172_s16, 16  }
 0xd8f   : > { %1537 = vsyncadd (%p1340_p13), %s1172_s16, 4294967280  ;;  %s2364_s15 = sld [smem:[#allocation19_spill]] }
 0xd90   : > { %s2365_s12 = sld [smem:[#allocation15_spill]] }
 0xd91   : > { %s2366_s13 = sld [smem:[#allocation16_spill]] }
 0xd92   : > { %s2367_s14 = sld [smem:[#allocation20_spill]] }
 0xd95   : > { %p18_p3 = scmp.ge.s32.totalorder %s2364_s15, 4  }
 0xd97   :  { %20 = sbr.rel (!%p18_p3) target bundleno = 12 (0xc), region = 103 }
 0xd9c   :  { %1176 = vsyncpa [#allocation3], 1 }
 0xd9d   :  { %1178 = vsyncpa [#allocation3 + $0x1], 1 }
 0xd9e   :  { %1179 = vsyncpa [#allocation8], 1 }
 0xd9f   :  { %1181 = vsyncpa [#allocation8 + $0x1], 1 }
 0xda0   :  { %1182 = vsyncpa [#allocation4], 1 }
 0xda1   :  { %1184 = vsyncpa [#allocation4 + $0x1], 1 }
 0xda2   :  { %1185 = vsyncpa [#allocation5], 1 }
 0xda3   :  { %1187 = vsyncpa [#allocation5 + $0x1], 1 }

</bundles_post_ra>
